<compile_context>
chip_gen: v6e
topology: v6e:2x2x1
jax: 0.10.0
libtpu: 0.0.40
codegen_flags: <defaults>
</compile_context>

<pallas_src>
import functools

import jax
import jax.numpy as jnp
from jax import lax
from jax.experimental import pallas as pl
from jax.experimental.pallas import tpu as pltpu


def _round_up(x, m):
    return ((x + m - 1) // m) * m


# ----------------------------------------------------------------------------
# Fused encoder kernel: one grid step = one (batch tile, GRU layer).
# Scratch persists across the layer axis; outputs are written at l == L-1.
# ----------------------------------------------------------------------------
def _encoder_kernel(lens_ref, x_ref,
                    wih_f_ref, wih_b_ref, whh_f_ref, whh_b_ref,
                    bih_f_ref, bih_b_ref, bhh_f_ref, bhh_b_ref,
                    fcw_f_ref, fcw_b_ref, fcb_ref,
                    states_ref, lasth_ref,
                    inbuf, outf, outb, gif, gib, fcacc,
                    *, T, W, Btile, Hp, Dp, L):
    l = pl.program_id(1)
    H3 = 3 * Hp
    n_chunks = T // W
    bf16 = jnp.bfloat16

    # Once per batch tile (layer 0): stage this tile's embedded inputs into
    # the layer-input buffer and reset the fc accumulator.
    @pl.when(l == 0)
    def _():
        inbuf[...] = x_ref[...].reshape(T * Btile, Dp)
        fcacc[...] = jnp.zeros_like(fcacc)

    lens_v = lens_ref[...]                                  # (Btile, 1) int32

    # Per-layer weights (bf16 for the MXU); bias broadcasts hoisted.
    wih_f = wih_f_ref[0]                                    # (Dp, 3Hp)
    wih_b = wih_b_ref[0]
    whh_f = whh_f_ref[0]                                    # (Hp, 3Hp)
    whh_b = whh_b_ref[0]
    bih_f = bih_f_ref[0]                                    # (1, 3Hp) f32
    bih_b = bih_b_ref[0]
    bhh_f = jnp.broadcast_to(bhh_f_ref[0], (Btile, H3))
    bhh_b = jnp.broadcast_to(bhh_b_ref[0], (Btile, H3))

    def gru_cell(gi, gh, h_prev):
        # all slices are 128-lane aligned (Hp multiple of 128)
        r = jax.nn.sigmoid(gi[:, 0:Hp] + gh[:, 0:Hp])
        z = jax.nn.sigmoid(gi[:, Hp:2 * Hp] + gh[:, Hp:2 * Hp])
        n = jnp.tanh(gi[:, 2 * Hp:H3] + r * gh[:, 2 * Hp:H3])
        return (1.0 - z) * n + z * h_prev

    def chunk_body(c, carry):
        h_f, h_b = carry
        # windowed input projection (both directions), one matmul each
        rf = pl.multiple_of(c * (W * Btile), Btile)
        rb = pl.multiple_of((T - (c + 1) * W) * Btile, Btile)
        xf = inbuf[pl.ds(rf, W * Btile), :].astype(bf16)
        xb = inbuf[pl.ds(rb, W * Btile), :].astype(bf16)
        gif[...] = jnp.dot(xf, wih_f, preferred_element_type=jnp.float32) + bih_f
        gib[...] = jnp.dot(xb, wih_b, preferred_element_type=jnp.float32) + bih_b

        for w in range(W):                      # unrolled: static gi offsets
            t_f = c * W + w
            t_b = T - 1 - t_f
            gh_f = jnp.dot(h_f.astype(bf16), whh_f,
                           preferred_element_type=jnp.float32) + bhh_f
            gh_b = jnp.dot(h_b.astype(bf16), whh_b,
                           preferred_element_type=jnp.float32) + bhh_b
            gi_f = gif[pl.ds(w * Btile, Btile), :]
            gi_b = gib[pl.ds((W - 1 - w) * Btile, Btile), :]
            mf = t_f < lens_v                   # (Btile, 1) bool
            mb = t_b < lens_v
            # freeze hidden state past each sequence's length (h_0 == 0)
            h_f = jnp.where(mf, gru_cell(gi_f, gh_f, h_f), h_f)
            h_b = jnp.where(mb, gru_cell(gi_b, gh_b, h_b), h_b)
            # padded output steps are zero (pad_packed_sequence semantics)
            outf[pl.ds(pl.multiple_of(t_f * Btile, Btile), Btile), :] = (
                jnp.where(mf, h_f, 0.0))
            outb[pl.ds(pl.multiple_of(t_b * Btile, Btile), Btile), :] = (
                jnp.where(mb, h_b, 0.0))
        return h_f, h_b

    h0 = jnp.zeros((Btile, Hp), jnp.float32)
    h_f, h_b = lax.fori_loop(0, n_chunks, chunk_body, (h0, h0))

    # This layer's contribution to fc(concat(last hiddens)); torch h_n order
    # (layer0-fwd, layer0-bwd, layer1-fwd, ...) is baked into the fc slabs.
    fcacc[...] += (
        jnp.dot(h_f.astype(bf16), fcw_f_ref[0], preferred_element_type=jnp.float32)
        + jnp.dot(h_b.astype(bf16), fcw_b_ref[0], preferred_element_type=jnp.float32))

    @pl.when(l < L - 1)
    def _():
        # next layer's input = [fwd | bwd] outputs of this layer.
        # (columns >= 2*Hp, if any, only carry layer-0 embedding padding and
        #  the corresponding wih rows of later layers are zero.)
        inbuf[:, 0:Hp] = outf[...]
        inbuf[:, Hp:2 * Hp] = outb[...]

    @pl.when(l == L - 1)
    def _():
        states_ref[:, :, 0:Hp] = outf[...].reshape(T, Btile, Hp)
        states_ref[:, :, Hp:2 * Hp] = outb[...].reshape(T, Btile, Hp)
        lasth_ref[...] = jnp.tanh(fcacc[...] + fcb_ref[...])


def _vmem_budget_bytes(*, T, W, Btile, Hp, Dp, Op):
    f32, bf16 = 4, 2
    H3 = 3 * Hp
    scratch = (T * Btile * Dp + 2 * T * Btile * Hp
               + 2 * W * Btile * H3 + Btile * Op) * f32
    ins = (Btile * 4
           + T * Btile * Dp * f32
           + 2 * Dp * H3 * bf16
           + 2 * Hp * H3 * bf16
           + 4 * H3 * f32
           + 2 * Hp * Op * bf16
           + Op * f32)
    outs = (T * Btile * 2 * Hp + Btile * Op) * f32
    total = scratch + 2 * (ins + outs)          # double-buffered I/O blocks
    # headroom, capped at 64 MiB so the config is v7x-safe
    # (v5e/v6e could go toward ~100 MiB of the 128 MiB physical if needed).
    return min(int(total * 1.5) + (8 << 20), 64 << 20)


def _encoder_pallas(x3d, lens2d, packed, *, T, Bp, Btile, W, Hp, Dp, Op, L):
    n_bt = Bp // Btile
    kernel = functools.partial(_encoder_kernel, T=T, W=W, Btile=Btile,
                               Hp=Hp, Dp=Dp, L=L)
    wmap = lambda bt, l: (l, 0, 0)
    in_specs = [
        pl.BlockSpec((Btile, 1), lambda bt, l: (bt, 0)),          # lens
        pl.BlockSpec((T, Btile, Dp), lambda bt, l: (0, bt, 0)),   # x (embedded)
        pl.BlockSpec((1, Dp, 3 * Hp), wmap),                      # wih fwd
        pl.BlockSpec((1, Dp, 3 * Hp), wmap),                      # wih bwd
        pl.BlockSpec((1, Hp, 3 * Hp), wmap),                      # whh fwd
        pl.BlockSpec((1, Hp, 3 * Hp), wmap),                      # whh bwd
        pl.BlockSpec((1, 1, 3 * Hp), wmap),                       # bih fwd
        pl.BlockSpec((1, 1, 3 * Hp), wmap),                       # bih bwd
        pl.BlockSpec((1, 1, 3 * Hp), wmap),                       # bhh fwd
        pl.BlockSpec((1, 1, 3 * Hp), wmap),                       # bhh bwd
        pl.BlockSpec((1, Hp, Op), wmap),                          # fc slab fwd
        pl.BlockSpec((1, Hp, Op), wmap),                          # fc slab bwd
        pl.BlockSpec((1, Op), lambda bt, l: (0, 0)),              # fc bias
    ]
    out_specs = [
        pl.BlockSpec((T, Btile, 2 * Hp), lambda bt, l: (0, bt, 0)),  # states
        pl.BlockSpec((Btile, Op), lambda bt, l: (bt, 0)),            # last hidden
    ]
    scratch = [
        pltpu.VMEM((T * Btile, Dp), jnp.float32),        # layer input buffer
        pltpu.VMEM((T * Btile, Hp), jnp.float32),        # fwd outputs
        pltpu.VMEM((T * Btile, Hp), jnp.float32),        # bwd outputs
        pltpu.VMEM((W * Btile, 3 * Hp), jnp.float32),    # gi chunk fwd
        pltpu.VMEM((W * Btile, 3 * Hp), jnp.float32),    # gi chunk bwd
        pltpu.VMEM((Btile, Op), jnp.float32),            # fc accumulator
    ]
    vmem_bytes = _vmem_budget_bytes(T=T, W=W, Btile=Btile, Hp=Hp, Dp=Dp, Op=Op)
    return pl.pallas_call(
        kernel,
        out_shape=(jax.ShapeDtypeStruct((T, Bp, 2 * Hp), jnp.float32),
                   jax.ShapeDtypeStruct((Bp, Op), jnp.float32)),
        grid=(n_bt, L),
        in_specs=in_specs,
        out_specs=out_specs,
        scratch_shapes=scratch,
        compiler_params=pltpu.CompilerParams(
            dimension_semantics=("parallel", "arbitrary"),
            vmem_limit_bytes=vmem_bytes),
    )(lens2d, x3d,
      packed['wih_f'], packed['wih_b'], packed['whh_f'], packed['whh_b'],
      packed['bih_f'], packed['bih_b'], packed['bhh_f'], packed['bhh_b'],
      packed['fcw_f'], packed['fcw_b'], packed['fcb'])


# ----------------------------------------------------------------------------
# Parameter construction (shapes match the nn.Module) + padded/packed forms.
# ----------------------------------------------------------------------------
def init_params(key, *, emb_count, emb_dim, enc_hid_dim, dec_hid_dim, num_layers):
    H = enc_hid_dim
    params = {}
    k_emb, k_gru, k_fc = jax.random.split(key, 3)

    # nn.Embedding(emb_count, emb_dim, padding_idx=0)
    emb = jax.random.normal(k_emb, (emb_count, emb_dim), jnp.float32)
    emb = emb.at[0].set(0.0)
    params['embedding'] = emb

    # nn.GRU(emb_dim, H, bidirectional=True, num_layers=num_layers)
    kk = 1.0 / jnp.sqrt(H)
    raw = []
    keys = jax.random.split(k_gru, num_layers * 2 * 4).reshape(num_layers, 2, 4, 2)
    for l in range(num_layers):
        d_in = emb_dim if l == 0 else 2 * H
        dirs = []
        for d in range(2):
            kw1, kw2, kb1, kb2 = (keys[l, d, i] for i in range(4))
            w_ih = jax.random.uniform(kw1, (3 * H, d_in), jnp.float32, -kk, kk)
            w_hh = jax.random.uniform(kw2, (3 * H, H), jnp.float32, -kk, kk)
            b_ih = jax.random.uniform(kb1, (3 * H,), jnp.float32, -kk, kk)
            b_hh = jax.random.uniform(kb2, (3 * H,), jnp.float32, -kk, kk)
            dirs.append(dict(wih_t=w_ih.T, whh_t=w_hh.T,
                             bih=b_ih.reshape(1, 3 * H),
                             bhh=b_hh.reshape(1, 3 * H)))
        raw.append(dirs)
    params['raw'] = raw

    # nn.Linear(2 * num_layers * H, dec_hid_dim)
    fan_in = 2 * num_layers * H
    kf = 1.0 / jnp.sqrt(fan_in)
    kw, kb = jax.random.split(k_fc)
    fc_w = jax.random.uniform(kw, (dec_hid_dim, fan_in), jnp.float32, -kf, kf)
    fc_b = jax.random.uniform(kb, (dec_hid_dim,), jnp.float32, -kf, kf)
    params['fc_w_t'] = fc_w.T
    params['fc_b'] = fc_b.reshape(1, dec_hid_dim)
    return params


def _pad_gate_cols(w, H, Hp):
    """(rows, 3H) -> (rows, 3Hp): pad each of the r/z/n gate blocks to Hp."""
    out = jnp.zeros((w.shape[0], 3 * Hp), w.dtype)
    for g in range(3):
        out = out.at[:, g * Hp:g * Hp + H].set(w[:, g * H:(g + 1) * H])
    return out


def _pad_in_rows(w, *, layer, H, Hp, E, Dp):
    """Pad input-projection rows to the padded layer-input layout (Dp rows)."""
    out = jnp.zeros((Dp, w.shape[1]), w.dtype)
    if layer == 0:
        out = out.at[0:E, :].set(w)                       # embedding rows
    else:
        out = out.at[0:H, :].set(w[0:H, :])               # fwd half
        out = out.at[Hp:Hp + H, :].set(w[H:2 * H, :])     # bwd half
    return out


def pack_params(params, *, emb_dim, enc_hid_dim, dec_hid_dim, num_layers,
                Hp, Dp, Op):
    H, L, E, dec = enc_hid_dim, num_layers, emb_dim, dec_hid_dim
    keys = ('wih_f', 'wih_b', 'whh_f', 'whh_b', 'bih_f', 'bih_b',
            'bhh_f', 'bhh_b', 'fcw_f', 'fcw_b')
    packs = {k: [] for k in keys}
    fc_w_t = params['fc_w_t']                              # (2LH, dec)
    for l in range(L):
        for d, tag in enumerate(('f', 'b')):
            p = params['raw'][l][d]
            wih = _pad_gate_cols(p['wih_t'], H, Hp)
            wih = _pad_in_rows(wih, layer=l, H=H, Hp=Hp, E=E, Dp=Dp)
            whh = jnp.zeros((Hp, 3 * Hp), jnp.float32).at[0:H].set(
                _pad_gate_cols(p['whh_t'], H, Hp))
            bih = _pad_gate_cols(p['bih'], H, Hp)
            bhh = _pad_gate_cols(p['bhh'], H, Hp)
            fcw = fc_w_t[(2 * l + d) * H:(2 * l + d + 1) * H, :]
            fcw_p = jnp.zeros((Hp, Op), jnp.float32).at[0:H, 0:dec].set(fcw)
            packs['wih_' + tag].append(wih)
            packs['whh_' + tag].append(whh)
            packs['bih_' + tag].append(bih)
            packs['bhh_' + tag].append(bhh)
            packs['fcw_' + tag].append(fcw_p)
    out = {}
    for k, v in packs.items():
        a = jnp.stack(v, axis=0)                           # (L, ...)
        if k.startswith(('wih', 'whh', 'fcw')):
            a = a.astype(jnp.bfloat16)                     # bf16 MXU operands
        out[k] = a
    out['fcb'] = jnp.zeros((1, Op), jnp.float32).at[0, 0:dec].set(
        params['fc_b'][0])
    return out


# ----------------------------------------------------------------------------
# Forward pass (mirrors EncoderNetwork.forward)
# ----------------------------------------------------------------------------
def encoder_forward(x, params, *, num_layers, enc_hid_dim, emb_dim, dec_hid_dim,
                    chunk=4):
    B, T = x.shape
    H, L = enc_hid_dim, num_layers

    # hardware-aligned padded sizes
    Hp = _round_up(H, 128)
    Ep = _round_up(emb_dim, 128)
    Dp = max(Ep, 2 * Hp)
    Op = _round_up(dec_hid_dim, 128)
    Bp = _round_up(B, 8)
    W = min(chunk, T)
    Tp = _round_up(T, W)
    Btile = next(c for c in (64, 32, 16, 8) if Bp % c == 0)

    # lens = (x != 0).sum(dim=1)
    valid = (x != 0)
    lens = jnp.sum(valid.astype(jnp.int32), axis=1)

    # embedding lookup + time-major padded layout (XLA glue)
    emb = params['embedding'][x]                           # (B, T, E)
    xt = jnp.transpose(emb, (1, 0, 2))                     # (T, B, E)
    x3d = jnp.zeros((Tp, Bp, Dp), jnp.float32).at[:T, :B, :emb_dim].set(xt)
    lens2d = jnp.zeros((Bp, 1), jnp.int32).at[:B, 0].set(lens)

    packed = pack_params(params, emb_dim=emb_dim, enc_hid_dim=H,
                         dec_hid_dim=dec_hid_dim, num_layers=L,
                         Hp=Hp, Dp=Dp, Op=Op)

    states3d, lasth = _encoder_pallas(
        x3d, lens2d, packed, T=Tp, Bp=Bp, Btile=Btile, W=W,
        Hp=Hp, Dp=Dp, Op=Op, L=L)

    st = jnp.transpose(states3d, (1, 0, 2))                # (Bp, Tp, 2Hp)
    states = jnp.concatenate([st[:B, :T, 0:H], st[:B, :T, Hp:Hp + H]], axis=-1)
    last_hidden = lasth[:B, :dec_hid_dim]
    return states, lens, last_hidden


# ----------------------------------------------------------------------------
# Pure-JAX reference (numerical sanity check)
# ----------------------------------------------------------------------------
def _gru_dir_ref(xs, mask, wih_t, whh_t, bih, bhh, *, reverse):
    B, T, _ = xs.shape
    H = whh_t.shape[0]
    h = jnp.zeros((B, H), jnp.float32)
    outs = [None] * T
    order = range(T - 1, -1, -1) if reverse else range(T)
    for t in order:
        xt = xs[:, t, :]
        mt = mask[:, t][:, None]
        gi = xt @ wih_t + bih
        gh = h @ whh_t + bhh
        r = jax.nn.sigmoid(gi[:, 0:H] + gh[:, 0:H])
        z = jax.nn.sigmoid(gi[:, H:2 * H] + gh[:, H:2 * H])
        n = jnp.tanh(gi[:, 2 * H:] + r * gh[:, 2 * H:])
        hn = (1.0 - z) * n + z * h
        h = jnp.where(mt > 0, hn, h)
        outs[t] = jnp.where(mt > 0, h, 0.0)
    return jnp.stack(outs, axis=1), h


def encoder_reference(x, params, *, num_layers):
    valid = (x != 0)
    lens = jnp.sum(valid.astype(jnp.int32), axis=1)
    mask = valid.astype(jnp.float32)
    inp = params['embedding'][x]
    last_hiddens = []
    for l in range(num_layers):
        outs = []
        for d, rev in enumerate((False, True)):
            p = params['raw'][l][d]
            o, h = _gru_dir_ref(inp, mask, p['wih_t'], p['whh_t'],
                                p['bih'], p['bhh'], reverse=rev)
            outs.append(o)
            last_hiddens.append(h)
        inp = jnp.concatenate(outs, axis=-1)
    h_cat = jnp.concatenate(last_hiddens, axis=1)
    last_hidden = jnp.tanh(h_cat @ params['fc_w_t'] + params['fc_b'])
    return inp, lens, last_hidden


if __name__ == "__main__":
    # small config consistent with the module
    emb_count, emb_dim, enc_hid_dim, dec_hid_dim, num_layers = 50, 32, 32, 32, 2
    B, T = 2, 8

    key = jax.random.PRNGKey(0)
    k_params, k_tok = jax.random.split(key)
    params = init_params(k_params, emb_count=emb_count, emb_dim=emb_dim,
                         enc_hid_dim=enc_hid_dim, dec_hid_dim=dec_hid_dim,
                         num_layers=num_layers)

    # deterministic token ids with trailing padding (padding id = 0)
    tok = jax.random.randint(k_tok, (B, T), 1, emb_count, dtype=jnp.int32)
    seq_lens = jnp.array([T, 5], dtype=jnp.int32)
    pos = jnp.arange(T)[None, :]
    x = jnp.where(pos < seq_lens[:, None], tok, 0)

    states_full, lens, last_hidden = encoder_forward(
        x, params, num_layers=num_layers, enc_hid_dim=enc_hid_dim,
        emb_dim=emb_dim, dec_hid_dim=dec_hid_dim)
    jax.block_until_ready((states_full, lens, last_hidden))

    # pad_packed_sequence returns max(lens) timesteps (glue slice, like torch)
    max_len = int(jnp.max(lens))
    states = states_full[:, :max_len, :]
    assert states.shape == (B, max_len, 2 * enc_hid_dim)
    assert last_hidden.shape == (B, dec_hid_dim)
    assert lens.shape == (B,)

    # numerical sanity check vs pure-JAX f32 reference (kernel uses bf16 MXU
    # operands with f32 accumulation / gate math -> loose tolerance)
    ref_states, ref_lens, ref_last = encoder_reference(x, params,
                                                       num_layers=num_layers)
    err_s = float(jnp.max(jnp.abs(states_full - ref_states)))
    err_h = float(jnp.max(jnp.abs(last_hidden - ref_last)))
    assert bool(jnp.all(lens == ref_lens))
    assert err_s < 5e-2 and err_h < 5e-2, (err_s, err_h)

    print("KERNEL_OK")
</pallas_src>

<mosaic_0001>
module attributes {stable_mosaic.version = 11 : i64} {
  func.func @_encoder_kernel(%arg0: i32, %arg1: i32, %arg2: memref<8x1xi32, #tpu.memory_space<vmem>>, %arg3: memref<8x8x256xf32, #tpu.memory_space<vmem>>, %arg4: memref<1x256x384xbf16, #tpu.memory_space<vmem>>, %arg5: memref<1x256x384xbf16, #tpu.memory_space<vmem>>, %arg6: memref<1x128x384xbf16, #tpu.memory_space<vmem>>, %arg7: memref<1x128x384xbf16, #tpu.memory_space<vmem>>, %arg8: memref<1x1x384xf32, #tpu.memory_space<vmem>>, %arg9: memref<1x1x384xf32, #tpu.memory_space<vmem>>, %arg10: memref<1x1x384xf32, #tpu.memory_space<vmem>>, %arg11: memref<1x1x384xf32, #tpu.memory_space<vmem>>, %arg12: memref<1x128x128xbf16, #tpu.memory_space<vmem>>, %arg13: memref<1x128x128xbf16, #tpu.memory_space<vmem>>, %arg14: memref<1x128xf32, #tpu.memory_space<vmem>>, %arg15: memref<8x8x256xf32, #tpu.memory_space<vmem>>, %arg16: memref<8x128xf32, #tpu.memory_space<vmem>>, %arg17: memref<64x256xf32, #tpu.memory_space<vmem>>, %arg18: memref<64x128xf32, #tpu.memory_space<vmem>>, %arg19: memref<64x128xf32, #tpu.memory_space<vmem>>, %arg20: memref<32x384xf32, #tpu.memory_space<vmem>>, %arg21: memref<32x384xf32, #tpu.memory_space<vmem>>, %arg22: memref<8x128xf32, #tpu.memory_space<vmem>>) attributes {dimension_semantics = [#tpu.dimension_semantics<parallel>, #tpu.dimension_semantics<arbitrary>], iteration_bounds = array<i64: 1, 2>, scalar_prefetch = 0 : i64, scratch_operands = 6 : i64, tpu.core_type = #tpu.core_type<tc>, window_params = [{transform_indices = @transform_0, window_bounds = array<i64: 8, 1>}, {transform_indices = @transform_1, window_bounds = array<i64: 8, 8, 256>}, {transform_indices = @transform_2, window_bounds = array<i64: 1, 256, 384>}, {transform_indices = @transform_3, window_bounds = array<i64: 1, 256, 384>}, {transform_indices = @transform_4, window_bounds = array<i64: 1, 128, 384>}, {transform_indices = @transform_5, window_bounds = array<i64: 1, 128, 384>}, {transform_indices = @transform_6, window_bounds = array<i64: 1, 1, 384>}, {transform_indices = @transform_7, window_bounds = array<i64: 1, 1, 384>}, {transform_indices = @transform_8, window_bounds = array<i64: 1, 1, 384>}, {transform_indices = @transform_9, window_bounds = array<i64: 1, 1, 384>}, {transform_indices = @transform_10, window_bounds = array<i64: 1, 128, 128>}, {transform_indices = @transform_11, window_bounds = array<i64: 1, 128, 128>}, {pipeline_mode = #tpu.pipeline_mode<synchronous>, transform_indices = @transform_12, window_bounds = array<i64: 1, 128>}, {transform_indices = @transform_13, window_bounds = array<i64: 8, 8, 256>}, {transform_indices = @transform_14, window_bounds = array<i64: 8, 128>}]} {
    %c0_i32 = arith.constant 0 : i32
    %0 = arith.cmpi eq, %arg1, %c0_i32 : i32
    %1 = arith.extui %0 : i1 to i32
    %c0_i32_0 = arith.constant 0 : i32
    %2 = arith.cmpi ne, %1, %c0_i32_0 : i32
    scf.if %2 {
      %c0_44 = arith.constant 0 : index
      %c0_45 = arith.constant 0 : index
      %c0_46 = arith.constant 0 : index
      %45 = vector.load %arg3[%c0_44, %c0_45, %c0_46] : memref<8x8x256xf32, #tpu.memory_space<vmem>>, vector<8x8x256xf32>
      %46 = vector.shape_cast %45 : vector<8x8x256xf32> to vector<64x256xf32>
      %c0_47 = arith.constant 0 : index
      %c0_48 = arith.constant 0 : index
      %47 = vector.load %arg17[%c0_47, %c0_48] : memref<64x256xf32, #tpu.memory_space<vmem>>, vector<64x256xf32>
      tpu.vector_store %arg17[%c0_47, %c0_48], %46 {strides = array<i32>} : memref<64x256xf32, #tpu.memory_space<vmem>>, vector<64x256xf32>,
      %cst_49 = arith.constant 0.000000e+00 : f32
      %48 = vector.broadcast %cst_49 : f32 to vector<8x128xf32>
      %c0_50 = arith.constant 0 : index
      %c0_51 = arith.constant 0 : index
      %49 = vector.load %arg22[%c0_50, %c0_51] : memref<8x128xf32, #tpu.memory_space<vmem>>, vector<8x128xf32>
      tpu.vector_store %arg22[%c0_50, %c0_51], %48 {strides = array<i32>} : memref<8x128xf32, #tpu.memory_space<vmem>>, vector<8x128xf32>,
    } else {
    }
    %c0 = arith.constant 0 : index
    %c0_1 = arith.constant 0 : index
    %3 = vector.load %arg2[%c0, %c0_1] : memref<8x1xi32, #tpu.memory_space<vmem>>, vector<8x1xi32>
    %c0_2 = arith.constant 0 : index
    %c0_3 = arith.constant 0 : index
    %c0_4 = arith.constant 0 : index
    %4 = vector.load %arg4[%c0_2, %c0_3, %c0_4] : memref<1x256x384xbf16, #tpu.memory_space<vmem>>, vector<1x256x384xbf16>
    %5 = vector.shape_cast %4 : vector<1x256x384xbf16> to vector<256x384xbf16>
    %c0_5 = arith.constant 0 : index
    %c0_6 = arith.constant 0 : index
    %c0_7 = arith.constant 0 : index
    %6 = vector.load %arg5[%c0_5, %c0_6, %c0_7] : memref<1x256x384xbf16, #tpu.memory_space<vmem>>, vector<1x256x384xbf16>
    %7 = vector.shape_cast %6 : vector<1x256x384xbf16> to vector<256x384xbf16>
    %c0_8 = arith.constant 0 : index
    %c0_9 = arith.constant 0 : index
    %c0_10 = arith.constant 0 : index
    %8 = vector.load %arg6[%c0_8, %c0_9, %c0_10] : memref<1x128x384xbf16, #tpu.memory_space<vmem>>, vector<1x128x384xbf16>
    %9 = vector.shape_cast %8 : vector<1x128x384xbf16> to vector<128x384xbf16>
    %c0_11 = arith.constant 0 : index
    %c0_12 = arith.constant 0 : index
    %c0_13 = arith.constant 0 : index
    %10 = vector.load %arg7[%c0_11, %c0_12, %c0_13] : memref<1x128x384xbf16, #tpu.memory_space<vmem>>, vector<1x128x384xbf16>
    %11 = vector.shape_cast %10 : vector<1x128x384xbf16> to vector<128x384xbf16>
    %c0_14 = arith.constant 0 : index
    %c0_15 = arith.constant 0 : index
    %c0_16 = arith.constant 0 : index
    %12 = vector.load %arg8[%c0_14, %c0_15, %c0_16] : memref<1x1x384xf32, #tpu.memory_space<vmem>>, vector<1x1x384xf32>
    %13 = vector.shape_cast %12 : vector<1x1x384xf32> to vector<1x384xf32>
    %c0_17 = arith.constant 0 : index
    %c0_18 = arith.constant 0 : index
    %c0_19 = arith.constant 0 : index
    %14 = vector.load %arg9[%c0_17, %c0_18, %c0_19] : memref<1x1x384xf32, #tpu.memory_space<vmem>>, vector<1x1x384xf32>
    %15 = vector.shape_cast %14 : vector<1x1x384xf32> to vector<1x384xf32>
    %c0_20 = arith.constant 0 : index
    %c0_21 = arith.constant 0 : index
    %c0_22 = arith.constant 0 : index
    %16 = vector.load %arg10[%c0_20, %c0_21, %c0_22] : memref<1x1x384xf32, #tpu.memory_space<vmem>>, vector<1x1x384xf32>
    %17 = vector.shape_cast %16 : vector<1x1x384xf32> to vector<1x384xf32>
    %18 = vector.shape_cast %17 : vector<1x384xf32> to vector<1x384xf32>
    %19 = vector.broadcast %18 : vector<1x384xf32> to vector<8x384xf32>
    %c0_23 = arith.constant 0 : index
    %c0_24 = arith.constant 0 : index
    %c0_25 = arith.constant 0 : index
    %20 = vector.load %arg11[%c0_23, %c0_24, %c0_25] : memref<1x1x384xf32, #tpu.memory_space<vmem>>, vector<1x1x384xf32>
    %21 = vector.shape_cast %20 : vector<1x1x384xf32> to vector<1x384xf32>
    %22 = vector.shape_cast %21 : vector<1x384xf32> to vector<1x384xf32>
    %23 = vector.broadcast %22 : vector<1x384xf32> to vector<8x384xf32>
    %cst = arith.constant 0.000000e+00 : f32
    %24 = vector.broadcast %cst : f32 to vector<8x128xf32>
    %c0_i32_26 = arith.constant 0 : i32
    %c2_i32 = arith.constant 2 : i32
    %25 = arith.addi %c0_i32_26, %c2_i32 : i32
    %c1_i32 = arith.constant 1 : i32
    %26:2 = scf.for %arg23 = %c0_i32_26 to %25 step %c1_i32 iter_args(%arg24 = %24, %arg25 = %24) -> (vector<8x128xf32>, vector<8x128xf32>)  : i32 {
      %c32_i32 = arith.constant 32 : i32
      %45 = arith.muli %arg23, %c32_i32 : i32
      %46 = tpu.assume_multiple %45, 8 : i32
      %c1_i32_44 = arith.constant 1 : i32
      %47 = arith.addi %arg23, %c1_i32_44 : i32
      %c4_i32 = arith.constant 4 : i32
      %48 = arith.muli %47, %c4_i32 : i32
      %c8_i32 = arith.constant 8 : i32
      %49 = arith.subi %c8_i32, %48 : i32
      %c8_i32_45 = arith.constant 8 : i32
      %50 = arith.muli %49, %c8_i32_45 : i32
      %51 = tpu.assume_multiple %50, 8 : i32
      %52 = arith.index_cast %46 : i32 to index
      %c0_46 = arith.constant 0 : index
      %53 = vector.load %arg17[%52, %c0_46] : memref<64x256xf32, #tpu.memory_space<vmem>>, vector<32x256xf32>
      %54 = arith.truncf %53 : vector<32x256xf32> to vector<32x256xbf16>
      %55 = arith.index_cast %51 : i32 to index
      %c0_47 = arith.constant 0 : index
      %56 = vector.load %arg17[%55, %c0_47] : memref<64x256xf32, #tpu.memory_space<vmem>>, vector<32x256xf32>
      %57 = arith.truncf %56 : vector<32x256xf32> to vector<32x256xbf16>
      %cst_48 = arith.constant dense<0.000000e+00> : vector<32x384xf32>
      %58 = tpu.matmul %54, %5, %cst_48 {dimension_numbers = #tpu.dot_dimension_numbers<[1], [0], [0], [1], [0, 0, 1, 1], [], []>} : vector<32x256xbf16>, vector<256x384xbf16>, vector<32x384xf32> -> vector<32x384xf32>
      %59 = vector.broadcast %13 : vector<1x384xf32> to vector<32x384xf32>
      %60 = arith.addf %58, %59 : vector<32x384xf32>
      %c0_49 = arith.constant 0 : index
      %c0_50 = arith.constant 0 : index
      %61 = vector.load %arg20[%c0_49, %c0_50] : memref<32x384xf32, #tpu.memory_space<vmem>>, vector<32x384xf32>
      tpu.vector_store %arg20[%c0_49, %c0_50], %60 {strides = array<i32>} : memref<32x384xf32, #tpu.memory_space<vmem>>, vector<32x384xf32>,
      %cst_51 = arith.constant dense<0.000000e+00> : vector<32x384xf32>
      %62 = tpu.matmul %57, %7, %cst_51 {dimension_numbers = #tpu.dot_dimension_numbers<[1], [0], [0], [1], [0, 0, 1, 1], [], []>} : vector<32x256xbf16>, vector<256x384xbf16>, vector<32x384xf32> -> vector<32x384xf32>
      %63 = vector.broadcast %15 : vector<1x384xf32> to vector<32x384xf32>
      %64 = arith.addf %62, %63 : vector<32x384xf32>
      %c0_52 = arith.constant 0 : index
      %c0_53 = arith.constant 0 : index
      %65 = vector.load %arg21[%c0_52, %c0_53] : memref<32x384xf32, #tpu.memory_space<vmem>>, vector<32x384xf32>
      tpu.vector_store %arg21[%c0_52, %c0_53], %64 {strides = array<i32>} : memref<32x384xf32, #tpu.memory_space<vmem>>, vector<32x384xf32>,
      %c4_i32_54 = arith.constant 4 : i32
      %66 = arith.muli %arg23, %c4_i32_54 : i32
      %c0_i32_55 = arith.constant 0 : i32
      %67 = arith.addi %66, %c0_i32_55 : i32
      %c7_i32 = arith.constant 7 : i32
      %68 = arith.subi %c7_i32, %67 : i32
      %69 = arith.truncf %arg24 : vector<8x128xf32> to vector<8x128xbf16>
      %cst_56 = arith.constant dense<0.000000e+00> : vector<8x384xf32>
      %70 = tpu.matmul %69, %9, %cst_56 {dimension_numbers = #tpu.dot_dimension_numbers<[1], [0], [0], [1], [0, 0, 1, 1], [], []>} : vector<8x128xbf16>, vector<128x384xbf16>, vector<8x384xf32> -> vector<8x384xf32>
      %71 = arith.addf %70, %19 : vector<8x384xf32>
      %72 = arith.truncf %arg25 : vector<8x128xf32> to vector<8x128xbf16>
      %cst_57 = arith.constant dense<0.000000e+00> : vector<8x384xf32>
      %73 = tpu.matmul %72, %11, %cst_57 {dimension_numbers = #tpu.dot_dimension_numbers<[1], [0], [0], [1], [0, 0, 1, 1], [], []>} : vector<8x128xbf16>, vector<128x384xbf16>, vector<8x384xf32> -> vector<8x384xf32>
      %74 = arith.addf %73, %23 : vector<8x384xf32>
      %c0_58 = arith.constant 0 : index
      %c0_59 = arith.constant 0 : index
      %75 = vector.load %arg20[%c0_58, %c0_59] : memref<32x384xf32, #tpu.memory_space<vmem>>, vector<8x384xf32>
      %c24 = arith.constant 24 : index
      %c0_60 = arith.constant 0 : index
      %76 = vector.load %arg21[%c24, %c0_60] : memref<32x384xf32, #tpu.memory_space<vmem>>, vector<8x384xf32>
      %77 = vector.broadcast %67 : i32 to vector<8x1xi32>
      %78 = arith.cmpi slt, %77, %3 : vector<8x1xi32>
      %79 = vector.broadcast %68 : i32 to vector<8x1xi32>
      %80 = arith.cmpi slt, %79, %3 : vector<8x1xi32>
      %81 = vector.extract_strided_slice %75 {offsets = [0, 0], sizes = [8, 128], strides = [1, 1]} : vector<8x384xf32> to vector<8x128xf32>
      %82 = vector.extract_strided_slice %71 {offsets = [0, 0], sizes = [8, 128], strides = [1, 1]} : vector<8x384xf32> to vector<8x128xf32>
      %83 = arith.addf %81, %82 : vector<8x128xf32>
      %84 = arith.negf %83 : vector<8x128xf32>
      %85 = math.exp %84 : vector<8x128xf32>
      %cst_61 = arith.constant 1.000000e+00 : f32
      %86 = vector.broadcast %cst_61 : f32 to vector<8x128xf32>
      %87 = arith.addf %86, %85 : vector<8x128xf32>
      %88 = arith.divf %86, %87 : vector<8x128xf32>
      %89 = vector.extract_strided_slice %75 {offsets = [0, 128], sizes = [8, 128], strides = [1, 1]} : vector<8x384xf32> to vector<8x128xf32>
      %90 = vector.extract_strided_slice %71 {offsets = [0, 128], sizes = [8, 128], strides = [1, 1]} : vector<8x384xf32> to vector<8x128xf32>
      %91 = arith.addf %89, %90 : vector<8x128xf32>
      %92 = arith.negf %91 : vector<8x128xf32>
      %93 = math.exp %92 : vector<8x128xf32>
      %cst_62 = arith.constant 1.000000e+00 : f32
      %94 = vector.broadcast %cst_62 : f32 to vector<8x128xf32>
      %95 = arith.addf %94, %93 : vector<8x128xf32>
      %96 = arith.divf %94, %95 : vector<8x128xf32>
      %97 = vector.extract_strided_slice %75 {offsets = [0, 256], sizes = [8, 128], strides = [1, 1]} : vector<8x384xf32> to vector<8x128xf32>
      %98 = vector.extract_strided_slice %71 {offsets = [0, 256], sizes = [8, 128], strides = [1, 1]} : vector<8x384xf32> to vector<8x128xf32>
      %99 = arith.mulf %88, %98 : vector<8x128xf32>
      %100 = arith.addf %97, %99 : vector<8x128xf32>
      %101 = math.tanh %100 : vector<8x128xf32>
      %cst_63 = arith.constant 1.000000e+00 : f32
      %102 = vector.broadcast %cst_63 : f32 to vector<8x128xf32>
      %103 = arith.subf %102, %96 : vector<8x128xf32>
      %104 = arith.mulf %103, %101 : vector<8x128xf32>
      %105 = arith.mulf %96, %arg24 : vector<8x128xf32>
      %106 = arith.addf %104, %105 : vector<8x128xf32>
      %107 = vector.shape_cast %78 : vector<8x1xi1> to vector<8x1xi1>
      %108 = vector.broadcast %107 : vector<8x1xi1> to vector<8x128xi1>
      %109 = arith.select %108, %106, %arg24 : vector<8x128xi1>, vector<8x128xf32>
      %110 = vector.extract_strided_slice %76 {offsets = [0, 0], sizes = [8, 128], strides = [1, 1]} : vector<8x384xf32> to vector<8x128xf32>
      %111 = vector.extract_strided_slice %74 {offsets = [0, 0], sizes = [8, 128], strides = [1, 1]} : vector<8x384xf32> to vector<8x128xf32>
      %112 = arith.addf %110, %111 : vector<8x128xf32>
      %113 = arith.negf %112 : vector<8x128xf32>
      %114 = math.exp %113 : vector<8x128xf32>
      %cst_64 = arith.constant 1.000000e+00 : f32
      %115 = vector.broadcast %cst_64 : f32 to vector<8x128xf32>
      %116 = arith.addf %115, %114 : vector<8x128xf32>
      %117 = arith.divf %115, %116 : vector<8x128xf32>
      %118 = vector.extract_strided_slice %76 {offsets = [0, 128], sizes = [8, 128], strides = [1, 1]} : vector<8x384xf32> to vector<8x128xf32>
      %119 = vector.extract_strided_slice %74 {offsets = [0, 128], sizes = [8, 128], strides = [1, 1]} : vector<8x384xf32> to vector<8x128xf32>
      %120 = arith.addf %118, %119 : vector<8x128xf32>
      %121 = arith.negf %120 : vector<8x128xf32>
      %122 = math.exp %121 : vector<8x128xf32>
      %cst_65 = arith.constant 1.000000e+00 : f32
      %123 = vector.broadcast %cst_65 : f32 to vector<8x128xf32>
      %124 = arith.addf %123, %122 : vector<8x128xf32>
      %125 = arith.divf %123, %124 : vector<8x128xf32>
      %126 = vector.extract_strided_slice %76 {offsets = [0, 256], sizes = [8, 128], strides = [1, 1]} : vector<8x384xf32> to vector<8x128xf32>
      %127 = vector.extract_strided_slice %74 {offsets = [0, 256], sizes = [8, 128], strides = [1, 1]} : vector<8x384xf32> to vector<8x128xf32>
      %128 = arith.mulf %117, %127 : vector<8x128xf32>
      %129 = arith.addf %126, %128 : vector<8x128xf32>
      %130 = math.tanh %129 : vector<8x128xf32>
      %cst_66 = arith.constant 1.000000e+00 : f32
      %131 = vector.broadcast %cst_66 : f32 to vector<8x128xf32>
      %132 = arith.subf %131, %125 : vector<8x128xf32>
      %133 = arith.mulf %132, %130 : vector<8x128xf32>
      %134 = arith.mulf %125, %arg25 : vector<8x128xf32>
      %135 = arith.addf %133, %134 : vector<8x128xf32>
      %136 = vector.shape_cast %80 : vector<8x1xi1> to vector<8x1xi1>
      %137 = vector.broadcast %136 : vector<8x1xi1> to vector<8x128xi1>
      %138 = arith.select %137, %135, %arg25 : vector<8x128xi1>, vector<8x128xf32>
      %cst_67 = arith.constant 0.000000e+00 : f32
      %139 = vector.shape_cast %78 : vector<8x1xi1> to vector<8x1xi1>
      %140 = vector.broadcast %139 : vector<8x1xi1> to vector<8x128xi1>
      %141 = vector.broadcast %cst_67 : f32 to vector<8x128xf32>
      %142 = arith.select %140, %109, %141 : vector<8x128xi1>, vector<8x128xf32>
      %c8_i32_68 = arith.constant 8 : i32
      %143 = arith.muli %67, %c8_i32_68 : i32
      %144 = tpu.assume_multiple %143, 8 : i32
      %145 = arith.index_cast %144 : i32 to index
      %c0_69 = arith.constant 0 : index
      %146 = vector.load %arg18[%145, %c0_69] : memref<64x128xf32, #tpu.memory_space<vmem>>, vector<8x128xf32>
      tpu.vector_store %arg18[%145, %c0_69], %142 {strides = array<i32>} : memref<64x128xf32, #tpu.memory_space<vmem>>, vector<8x128xf32>,
      %cst_70 = arith.constant 0.000000e+00 : f32
      %147 = vector.shape_cast %80 : vector<8x1xi1> to vector<8x1xi1>
      %148 = vector.broadcast %147 : vector<8x1xi1> to vector<8x128xi1>
      %149 = vector.broadcast %cst_70 : f32 to vector<8x128xf32>
      %150 = arith.select %148, %138, %149 : vector<8x128xi1>, vector<8x128xf32>
      %c8_i32_71 = arith.constant 8 : i32
      %151 = arith.muli %68, %c8_i32_71 : i32
      %152 = tpu.assume_multiple %151, 8 : i32
      %153 = arith.index_cast %152 : i32 to index
      %c0_72 = arith.constant 0 : index
      %154 = vector.load %arg19[%153, %c0_72] : memref<64x128xf32, #tpu.memory_space<vmem>>, vector<8x128xf32>
      tpu.vector_store %arg19[%153, %c0_72], %150 {strides = array<i32>} : memref<64x128xf32, #tpu.memory_space<vmem>>, vector<8x128xf32>,
      %c4_i32_73 = arith.constant 4 : i32
      %155 = arith.muli %arg23, %c4_i32_73 : i32
      %c1_i32_74 = arith.constant 1 : i32
      %156 = arith.addi %155, %c1_i32_74 : i32
      %c7_i32_75 = arith.constant 7 : i32
      %157 = arith.subi %c7_i32_75, %156 : i32
      %158 = arith.truncf %109 : vector<8x128xf32> to vector<8x128xbf16>
      %cst_76 = arith.constant dense<0.000000e+00> : vector<8x384xf32>
      %159 = tpu.matmul %158, %9, %cst_76 {dimension_numbers = #tpu.dot_dimension_numbers<[1], [0], [0], [1], [0, 0, 1, 1], [], []>} : vector<8x128xbf16>, vector<128x384xbf16>, vector<8x384xf32> -> vector<8x384xf32>
      %160 = arith.addf %159, %19 : vector<8x384xf32>
      %161 = arith.truncf %138 : vector<8x128xf32> to vector<8x128xbf16>
      %cst_77 = arith.constant dense<0.000000e+00> : vector<8x384xf32>
      %162 = tpu.matmul %161, %11, %cst_77 {dimension_numbers = #tpu.dot_dimension_numbers<[1], [0], [0], [1], [0, 0, 1, 1], [], []>} : vector<8x128xbf16>, vector<128x384xbf16>, vector<8x384xf32> -> vector<8x384xf32>
      %163 = arith.addf %162, %23 : vector<8x384xf32>
      %c8 = arith.constant 8 : index
      %c0_78 = arith.constant 0 : index
      %164 = vector.load %arg20[%c8, %c0_78] : memref<32x384xf32, #tpu.memory_space<vmem>>, vector<8x384xf32>
      %c16 = arith.constant 16 : index
      %c0_79 = arith.constant 0 : index
      %165 = vector.load %arg21[%c16, %c0_79] : memref<32x384xf32, #tpu.memory_space<vmem>>, vector<8x384xf32>
      %166 = vector.broadcast %156 : i32 to vector<8x1xi32>
      %167 = arith.cmpi slt, %166, %3 : vector<8x1xi32>
      %168 = vector.broadcast %157 : i32 to vector<8x1xi32>
      %169 = arith.cmpi slt, %168, %3 : vector<8x1xi32>
      %170 = vector.extract_strided_slice %164 {offsets = [0, 0], sizes = [8, 128], strides = [1, 1]} : vector<8x384xf32> to vector<8x128xf32>
      %171 = vector.extract_strided_slice %160 {offsets = [0, 0], sizes = [8, 128], strides = [1, 1]} : vector<8x384xf32> to vector<8x128xf32>
      %172 = arith.addf %170, %171 : vector<8x128xf32>
      %173 = arith.negf %172 : vector<8x128xf32>
      %174 = math.exp %173 : vector<8x128xf32>
      %cst_80 = arith.constant 1.000000e+00 : f32
      %175 = vector.broadcast %cst_80 : f32 to vector<8x128xf32>
      %176 = arith.addf %175, %174 : vector<8x128xf32>
      %177 = arith.divf %175, %176 : vector<8x128xf32>
      %178 = vector.extract_strided_slice %164 {offsets = [0, 128], sizes = [8, 128], strides = [1, 1]} : vector<8x384xf32> to vector<8x128xf32>
      %179 = vector.extract_strided_slice %160 {offsets = [0, 128], sizes = [8, 128], strides = [1, 1]} : vector<8x384xf32> to vector<8x128xf32>
      %180 = arith.addf %178, %179 : vector<8x128xf32>
      %181 = arith.negf %180 : vector<8x128xf32>
      %182 = math.exp %181 : vector<8x128xf32>
      %cst_81 = arith.constant 1.000000e+00 : f32
      %183 = vector.broadcast %cst_81 : f32 to vector<8x128xf32>
      %184 = arith.addf %183, %182 : vector<8x128xf32>
      %185 = arith.divf %183, %184 : vector<8x128xf32>
      %186 = vector.extract_strided_slice %164 {offsets = [0, 256], sizes = [8, 128], strides = [1, 1]} : vector<8x384xf32> to vector<8x128xf32>
      %187 = vector.extract_strided_slice %160 {offsets = [0, 256], sizes = [8, 128], strides = [1, 1]} : vector<8x384xf32> to vector<8x128xf32>
      %188 = arith.mulf %177, %187 : vector<8x128xf32>
      %189 = arith.addf %186, %188 : vector<8x128xf32>
      %190 = math.tanh %189 : vector<8x128xf32>
      %cst_82 = arith.constant 1.000000e+00 : f32
      %191 = vector.broadcast %cst_82 : f32 to vector<8x128xf32>
      %192 = arith.subf %191, %185 : vector<8x128xf32>
      %193 = arith.mulf %192, %190 : vector<8x128xf32>
      %194 = arith.mulf %185, %109 : vector<8x128xf32>
      %195 = arith.addf %193, %194 : vector<8x128xf32>
      %196 = vector.shape_cast %167 : vector<8x1xi1> to vector<8x1xi1>
      %197 = vector.broadcast %196 : vector<8x1xi1> to vector<8x128xi1>
      %198 = arith.select %197, %195, %109 : vector<8x128xi1>, vector<8x128xf32>
      %199 = vector.extract_strided_slice %165 {offsets = [0, 0], sizes = [8, 128], strides = [1, 1]} : vector<8x384xf32> to vector<8x128xf32>
      %200 = vector.extract_strided_slice %163 {offsets = [0, 0], sizes = [8, 128], strides = [1, 1]} : vector<8x384xf32> to vector<8x128xf32>
      %201 = arith.addf %199, %200 : vector<8x128xf32>
      %202 = arith.negf %201 : vector<8x128xf32>
      %203 = math.exp %202 : vector<8x128xf32>
      %cst_83 = arith.constant 1.000000e+00 : f32
      %204 = vector.broadcast %cst_83 : f32 to vector<8x128xf32>
      %205 = arith.addf %204, %203 : vector<8x128xf32>
      %206 = arith.divf %204, %205 : vector<8x128xf32>
      %207 = vector.extract_strided_slice %165 {offsets = [0, 128], sizes = [8, 128], strides = [1, 1]} : vector<8x384xf32> to vector<8x128xf32>
      %208 = vector.extract_strided_slice %163 {offsets = [0, 128], sizes = [8, 128], strides = [1, 1]} : vector<8x384xf32> to vector<8x128xf32>
      %209 = arith.addf %207, %208 : vector<8x128xf32>
      %210 = arith.negf %209 : vector<8x128xf32>
      %211 = math.exp %210 : vector<8x128xf32>
      %cst_84 = arith.constant 1.000000e+00 : f32
      %212 = vector.broadcast %cst_84 : f32 to vector<8x128xf32>
      %213 = arith.addf %212, %211 : vector<8x128xf32>
      %214 = arith.divf %212, %213 : vector<8x128xf32>
      %215 = vector.extract_strided_slice %165 {offsets = [0, 256], sizes = [8, 128], strides = [1, 1]} : vector<8x384xf32> to vector<8x128xf32>
      %216 = vector.extract_strided_slice %163 {offsets = [0, 256], sizes = [8, 128], strides = [1, 1]} : vector<8x384xf32> to vector<8x128xf32>
      %217 = arith.mulf %206, %216 : vector<8x128xf32>
      %218 = arith.addf %215, %217 : vector<8x128xf32>
      %219 = math.tanh %218 : vector<8x128xf32>
      %cst_85 = arith.constant 1.000000e+00 : f32
      %220 = vector.broadcast %cst_85 : f32 to vector<8x128xf32>
      %221 = arith.subf %220, %214 : vector<8x128xf32>
      %222 = arith.mulf %221, %219 : vector<8x128xf32>
      %223 = arith.mulf %214, %138 : vector<8x128xf32>
      %224 = arith.addf %222, %223 : vector<8x128xf32>
      %225 = vector.shape_cast %169 : vector<8x1xi1> to vector<8x1xi1>
      %226 = vector.broadcast %225 : vector<8x1xi1> to vector<8x128xi1>
      %227 = arith.select %226, %224, %138 : vector<8x128xi1>, vector<8x128xf32>
      %cst_86 = arith.constant 0.000000e+00 : f32
      %228 = vector.shape_cast %167 : vector<8x1xi1> to vector<8x1xi1>
      %229 = vector.broadcast %228 : vector<8x1xi1> to vector<8x128xi1>
      %230 = vector.broadcast %cst_86 : f32 to vector<8x128xf32>
      %231 = arith.select %229, %198, %230 : vector<8x128xi1>, vector<8x128xf32>
      %c8_i32_87 = arith.constant 8 : i32
      %232 = arith.muli %156, %c8_i32_87 : i32
      %233 = tpu.assume_multiple %232, 8 : i32
      %234 = arith.index_cast %233 : i32 to index
      %c0_88 = arith.constant 0 : index
      %235 = vector.load %arg18[%234, %c0_88] : memref<64x128xf32, #tpu.memory_space<vmem>>, vector<8x128xf32>
      tpu.vector_store %arg18[%234, %c0_88], %231 {strides = array<i32>} : memref<64x128xf32, #tpu.memory_space<vmem>>, vector<8x128xf32>,
      %cst_89 = arith.constant 0.000000e+00 : f32
      %236 = vector.shape_cast %169 : vector<8x1xi1> to vector<8x1xi1>
      %237 = vector.broadcast %236 : vector<8x1xi1> to vector<8x128xi1>
      %238 = vector.broadcast %cst_89 : f32 to vector<8x128xf32>
      %239 = arith.select %237, %227, %238 : vector<8x128xi1>, vector<8x128xf32>
      %c8_i32_90 = arith.constant 8 : i32
      %240 = arith.muli %157, %c8_i32_90 : i32
      %241 = tpu.assume_multiple %240, 8 : i32
      %242 = arith.index_cast %241 : i32 to index
      %c0_91 = arith.constant 0 : index
      %243 = vector.load %arg19[%242, %c0_91] : memref<64x128xf32, #tpu.memory_space<vmem>>, vector<8x128xf32>
      tpu.vector_store %arg19[%242, %c0_91], %239 {strides = array<i32>} : memref<64x128xf32, #tpu.memory_space<vmem>>, vector<8x128xf32>,
      %c4_i32_92 = arith.constant 4 : i32
      %244 = arith.muli %arg23, %c4_i32_92 : i32
      %c2_i32_93 = arith.constant 2 : i32
      %245 = arith.addi %244, %c2_i32_93 : i32
      %c7_i32_94 = arith.constant 7 : i32
      %246 = arith.subi %c7_i32_94, %245 : i32
      %247 = arith.truncf %198 : vector<8x128xf32> to vector<8x128xbf16>
      %cst_95 = arith.constant dense<0.000000e+00> : vector<8x384xf32>
      %248 = tpu.matmul %247, %9, %cst_95 {dimension_numbers = #tpu.dot_dimension_numbers<[1], [0], [0], [1], [0, 0, 1, 1], [], []>} : vector<8x128xbf16>, vector<128x384xbf16>, vector<8x384xf32> -> vector<8x384xf32>
      %249 = arith.addf %248, %19 : vector<8x384xf32>
      %250 = arith.truncf %227 : vector<8x128xf32> to vector<8x128xbf16>
      %cst_96 = arith.constant dense<0.000000e+00> : vector<8x384xf32>
      %251 = tpu.matmul %250, %11, %cst_96 {dimension_numbers = #tpu.dot_dimension_numbers<[1], [0], [0], [1], [0, 0, 1, 1], [], []>} : vector<8x128xbf16>, vector<128x384xbf16>, vector<8x384xf32> -> vector<8x384xf32>
      %252 = arith.addf %251, %23 : vector<8x384xf32>
      %c16_97 = arith.constant 16 : index
      %c0_98 = arith.constant 0 : index
      %253 = vector.load %arg20[%c16_97, %c0_98] : memref<32x384xf32, #tpu.memory_space<vmem>>, vector<8x384xf32>
      %c8_99 = arith.constant 8 : index
      %c0_100 = arith.constant 0 : index
      %254 = vector.load %arg21[%c8_99, %c0_100] : memref<32x384xf32, #tpu.memory_space<vmem>>, vector<8x384xf32>
      %255 = vector.broadcast %245 : i32 to vector<8x1xi32>
      %256 = arith.cmpi slt, %255, %3 : vector<8x1xi32>
      %257 = vector.broadcast %246 : i32 to vector<8x1xi32>
      %258 = arith.cmpi slt, %257, %3 : vector<8x1xi32>
      %259 = vector.extract_strided_slice %253 {offsets = [0, 0], sizes = [8, 128], strides = [1, 1]} : vector<8x384xf32> to vector<8x128xf32>
      %260 = vector.extract_strided_slice %249 {offsets = [0, 0], sizes = [8, 128], strides = [1, 1]} : vector<8x384xf32> to vector<8x128xf32>
      %261 = arith.addf %259, %260 : vector<8x128xf32>
      %262 = arith.negf %261 : vector<8x128xf32>
      %263 = math.exp %262 : vector<8x128xf32>
      %cst_101 = arith.constant 1.000000e+00 : f32
      %264 = vector.broadcast %cst_101 : f32 to vector<8x128xf32>
      %265 = arith.addf %264, %263 : vector<8x128xf32>
      %266 = arith.divf %264, %265 : vector<8x128xf32>
      %267 = vector.extract_strided_slice %253 {offsets = [0, 128], sizes = [8, 128], strides = [1, 1]} : vector<8x384xf32> to vector<8x128xf32>
      %268 = vector.extract_strided_slice %249 {offsets = [0, 128], sizes = [8, 128], strides = [1, 1]} : vector<8x384xf32> to vector<8x128xf32>
      %269 = arith.addf %267, %268 : vector<8x128xf32>
      %270 = arith.negf %269 : vector<8x128xf32>
      %271 = math.exp %270 : vector<8x128xf32>
      %cst_102 = arith.constant 1.000000e+00 : f32
      %272 = vector.broadcast %cst_102 : f32 to vector<8x128xf32>
      %273 = arith.addf %272, %271 : vector<8x128xf32>
      %274 = arith.divf %272, %273 : vector<8x128xf32>
      %275 = vector.extract_strided_slice %253 {offsets = [0, 256], sizes = [8, 128], strides = [1, 1]} : vector<8x384xf32> to vector<8x128xf32>
      %276 = vector.extract_strided_slice %249 {offsets = [0, 256], sizes = [8, 128], strides = [1, 1]} : vector<8x384xf32> to vector<8x128xf32>
      %277 = arith.mulf %266, %276 : vector<8x128xf32>
      %278 = arith.addf %275, %277 : vector<8x128xf32>
      %279 = math.tanh %278 : vector<8x128xf32>
      %cst_103 = arith.constant 1.000000e+00 : f32
      %280 = vector.broadcast %cst_103 : f32 to vector<8x128xf32>
      %281 = arith.subf %280, %274 : vector<8x128xf32>
      %282 = arith.mulf %281, %279 : vector<8x128xf32>
      %283 = arith.mulf %274, %198 : vector<8x128xf32>
      %284 = arith.addf %282, %283 : vector<8x128xf32>
      %285 = vector.shape_cast %256 : vector<8x1xi1> to vector<8x1xi1>
      %286 = vector.broadcast %285 : vector<8x1xi1> to vector<8x128xi1>
      %287 = arith.select %286, %284, %198 : vector<8x128xi1>, vector<8x128xf32>
      %288 = vector.extract_strided_slice %254 {offsets = [0, 0], sizes = [8, 128], strides = [1, 1]} : vector<8x384xf32> to vector<8x128xf32>
      %289 = vector.extract_strided_slice %252 {offsets = [0, 0], sizes = [8, 128], strides = [1, 1]} : vector<8x384xf32> to vector<8x128xf32>
      %290 = arith.addf %288, %289 : vector<8x128xf32>
      %291 = arith.negf %290 : vector<8x128xf32>
      %292 = math.exp %291 : vector<8x128xf32>
      %cst_104 = arith.constant 1.000000e+00 : f32
      %293 = vector.broadcast %cst_104 : f32 to vector<8x128xf32>
      %294 = arith.addf %293, %292 : vector<8x128xf32>
      %295 = arith.divf %293, %294 : vector<8x128xf32>
      %296 = vector.extract_strided_slice %254 {offsets = [0, 128], sizes = [8, 128], strides = [1, 1]} : vector<8x384xf32> to vector<8x128xf32>
      %297 = vector.extract_strided_slice %252 {offsets = [0, 128], sizes = [8, 128], strides = [1, 1]} : vector<8x384xf32> to vector<8x128xf32>
      %298 = arith.addf %296, %297 : vector<8x128xf32>
      %299 = arith.negf %298 : vector<8x128xf32>
      %300 = math.exp %299 : vector<8x128xf32>
      %cst_105 = arith.constant 1.000000e+00 : f32
      %301 = vector.broadcast %cst_105 : f32 to vector<8x128xf32>
      %302 = arith.addf %301, %300 : vector<8x128xf32>
      %303 = arith.divf %301, %302 : vector<8x128xf32>
      %304 = vector.extract_strided_slice %254 {offsets = [0, 256], sizes = [8, 128], strides = [1, 1]} : vector<8x384xf32> to vector<8x128xf32>
      %305 = vector.extract_strided_slice %252 {offsets = [0, 256], sizes = [8, 128], strides = [1, 1]} : vector<8x384xf32> to vector<8x128xf32>
      %306 = arith.mulf %295, %305 : vector<8x128xf32>
      %307 = arith.addf %304, %306 : vector<8x128xf32>
      %308 = math.tanh %307 : vector<8x128xf32>
      %cst_106 = arith.constant 1.000000e+00 : f32
      %309 = vector.broadcast %cst_106 : f32 to vector<8x128xf32>
      %310 = arith.subf %309, %303 : vector<8x128xf32>
      %311 = arith.mulf %310, %308 : vector<8x128xf32>
      %312 = arith.mulf %303, %227 : vector<8x128xf32>
      %313 = arith.addf %311, %312 : vector<8x128xf32>
      %314 = vector.shape_cast %258 : vector<8x1xi1> to vector<8x1xi1>
      %315 = vector.broadcast %314 : vector<8x1xi1> to vector<8x128xi1>
      %316 = arith.select %315, %313, %227 : vector<8x128xi1>, vector<8x128xf32>
      %cst_107 = arith.constant 0.000000e+00 : f32
      %317 = vector.shape_cast %256 : vector<8x1xi1> to vector<8x1xi1>
      %318 = vector.broadcast %317 : vector<8x1xi1> to vector<8x128xi1>
      %319 = vector.broadcast %cst_107 : f32 to vector<8x128xf32>
      %320 = arith.select %318, %287, %319 : vector<8x128xi1>, vector<8x128xf32>
      %c8_i32_108 = arith.constant 8 : i32
      %321 = arith.muli %245, %c8_i32_108 : i32
      %322 = tpu.assume_multiple %321, 8 : i32
      %323 = arith.index_cast %322 : i32 to index
      %c0_109 = arith.constant 0 : index
      %324 = vector.load %arg18[%323, %c0_109] : memref<64x128xf32, #tpu.memory_space<vmem>>, vector<8x128xf32>
      tpu.vector_store %arg18[%323, %c0_109], %320 {strides = array<i32>} : memref<64x128xf32, #tpu.memory_space<vmem>>, vector<8x128xf32>,
      %cst_110 = arith.constant 0.000000e+00 : f32
      %325 = vector.shape_cast %258 : vector<8x1xi1> to vector<8x1xi1>
      %326 = vector.broadcast %325 : vector<8x1xi1> to vector<8x128xi1>
      %327 = vector.broadcast %cst_110 : f32 to vector<8x128xf32>
      %328 = arith.select %326, %316, %327 : vector<8x128xi1>, vector<8x128xf32>
      %c8_i32_111 = arith.constant 8 : i32
      %329 = arith.muli %246, %c8_i32_111 : i32
      %330 = tpu.assume_multiple %329, 8 : i32
      %331 = arith.index_cast %330 : i32 to index
      %c0_112 = arith.constant 0 : index
      %332 = vector.load %arg19[%331, %c0_112] : memref<64x128xf32, #tpu.memory_space<vmem>>, vector<8x128xf32>
      tpu.vector_store %arg19[%331, %c0_112], %328 {strides = array<i32>} : memref<64x128xf32, #tpu.memory_space<vmem>>, vector<8x128xf32>,
      %c4_i32_113 = arith.constant 4 : i32
      %333 = arith.muli %arg23, %c4_i32_113 : i32
      %c3_i32 = arith.constant 3 : i32
      %334 = arith.addi %333, %c3_i32 : i32
      %c7_i32_114 = arith.constant 7 : i32
      %335 = arith.subi %c7_i32_114, %334 : i32
      %336 = arith.truncf %287 : vector<8x128xf32> to vector<8x128xbf16>
      %cst_115 = arith.constant dense<0.000000e+00> : vector<8x384xf32>
      %337 = tpu.matmul %336, %9, %cst_115 {dimension_numbers = #tpu.dot_dimension_numbers<[1], [0], [0], [1], [0, 0, 1, 1], [], []>} : vector<8x128xbf16>, vector<128x384xbf16>, vector<8x384xf32> -> vector<8x384xf32>
      %338 = arith.addf %337, %19 : vector<8x384xf32>
      %339 = arith.truncf %316 : vector<8x128xf32> to vector<8x128xbf16>
      %cst_116 = arith.constant dense<0.000000e+00> : vector<8x384xf32>
      %340 = tpu.matmul %339, %11, %cst_116 {dimension_numbers = #tpu.dot_dimension_numbers<[1], [0], [0], [1], [0, 0, 1, 1], [], []>} : vector<8x128xbf16>, vector<128x384xbf16>, vector<8x384xf32> -> vector<8x384xf32>
      %341 = arith.addf %340, %23 : vector<8x384xf32>
      %c24_117 = arith.constant 24 : index
      %c0_118 = arith.constant 0 : index
      %342 = vector.load %arg20[%c24_117, %c0_118] : memref<32x384xf32, #tpu.memory_space<vmem>>, vector<8x384xf32>
      %c0_119 = arith.constant 0 : index
      %c0_120 = arith.constant 0 : index
      %343 = vector.load %arg21[%c0_119, %c0_120] : memref<32x384xf32, #tpu.memory_space<vmem>>, vector<8x384xf32>
      %344 = vector.broadcast %334 : i32 to vector<8x1xi32>
      %345 = arith.cmpi slt, %344, %3 : vector<8x1xi32>
      %346 = vector.broadcast %335 : i32 to vector<8x1xi32>
      %347 = arith.cmpi slt, %346, %3 : vector<8x1xi32>
      %348 = vector.extract_strided_slice %342 {offsets = [0, 0], sizes = [8, 128], strides = [1, 1]} : vector<8x384xf32> to vector<8x128xf32>
      %349 = vector.extract_strided_slice %338 {offsets = [0, 0], sizes = [8, 128], strides = [1, 1]} : vector<8x384xf32> to vector<8x128xf32>
      %350 = arith.addf %348, %349 : vector<8x128xf32>
      %351 = arith.negf %350 : vector<8x128xf32>
      %352 = math.exp %351 : vector<8x128xf32>
      %cst_121 = arith.constant 1.000000e+00 : f32
      %353 = vector.broadcast %cst_121 : f32 to vector<8x128xf32>
      %354 = arith.addf %353, %352 : vector<8x128xf32>
      %355 = arith.divf %353, %354 : vector<8x128xf32>
      %356 = vector.extract_strided_slice %342 {offsets = [0, 128], sizes = [8, 128], strides = [1, 1]} : vector<8x384xf32> to vector<8x128xf32>
      %357 = vector.extract_strided_slice %338 {offsets = [0, 128], sizes = [8, 128], strides = [1, 1]} : vector<8x384xf32> to vector<8x128xf32>
      %358 = arith.addf %356, %357 : vector<8x128xf32>
      %359 = arith.negf %358 : vector<8x128xf32>
      %360 = math.exp %359 : vector<8x128xf32>
      %cst_122 = arith.constant 1.000000e+00 : f32
      %361 = vector.broadcast %cst_122 : f32 to vector<8x128xf32>
      %362 = arith.addf %361, %360 : vector<8x128xf32>
      %363 = arith.divf %361, %362 : vector<8x128xf32>
      %364 = vector.extract_strided_slice %342 {offsets = [0, 256], sizes = [8, 128], strides = [1, 1]} : vector<8x384xf32> to vector<8x128xf32>
      %365 = vector.extract_strided_slice %338 {offsets = [0, 256], sizes = [8, 128], strides = [1, 1]} : vector<8x384xf32> to vector<8x128xf32>
      %366 = arith.mulf %355, %365 : vector<8x128xf32>
      %367 = arith.addf %364, %366 : vector<8x128xf32>
      %368 = math.tanh %367 : vector<8x128xf32>
      %cst_123 = arith.constant 1.000000e+00 : f32
      %369 = vector.broadcast %cst_123 : f32 to vector<8x128xf32>
      %370 = arith.subf %369, %363 : vector<8x128xf32>
      %371 = arith.mulf %370, %368 : vector<8x128xf32>
      %372 = arith.mulf %363, %287 : vector<8x128xf32>
      %373 = arith.addf %371, %372 : vector<8x128xf32>
      %374 = vector.shape_cast %345 : vector<8x1xi1> to vector<8x1xi1>
      %375 = vector.broadcast %374 : vector<8x1xi1> to vector<8x128xi1>
      %376 = arith.select %375, %373, %287 : vector<8x128xi1>, vector<8x128xf32>
      %377 = vector.extract_strided_slice %343 {offsets = [0, 0], sizes = [8, 128], strides = [1, 1]} : vector<8x384xf32> to vector<8x128xf32>
      %378 = vector.extract_strided_slice %341 {offsets = [0, 0], sizes = [8, 128], strides = [1, 1]} : vector<8x384xf32> to vector<8x128xf32>
      %379 = arith.addf %377, %378 : vector<8x128xf32>
      %380 = arith.negf %379 : vector<8x128xf32>
      %381 = math.exp %380 : vector<8x128xf32>
      %cst_124 = arith.constant 1.000000e+00 : f32
      %382 = vector.broadcast %cst_124 : f32 to vector<8x128xf32>
      %383 = arith.addf %382, %381 : vector<8x128xf32>
      %384 = arith.divf %382, %383 : vector<8x128xf32>
      %385 = vector.extract_strided_slice %343 {offsets = [0, 128], sizes = [8, 128], strides = [1, 1]} : vector<8x384xf32> to vector<8x128xf32>
      %386 = vector.extract_strided_slice %341 {offsets = [0, 128], sizes = [8, 128], strides = [1, 1]} : vector<8x384xf32> to vector<8x128xf32>
      %387 = arith.addf %385, %386 : vector<8x128xf32>
      %388 = arith.negf %387 : vector<8x128xf32>
      %389 = math.exp %388 : vector<8x128xf32>
      %cst_125 = arith.constant 1.000000e+00 : f32
      %390 = vector.broadcast %cst_125 : f32 to vector<8x128xf32>
      %391 = arith.addf %390, %389 : vector<8x128xf32>
      %392 = arith.divf %390, %391 : vector<8x128xf32>
      %393 = vector.extract_strided_slice %343 {offsets = [0, 256], sizes = [8, 128], strides = [1, 1]} : vector<8x384xf32> to vector<8x128xf32>
      %394 = vector.extract_strided_slice %341 {offsets = [0, 256], sizes = [8, 128], strides = [1, 1]} : vector<8x384xf32> to vector<8x128xf32>
      %395 = arith.mulf %384, %394 : vector<8x128xf32>
      %396 = arith.addf %393, %395 : vector<8x128xf32>
      %397 = math.tanh %396 : vector<8x128xf32>
      %cst_126 = arith.constant 1.000000e+00 : f32
      %398 = vector.broadcast %cst_126 : f32 to vector<8x128xf32>
      %399 = arith.subf %398, %392 : vector<8x128xf32>
      %400 = arith.mulf %399, %397 : vector<8x128xf32>
      %401 = arith.mulf %392, %316 : vector<8x128xf32>
      %402 = arith.addf %400, %401 : vector<8x128xf32>
      %403 = vector.shape_cast %347 : vector<8x1xi1> to vector<8x1xi1>
      %404 = vector.broadcast %403 : vector<8x1xi1> to vector<8x128xi1>
      %405 = arith.select %404, %402, %316 : vector<8x128xi1>, vector<8x128xf32>
      %cst_127 = arith.constant 0.000000e+00 : f32
      %406 = vector.shape_cast %345 : vector<8x1xi1> to vector<8x1xi1>
      %407 = vector.broadcast %406 : vector<8x1xi1> to vector<8x128xi1>
      %408 = vector.broadcast %cst_127 : f32 to vector<8x128xf32>
      %409 = arith.select %407, %376, %408 : vector<8x128xi1>, vector<8x128xf32>
      %c8_i32_128 = arith.constant 8 : i32
      %410 = arith.muli %334, %c8_i32_128 : i32
      %411 = tpu.assume_multiple %410, 8 : i32
      %412 = arith.index_cast %411 : i32 to index
      %c0_129 = arith.constant 0 : index
      %413 = vector.load %arg18[%412, %c0_129] : memref<64x128xf32, #tpu.memory_space<vmem>>, vector<8x128xf32>
      tpu.vector_store %arg18[%412, %c0_129], %409 {strides = array<i32>} : memref<64x128xf32, #tpu.memory_space<vmem>>, vector<8x128xf32>,
      %cst_130 = arith.constant 0.000000e+00 : f32
      %414 = vector.shape_cast %347 : vector<8x1xi1> to vector<8x1xi1>
      %415 = vector.broadcast %414 : vector<8x1xi1> to vector<8x128xi1>
      %416 = vector.broadcast %cst_130 : f32 to vector<8x128xf32>
      %417 = arith.select %415, %405, %416 : vector<8x128xi1>, vector<8x128xf32>
      %c8_i32_131 = arith.constant 8 : i32
      %418 = arith.muli %335, %c8_i32_131 : i32
      %419 = tpu.assume_multiple %418, 8 : i32
      %420 = arith.index_cast %419 : i32 to index
      %c0_132 = arith.constant 0 : index
      %421 = vector.load %arg19[%420, %c0_132] : memref<64x128xf32, #tpu.memory_space<vmem>>, vector<8x128xf32>
      tpu.vector_store %arg19[%420, %c0_132], %417 {strides = array<i32>} : memref<64x128xf32, #tpu.memory_space<vmem>>, vector<8x128xf32>,
      scf.yield %376, %405 : vector<8x128xf32>, vector<8x128xf32>
    }
    %c2_i32_27 = arith.constant 2 : i32
    %c0_28 = arith.constant 0 : index
    %c0_29 = arith.constant 0 : index
    %27 = vector.load %arg22[%c0_28, %c0_29] : memref<8x128xf32, #tpu.memory_space<vmem>>, vector<8x128xf32>
    %28 = arith.truncf %26#0 : vector<8x128xf32> to vector<8x128xbf16>
    %c0_30 = arith.constant 0 : index
    %c0_31 = arith.constant 0 : index
    %c0_32 = arith.constant 0 : index
    %29 = vector.load %arg12[%c0_30, %c0_31, %c0_32] : memref<1x128x128xbf16, #tpu.memory_space<vmem>>, vector<1x128x128xbf16>
    %30 = vector.shape_cast %29 : vector<1x128x128xbf16> to vector<128x128xbf16>
    %cst_33 = arith.constant dense<0.000000e+00> : vector<8x128xf32>
    %31 = tpu.matmul %28, %30, %cst_33 {dimension_numbers = #tpu.dot_dimension_numbers<[1], [0], [0], [1], [0, 0, 1, 1], [], []>} : vector<8x128xbf16>, vector<128x128xbf16>, vector<8x128xf32> -> vector<8x128xf32>
    %32 = arith.truncf %26#1 : vector<8x128xf32> to vector<8x128xbf16>
    %c0_34 = arith.constant 0 : index
    %c0_35 = arith.constant 0 : index
    %c0_36 = arith.constant 0 : index
    %33 = vector.load %arg13[%c0_34, %c0_35, %c0_36] : memref<1x128x128xbf16, #tpu.memory_space<vmem>>, vector<1x128x128xbf16>
    %34 = vector.shape_cast %33 : vector<1x128x128xbf16> to vector<128x128xbf16>
    %cst_37 = arith.constant dense<0.000000e+00> : vector<8x128xf32>
    %35 = tpu.matmul %32, %34, %cst_37 {dimension_numbers = #tpu.dot_dimension_numbers<[1], [0], [0], [1], [0, 0, 1, 1], [], []>} : vector<8x128xbf16>, vector<128x128xbf16>, vector<8x128xf32> -> vector<8x128xf32>
    %36 = arith.addf %31, %35 : vector<8x128xf32>
    %37 = arith.addf %27, %36 : vector<8x128xf32>
    %c0_38 = arith.constant 0 : index
    %c0_39 = arith.constant 0 : index
    %38 = vector.load %arg22[%c0_38, %c0_39] : memref<8x128xf32, #tpu.memory_space<vmem>>, vector<8x128xf32>
    tpu.vector_store %arg22[%c0_38, %c0_39], %37 {strides = array<i32>} : memref<8x128xf32, #tpu.memory_space<vmem>>, vector<8x128xf32>,
    %c1_i32_40 = arith.constant 1 : i32
    %39 = arith.cmpi slt, %arg1, %c1_i32_40 : i32
    %40 = arith.extui %39 : i1 to i32
    %c0_i32_41 = arith.constant 0 : i32
    %41 = arith.cmpi ne, %40, %c0_i32_41 : i32
    scf.if %41 {
      %c0_44 = arith.constant 0 : index
      %c0_45 = arith.constant 0 : index
      %45 = vector.load %arg18[%c0_44, %c0_45] : memref<64x128xf32, #tpu.memory_space<vmem>>, vector<64x128xf32>
      %c0_46 = arith.constant 0 : index
      %c0_47 = arith.constant 0 : index
      %46 = vector.load %arg17[%c0_46, %c0_47] : memref<64x256xf32, #tpu.memory_space<vmem>>, vector<64x128xf32>
      tpu.vector_store %arg17[%c0_46, %c0_47], %45 {strides = array<i32>} : memref<64x256xf32, #tpu.memory_space<vmem>>, vector<64x128xf32>,
      %c0_48 = arith.constant 0 : index
      %c0_49 = arith.constant 0 : index
      %47 = vector.load %arg19[%c0_48, %c0_49] : memref<64x128xf32, #tpu.memory_space<vmem>>, vector<64x128xf32>
      %c0_50 = arith.constant 0 : index
      %c128 = arith.constant 128 : index
      %48 = vector.load %arg17[%c0_50, %c128] : memref<64x256xf32, #tpu.memory_space<vmem>>, vector<64x128xf32>
      tpu.vector_store %arg17[%c0_50, %c128], %47 {strides = array<i32>} : memref<64x256xf32, #tpu.memory_space<vmem>>, vector<64x128xf32>,
    } else {
    }
    %c1_i32_42 = arith.constant 1 : i32
    %42 = arith.cmpi eq, %arg1, %c1_i32_42 : i32
    %43 = arith.extui %42 : i1 to i32
    %c0_i32_43 = arith.constant 0 : i32
    %44 = arith.cmpi ne, %43, %c0_i32_43 : i32
    scf.if %44 {
      %c0_44 = arith.constant 0 : index
      %c0_45 = arith.constant 0 : index
      %45 = vector.load %arg18[%c0_44, %c0_45] : memref<64x128xf32, #tpu.memory_space<vmem>>, vector<64x128xf32>
      %46 = vector.shape_cast %45 : vector<64x128xf32> to vector<8x8x128xf32>
      %c0_46 = arith.constant 0 : index
      %c0_47 = arith.constant 0 : index
      %c0_48 = arith.constant 0 : index
      %47 = vector.load %arg15[%c0_46, %c0_47, %c0_48] : memref<8x8x256xf32, #tpu.memory_space<vmem>>, vector<8x8x128xf32>
      tpu.vector_store %arg15[%c0_46, %c0_47, %c0_48], %46 {strides = array<i32>} : memref<8x8x256xf32, #tpu.memory_space<vmem>>, vector<8x8x128xf32>,
      %c0_49 = arith.constant 0 : index
      %c0_50 = arith.constant 0 : index
      %48 = vector.load %arg19[%c0_49, %c0_50] : memref<64x128xf32, #tpu.memory_space<vmem>>, vector<64x128xf32>
      %49 = vector.shape_cast %48 : vector<64x128xf32> to vector<8x8x128xf32>
      %c0_51 = arith.constant 0 : index
      %c0_52 = arith.constant 0 : index
      %c128 = arith.constant 128 : index
      %50 = vector.load %arg15[%c0_51, %c0_52, %c128] : memref<8x8x256xf32, #tpu.memory_space<vmem>>, vector<8x8x128xf32>
      tpu.vector_store %arg15[%c0_51, %c0_52, %c128], %49 {strides = array<i32>} : memref<8x8x256xf32, #tpu.memory_space<vmem>>, vector<8x8x128xf32>,
      %c0_53 = arith.constant 0 : index
      %c0_54 = arith.constant 0 : index
      %51 = vector.load %arg22[%c0_53, %c0_54] : memref<8x128xf32, #tpu.memory_space<vmem>>, vector<8x128xf32>
      %c0_55 = arith.constant 0 : index
      %c0_56 = arith.constant 0 : index
      %52 = vector.load %arg14[%c0_55, %c0_56] : memref<1x128xf32, #tpu.memory_space<vmem>>, vector<1x128xf32>
      %53 = vector.broadcast %52 : vector<1x128xf32> to vector<8x128xf32>
      %54 = arith.addf %51, %53 : vector<8x128xf32>
      %55 = math.tanh %54 : vector<8x128xf32>
      %c0_57 = arith.constant 0 : index
      %c0_58 = arith.constant 0 : index
      %56 = vector.load %arg16[%c0_57, %c0_58] : memref<8x128xf32, #tpu.memory_space<vmem>>, vector<8x128xf32>
      tpu.vector_store %arg16[%c0_57, %c0_58], %55 {strides = array<i32>} : memref<8x128xf32, #tpu.memory_space<vmem>>, vector<8x128xf32>,
    } else {
    }
    return
  }
  func.func @transform_0(%arg0: i32, %arg1: i32) -> (i32, i32) {
    %c0_i32 = arith.constant 0 : i32
    %c0_i32_0 = arith.constant 0 : i32
    return %arg0, %c0_i32 : i32, i32
  }
  func.func @transform_1(%arg0: i32, %arg1: i32) -> (i32, i32, i32) {
    %c0_i32 = arith.constant 0 : i32
    %c0_i32_0 = arith.constant 0 : i32
    %c0_i32_1 = arith.constant 0 : i32
    return %c0_i32, %arg0, %c0_i32_0 : i32, i32, i32
  }
  func.func @transform_2(%arg0: i32, %arg1: i32) -> (i32, i32, i32) {
    %c0_i32 = arith.constant 0 : i32
    %c0_i32_0 = arith.constant 0 : i32
    %c0_i32_1 = arith.constant 0 : i32
    return %arg1, %c0_i32, %c0_i32_0 : i32, i32, i32
  }
  func.func @transform_3(%arg0: i32, %arg1: i32) -> (i32, i32, i32) {
    %c0_i32 = arith.constant 0 : i32
    %c0_i32_0 = arith.constant 0 : i32
    %c0_i32_1 = arith.constant 0 : i32
    return %arg1, %c0_i32, %c0_i32_0 : i32, i32, i32
  }
  func.func @transform_4(%arg0: i32, %arg1: i32) -> (i32, i32, i32) {
    %c0_i32 = arith.constant 0 : i32
    %c0_i32_0 = arith.constant 0 : i32
    %c0_i32_1 = arith.constant 0 : i32
    return %arg1, %c0_i32, %c0_i32_0 : i32, i32, i32
  }
  func.func @transform_5(%arg0: i32, %arg1: i32) -> (i32, i32, i32) {
    %c0_i32 = arith.constant 0 : i32
    %c0_i32_0 = arith.constant 0 : i32
    %c0_i32_1 = arith.constant 0 : i32
    return %arg1, %c0_i32, %c0_i32_0 : i32, i32, i32
  }
  func.func @transform_6(%arg0: i32, %arg1: i32) -> (i32, i32, i32) {
    %c0_i32 = arith.constant 0 : i32
    %c0_i32_0 = arith.constant 0 : i32
    %c0_i32_1 = arith.constant 0 : i32
    return %arg1, %c0_i32, %c0_i32_0 : i32, i32, i32
  }
  func.func @transform_7(%arg0: i32, %arg1: i32) -> (i32, i32, i32) {
    %c0_i32 = arith.constant 0 : i32
    %c0_i32_0 = arith.constant 0 : i32
    %c0_i32_1 = arith.constant 0 : i32
    return %arg1, %c0_i32, %c0_i32_0 : i32, i32, i32
  }
  func.func @transform_8(%arg0: i32, %arg1: i32) -> (i32, i32, i32) {
    %c0_i32 = arith.constant 0 : i32
    %c0_i32_0 = arith.constant 0 : i32
    %c0_i32_1 = arith.constant 0 : i32
    return %arg1, %c0_i32, %c0_i32_0 : i32, i32, i32
  }
  func.func @transform_9(%arg0: i32, %arg1: i32) -> (i32, i32, i32) {
    %c0_i32 = arith.constant 0 : i32
    %c0_i32_0 = arith.constant 0 : i32
    %c0_i32_1 = arith.constant 0 : i32
    return %arg1, %c0_i32, %c0_i32_0 : i32, i32, i32
  }
  func.func @transform_10(%arg0: i32, %arg1: i32) -> (i32, i32, i32) {
    %c0_i32 = arith.constant 0 : i32
    %c0_i32_0 = arith.constant 0 : i32
    %c0_i32_1 = arith.constant 0 : i32
    return %arg1, %c0_i32, %c0_i32_0 : i32, i32, i32
  }
  func.func @transform_11(%arg0: i32, %arg1: i32) -> (i32, i32, i32) {
    %c0_i32 = arith.constant 0 : i32
    %c0_i32_0 = arith.constant 0 : i32
    %c0_i32_1 = arith.constant 0 : i32
    return %arg1, %c0_i32, %c0_i32_0 : i32, i32, i32
  }
  func.func @transform_12(%arg0: i32, %arg1: i32) -> (i32, i32) {
    %c0_i32 = arith.constant 0 : i32
    %c0_i32_0 = arith.constant 0 : i32
    %c0_i32_1 = arith.constant 0 : i32
    return %c0_i32, %c0_i32_0 : i32, i32
  }
  func.func @transform_13(%arg0: i32, %arg1: i32) -> (i32, i32, i32) {
    %c0_i32 = arith.constant 0 : i32
    %c0_i32_0 = arith.constant 0 : i32
    %c0_i32_1 = arith.constant 0 : i32
    return %c0_i32, %arg0, %c0_i32_0 : i32, i32, i32
  }
  func.func @transform_14(%arg0: i32, %arg1: i32) -> (i32, i32) {
    %c0_i32 = arith.constant 0 : i32
    %c0_i32_0 = arith.constant 0 : i32
    return %arg0, %c0_i32 : i32, i32
  }
}

</mosaic_0001>

<bundles_post_ra>
// kernel: tpu_custom_call.1
= control target key start
LH: loop header
LB: loop body
LE: loop exit
PB: predicated region body
PF: predicated region fallthrough
CT: control target
= control target key end

     0   :  { %s6909_s0 = inlined_call_operand.vmem [shape: s32[8,1], index: 0, kind: input, shape index: {}]   ;;  %s6910_s1 = inlined_call_operand.hbm [shape: f32[8,8,256], index: 1, kind: input, shape index: {}]   ;;  %s6911_s2 = inlined_call_operand.hbm [shape: bf16[2,256,384], index: 2, kind: input, shape index: {}]   ;;  %s6912_s3 = inlined_call_operand.hbm [shape: bf16[2,256,384], index: 3, kind: input, shape index: {}]   ;;  %s6913_s4 = inlined_call_operand.hbm [shape: bf16[2,128,384], index: 4, kind: input, shape index: {}]   ;;  %s6914_s5 = inlined_call_operand.hbm [shape: bf16[2,128,384], index: 5, kind: input, shape index: {}]   ;;  %s6915_s6 = inlined_call_operand.vmem [shape: f32[2,1,384], index: 6, kind: input, shape index: {}]   ;;  %s6916_s7 = inlined_call_operand.vmem [shape: f32[2,1,384], index: 7, kind: input, shape index: {}]   ;;  %s6917_s8 = inlined_call_operand.vmem [shape: f32[2,1,384], index: 8, kind: input, shape index: {}]   ;;  %s6918_s9 = inlined_call_operand.vmem [shape: f32[2,1,384], index: 9, kind: input, shape index: {}]   ;;  %s6919_s10 = inlined_call_operand.hbm [shape: bf16[2,128,128], index: 10, kind: input, shape index: {}]   ;;  %s6920_s11 = inlined_call_operand.hbm [shape: bf16[2,128,128], index: 11, kind: input, shape index: {}]   ;;  %s6921_s12 = inlined_call_operand.vmem [shape: f32[1,128], index: 12, kind: input, shape index: {}]   ;;  %s6922_s13 = inlined_call_operand.hbm [shape: f32[8,8,256], index: 13, kind: output, shape index: {0}]   ;;  %s6923_s14 = inlined_call_operand.hbm [shape: f32[8,128], index: 14, kind: output, shape index: {1}]  }
   0x1   :  { %7170 = sst [smem:[#allocation272_spill]] %s6909_s0 }
   0x2   :  { %7171 = sst [smem:[#allocation273_spill]] %s6910_s1 }
   0x3   :  { %7172 = sst [smem:[#allocation274_spill]] %s6911_s2 }
   0x4   :  { %7173 = sst [smem:[#allocation275_spill]] %s6912_s3 }
   0x5   :  { %7174 = sst [smem:[#allocation276_spill]] %s6913_s4 }
   0x6   :  { %7175 = sst [smem:[#allocation277_spill]] %s6915_s6 }
   0x7   :  { %7176 = sst [smem:[#allocation278_spill]] %s6916_s7 }
   0x8   :  { %7177 = sst [smem:[#allocation279_spill]] %s6917_s8 }
   0x9   :  { %7178 = sst [smem:[#allocation280_spill]] %s6918_s9 }
   0xa   :  { %7179 = sst [smem:[#allocation281_spill]] %s6919_s10 }
   0xb   :  { %7180 = sst [smem:[#allocation282_spill]] %s6921_s12 }
   0xc   :  { %7181 = sst [smem:[#allocation283_spill]] %s6922_s13 }
   0xd   :  { %7182 = sst [smem:[#allocation284_spill]] %s6923_s14 }
   0xe   :  { %20 = vsyncpa [#allocation9], 0 }
   0xf   :  { %21 = vsyncpa [#allocation12], 0 }
  0x10   :  { %23 = vsyncpa [#allocation12 + $0x1], 0 }
  0x11   :  { %24 = vsyncpa [#allocation15], 0 }
  0x12   :  { %26 = vsyncpa [#allocation15 + $0x1], 0 }
  0x13   :  { %27 = vsyncpa [#allocation18], 0 }
  0x14   :  { %29 = vsyncpa [#allocation18 + $0x1], 0 }
  0x15   :  { %30 = vsyncpa [#allocation10], 0 }
  0x16   :  { %31 = vsyncpa [#allocation22], 0  ;;  %s4973_s29 = smov 0   ;;  %s4975_s30 = smov 0  }
  0x17   :  { %s4977_s15 = smov 0   ;;  %s4979_s16 = smov 0  }
  0x18   :  { %s4981_s17 = smov 0   ;;  %s4983_s18 = smov 0  }
  0x19 LB: > { %7183 = sst [smem:[#allocation29_spill]] %s4849_s15  ;;  %s46_s19 = sadd.s32 1, %s4857_s17  ;;  %s4861_s18 = sphi %s4983_s18, %s37_s18   ;;  %s4857_s17 = sphi %s4981_s17, %s7724_s17   ;;  %s4853_s16 = sphi %s4979_s16, %s7723_s16   ;;  %s4849_s15 = sphi %s4977_s15, %s7719_s15   ;;  %s4845_s30 = sphi %s4975_s30, %s7722_s30   ;;  %s4841_s29 = sphi %s4973_s29, %s7721_s29  }
  0x1a   : > { %s108_s20 = sadd.s32 1, %s4849_s15  ;;  %p47_p0 = scmp.ge.s32.totalorder %s46_s19, 2 }
  0x1b   : > { %p115_p1 = scmp.ne.s32.totalorder %s4849_s15, %s4845_s30  ;;  %p116_p2 = scmp.eq.s32.totalorder %s4861_s18, 0 }
  0x1c   : > { %s7726_s19 = smov (%p47_p0, %s46_s19), 0  ;;  %p4342_p4 = scmp.lt.s32.totalorder %s4861_s18, 2 }
  0x1d   : > { %7184 = sst [smem:[#allocation30_spill]] %s7726_s19  ;;  %p117_p3 = por %p116_p2, %p115_p1 }
  0x1e   : > { %s105_s21 = ssub.s32 %s4857_s17, %s7726_s19  ;;  %s5014_s22 = sand.u32 1, %s4861_s18  }
  0x1f   : > { %p106_p5 = scmp.eq.s32.totalorder %s105_s21, 0  ;;  %s5017_s23 = sand.u32 1, %s4849_s15  }
  0x20   : > { %s6925_s24 = smul.u32 6144, %s4857_s17  ;;  %s7186_s2 = sld [smem:[#allocation274_spill]] }
  0x21   : > { %s5021_s25 = scalar_select %p106_p5, %s4849_s15, %s108_s20  }
  0x22   : > { %s6926_s26 = smul.u32 384, %s5017_s23  ;;  %p5029_p6 = pnand %p4342_p4, %p117_p3 }
  0x23   : > { %7185 = sst [smem:[#allocation31_spill]] %s5021_s25  ;;  %s6928_s12 = scalar_lea.sflag [#allocation12], %s5014_s22 }
  0x24   : > { %s482_s21 = scalar_lea.vmem [#allocation11], %s6926_s26  ;;  %p5038_p7 = pneg %p5029_p6 }
  0x25   : > { %s489_s19 = sshll.u32 %s482_s21, 4  ;;  %s4875_s27 = smov [#allocation11]   ;;  %s490_s19 = int_to_ptr.vmem [resolvable:$true] %s489_s19 }
  0x26   : > { %s488_s14 = scalar_lea.hbm %s7186_s2, %s6925_s24  ;;  %s4550_s25 = scalar_lea.vmem %s490_s19, 6144 }
  0x27   : > { %p4551_p8 = scmp.ne.s32.totalorder %s490_s19, %s4550_s25  ;;  %s4555_s28 = sshll.u32 %s4875_s27, 4  ;;  %s4556_s28 = int_to_ptr.vmem [resolvable:$false] %s4555_s28 }
  0x28   : > { %s4557_s24 = scalar_lea.vmem %s4556_s28, 12288  ;;  %p4558_p11 = scmp.lt.s32.totalorder %s490_s19, %s4556_s28 }
  0x29   : > { %p4553_p9 = pnand %p4551_p8, %p5038_p7  ;;  %p4559_p12 = scmp.lt.s32.totalorder %s4557_s24, %s4550_s25 }
  0x2b   : > { %p4554_p10 = pneg %p4553_p9  ;;  %p4560_p13 = por %p4559_p12, %p4558_p11 }
  0x2d   : > { %p4561_p0 = pnand %p4560_p13, %p4554_p10 }
  0x2f   : > { %4564 = shalt.err (!%p4561_p0)
}
  0x30   : > { %s6935_s21 = smov 192   ;;  %s4877_s26 = smov 12  }
  0x31   : > { %4325 = dma.hbm_to_vmem [thread:$0]  (!%p5029_p6), %s488_s14, 6144, %s490_s19, %s6928_s12, %s6935_s21, %s6935_s21, %s4877_s26  }
  0x32   : > { %s6929_s24 = smul.u32 192, %s5017_s23  ;;  %s3711_s27 = sshll.u32 %s5017_s23, 6 }
  0x33   : > { %s6930_s25 = smul.u32 3072, %s4857_s17  ;;  %s7189_s4 = sld [smem:[#allocation276_spill]] }
  0x34   : > { %s524_s0 = scalar_lea.vmem [#allocation14], %s6929_s24  ;;  %s3928_s8 = sshll.u32 %s4857_s17, 10 }
  0x35   : > { %s531_s9 = sshll.u32 %s524_s0, 4  ;;  %s6934_s7 = scalar_lea.sflag [#allocation15], %s5014_s22  ;;  %s532_s9 = int_to_ptr.vmem [resolvable:$true] %s531_s9 }
  0x36   : > { %s4578_s6 = scalar_lea.vmem %s532_s9, 3072  ;;  %s4878_s14 = smov [#allocation14]  }
  0x37   : > { %p4579_p1 = scmp.ne.s32.totalorder %s532_s9, %s4578_s6  ;;  %s4583_s19 = sshll.u32 %s4878_s14, 4  ;;  %s4584_s19 = int_to_ptr.vmem [resolvable:$false] %s4583_s19 }
  0x38   : > { %s4585_s12 = scalar_lea.vmem %s4584_s19, 6144  ;;  %p4586_p4 = scmp.lt.s32.totalorder %s532_s9, %s4584_s19 }
  0x39   : > { %s530_s15 = scalar_lea.hbm %s7189_s4, %s6930_s25  ;;  %p4581_p2 = pnand %p4579_p1, %p5038_p7 }
  0x3a   : > { %p4587_p5 = scmp.lt.s32.totalorder %s4585_s12, %s4578_s6 }
  0x3b   : > { %p4582_p3 = pneg %p4581_p2 }
  0x3c   : > { %p4588_p8 = por %p4587_p5, %p4586_p4 }
  0x3e   : > { %p4589_p9 = pnand %p4588_p8, %p4582_p3 }
  0x40   : > { %4592 = shalt.err (!%p4589_p9)
}
  0x41   : > { %4331 = dma.hbm_to_vmem [thread:$0]  (!%p5029_p6), %s530_s15, 3072, %s532_s9, %s6934_s7, %s6935_s21, %s6935_s21, %s4877_s26  }
  0x42   : > { %s7190_s10 = sld [smem:[#allocation281_spill]]  ;;  %s594_s12 = scalar_lea.vmem [#allocation17], %s3711_s27 }
  0x43   : > { %s601_s28 = sshll.u32 %s594_s12, 4  ;;  %s6931_s14 = scalar_lea.sflag [#allocation18], %s5014_s22  ;;  %s602_s28 = int_to_ptr.vmem [resolvable:$true] %s601_s28 }
  0x44   : > { %s4606_s19 = scalar_lea.vmem %s602_s28, 1024  ;;  %s4879_s24 = smov [#allocation17]  }
  0x45   : > { %p4607_p10 = scmp.ne.s32.totalorder %s602_s28, %s4606_s19  ;;  %s4611_s25 = sshll.u32 %s4879_s24, 4  ;;  %s4612_s25 = int_to_ptr.vmem [resolvable:$false] %s4611_s25 }
  0x46   : > { %s4613_s4 = scalar_lea.vmem %s4612_s25, 2048  ;;  %p4614_p13 = scmp.lt.s32.totalorder %s602_s28, %s4612_s25 }
  0x47   : > { %p4609_p11 = pnand %p4607_p10, %p5038_p7  ;;  %p4615_p0 = scmp.lt.s32.totalorder %s4613_s4, %s4606_s19 }
  0x48   : > { %s600_s6 = scalar_lea.hbm %s7190_s10, %s3928_s8 }
  0x49   : > { %p4610_p12 = pneg %p4609_p11  ;;  %p4616_p1 = por %p4615_p0, %p4614_p13 }
  0x4b   : > { %p4617_p2 = pnand %p4616_p1, %p4610_p12 }
  0x4d   : > { %4620 = shalt.err (!%p4617_p2)
}
  0x4e   : > { %s6932_s9 = smov 64   ;;  %s6933_s15 = smov 4  }
  0x4f   : > { %4337 = dma.hbm_to_vmem [thread:$0]  (!%p5029_p6), %s600_s6, 1024, %s602_s28, %s6931_s14, %s6932_s9, %s6932_s9, %s6933_s15  }
  0x50   : > { %s5094_s25 = scalar_lea.hbm %s6920_s11, %s3928_s8  ;;  %s615_s0 = scalar_lea.vmem [#allocation19], %s3711_s27 }
  0x51   : > { %s622_s2 = sshll.u32 %s615_s0, 4  ;;  %s5101_s12 = sadd.s32 4294967295, %s4861_s18   ;;  %s5098_s2 = int_to_ptr.vmem [resolvable:$true] %s622_s2 }
  0x52   : > { %p121_p3 = scmp.ne.s32.totalorder %s4845_s30, %s4841_s29  ;;  %p122_p4 = scmp.eq.s32.totalorder %s5101_s12, 0 }
  0x53   : > { %p3703_p5 = scmp.ge.s32.totalorder %s4861_s18, 1  ;;  %p439_p8 = scmp.lt.s32.totalorder %s4861_s18, 3 }
  0x54   : > { %p5110_p9 = por %p122_p4, %p121_p3  ;;  %s4882_s6 = smov [#allocation8]  }
  0x55   : > { %p5114_p10 = pnand %p3703_p5, %p439_p8  ;;  %s461_s28 = sshll.u32 %s4882_s6, 4  ;;  %s462_s28 = int_to_ptr.vmem [resolvable:$true] %s461_s28 }
  0x56   : > { %s7194_s19 = smul.u32 6144, %s4857_s17  ;;  %s7195_s3 = sld [smem:[#allocation275_spill]] }
  0x57   : > { %p4318_p11 = pneg %p5114_p10  ;;  %s7196_s14 = smul.u32 384, %s5017_s23 }
  0x58   : > { %s4632_s6 = scalar_lea.vmem %s462_s28, 2048  ;;  %p4640_p3 = scmp.lt.s32.totalorder %s462_s28, %s462_s28 }
  0x59   : > { %p5122_p12 = pnand %p4318_p11, %p122_p4  ;;  %s503_s9 = scalar_lea.vmem [#allocation13], %s7196_s14 }
  0x5a   : > { %s510_s15 = sshll.u32 %s503_s9, 4  ;;  %p4633_p0 = scmp.ne.s32.totalorder %s462_s28, %s4632_s6  ;;  %s5135_s15 = int_to_ptr.vmem [resolvable:$true] %s510_s15 }
  0x5b   : > { %p4623_p13 = pneg %p5122_p12  ;;  %p4641_p5 = scmp.lt.s32.totalorder %s4632_s6, %s4632_s6 }
  0x5c   : > { %s5131_s0 = scalar_lea.hbm %s7195_s3, %s7194_s19 }
  0x5d   : > { %p4635_p1 = pnand %p4633_p0, %p4623_p13  ;;  %p4642_p8 = por %p4641_p5, %p4640_p3 }
  0x5f   : > { %p4636_p2 = pneg %p4635_p1 }
  0x61   : > { %p4643_p11 = pnand %p4642_p8, %p4636_p2 }
  0x63   : > { %4646 = shalt.err (!%p4643_p11)
}
  0x64   : > { %s4883_s4 = smov 256   ;;  %s4884_s14 = smov 16  }
  0x65   : > { %s7197_s1 = sld [smem:[#allocation273_spill]]  ;;  %s4660_s24 = scalar_lea.vmem %s5135_s15, 6144 }
  0x66   : > { %p4661_p13 = scmp.ne.s32.totalorder %s5135_s15, %s4660_s24  ;;  %s4885_s6 = smov [#allocation13]  }
  0x67   : > { %s4665_s7 = sshll.u32 %s4885_s6, 4  ;;  %s4666_s7 = int_to_ptr.vmem [resolvable:$false] %s4665_s7 }
  0x68   : > { %p4663_p0 = pnand %p4661_p13, %p5038_p7  ;;  %s4667_s21 = scalar_lea.vmem %s4666_s7, 12288 }
  0x69   : > { %p4668_p2 = scmp.lt.s32.totalorder %s5135_s15, %s4666_s7  ;;  %p4669_p3 = scmp.lt.s32.totalorder %s4667_s21, %s4660_s24 }
  0x6a   : > { %p4664_p1 = pneg %p4663_p0 }
  0x6b   : > { %4321 = dma.hbm_to_vmem [thread:$0]  (!%p5122_p12), %s7197_s1, 2048, %s462_s28, [#allocation9], %s4883_s4, %s4883_s4, %s4884_s14  }
  0x6c   : > { %p4670_p5 = por %p4669_p3, %p4668_p2 }
  0x6e   : > { %p4671_p8 = pnand %p4670_p5, %p4664_p1 }
  0x70   : > { %4674 = shalt.err (!%p4671_p8)
}
  0x71   : > { %s7198_s29 = smov 192   ;;  %s7199_s28 = scalar_lea.sflag [#allocation12], %s5014_s22 }
  0x72   : > { %4328 = dma.hbm_to_vmem [thread:$0]  (!%p5029_p6), %s5131_s0, 6144, %s5135_s15, %s7199_s28, %s7198_s29, %s7198_s29, %s4877_s26  }
  0x73   : > { %s7200_s4 = smul.u32 3072, %s4857_s17  ;;  %s4886_s1 = smov [#allocation16]  }
  0x74   : > { %s7201_s9 = smul.u32 192, %s5017_s23  ;;  %s4693_s3 = sshll.u32 %s4886_s1, 4  ;;  %s4694_s3 = int_to_ptr.vmem [resolvable:$false] %s4693_s3 }
  0x75   : > { %s551_s21 = scalar_lea.hbm %s6914_s5, %s7200_s4  ;;  %s4695_s10 = scalar_lea.vmem %s4694_s3, 6144 }
  0x76   : > { %s545_s19 = scalar_lea.vmem [#allocation16], %s7201_s9 }
  0x77   : > { %s552_s24 = sshll.u32 %s545_s19, 4  ;;  %s553_s24 = int_to_ptr.vmem [resolvable:$true] %s552_s24 }
  0x78   : > { %s4688_s6 = scalar_lea.vmem %s553_s24, 3072  ;;  %p4696_p0 = scmp.lt.s32.totalorder %s553_s24, %s4694_s3 }
  0x79   : > { %p4689_p12 = scmp.ne.s32.totalorder %s553_s24, %s4688_s6  ;;  %p4697_p1 = scmp.lt.s32.totalorder %s4695_s10, %s4688_s6 }
  0x7b   : > { %p4691_p11 = pnand %p4689_p12, %p5038_p7  ;;  %p4698_p2 = por %p4697_p1, %p4696_p0 }
  0x7d   : > { %p4692_p13 = pneg %p4691_p11 }
  0x7f   : > { %p4699_p3 = pnand %p4698_p2, %p4692_p13 }
  0x81   : > { %4702 = shalt.err (!%p4699_p3)
}
  0x82   : > { %s7202_s23 = scalar_lea.sflag [#allocation15], %s5014_s22  ;;  %s4716_s1 = scalar_lea.vmem %s5098_s2, 1024 }
  0x83   : > { %4334 = dma.hbm_to_vmem [thread:$0]  (!%p5029_p6), %s551_s21, 3072, %s553_s24, %s7202_s23, %s7198_s29, %s7198_s29, %s4877_s26  }
  0x84   : > { %p4717_p5 = scmp.ne.s32.totalorder %s5098_s2, %s4716_s1  ;;  %s4887_s3 = smov [#allocation19]  }
  0x85   : > { %s4721_s10 = sshll.u32 %s4887_s3, 4  ;;  %s4722_s10 = int_to_ptr.vmem [resolvable:$false] %s4721_s10 }
  0x86   : > { %p4719_p8 = pnand %p4717_p5, %p5038_p7  ;;  %s4723_s15 = scalar_lea.vmem %s4722_s10, 2048 }
  0x87   : > { %p4724_p11 = scmp.lt.s32.totalorder %s5098_s2, %s4722_s10  ;;  %p4725_p13 = scmp.lt.s32.totalorder %s4723_s15, %s4716_s1 }
  0x88   : > { %p4720_p12 = pneg %p4719_p8 }
  0x89   : > { %p4726_p0 = por %p4725_p13, %p4724_p11 }
  0x8b   : > { %p4727_p1 = pnand %p4726_p0, %p4720_p12 }
  0x8d   : > { %4730 = shalt.err (!%p4727_p1)
}
  0x8e   : > { %s7203_s0 = smov 4   ;;  %s7204_s28 = smov 64  }
  0x8f   : > { %s7205_s26 = scalar_lea.sflag [#allocation18], %s5014_s22  ;;  %634 = sbr.rel (%p5114_p10) target bundleno = 1779 (0x6f3), region = 72 }
  0x90   : > { %4340 = dma.hbm_to_vmem [thread:$0]  (!%p5029_p6), %s5094_s25, 1024, %s5098_s2, %s7205_s26, %s7204_s28, %s7204_s28, %s7203_s0  }
  0x94   : > { %4816 = dma.done.wait (%p122_p4), [#allocation9], 2048  }
  0x95   : > { %4818 = vsyncadd (%p122_p4), [#allocation9], 4294965248  ;;  %s640_s13 = sand.u32 1, %s5101_s12   ;;  %s642_s20 = sand.u32 1, %s4845_s30  }
  0x96   : > { %s4291_s29 = smul.u32 384, %s642_s20  ;;  %s641_s4 = scalar_lea.sflag [#allocation12], %s640_s13 }
  0x98   : > { %s5196_s22 = scalar_lea.vmem [#allocation11], %s4291_s29 }
  0x99   : > { %4820 = dma.done.wait (%p5110_p9), %s641_s4, 12288  }
  0x9a   : > { %4822 = vsyncadd (%p5110_p9), %s641_s4, 4294955008  ;;  %s4292_s25 = smul.u32 192, %s642_s20  ;;  %s5202_s2 = scalar_lea.vmem [#allocation13], %s4291_s29 }
  0x9b   : > { %s659_s27 = scalar_lea.sflag [#allocation15], %s640_s13 }
  0x9c   : > { %s5204_s14 = scalar_lea.vmem [#allocation14], %s4292_s25 }
  0x9d   : > { %4824 = dma.done.wait (%p5110_p9), %s659_s27, 6144  }
  0x9e   : > { %4826 = vsyncadd (%p5110_p9), %s659_s27, 4294961152  ;;  %s3719_s7 = sshll.u32 %s642_s20, 6  ;;  %s5210_s21 = scalar_lea.vmem [#allocation16], %s4292_s25 }
  0x9f   : > { %s677_s9 = scalar_lea.sflag [#allocation18], %s640_s13  ;;  %s5212_s19 = scalar_lea.vmem [#allocation17], %s3719_s7 }
  0xa0   : > { %4828 = dma.done.wait (%p5110_p9), %s677_s9, 2048  }
  0xa1   : > { %4830 = vsyncadd (%p5110_p9), %s677_s9, 4294965248  ;;  %p778_p6 = scmp.lt.s32.totalorder %s4853_s16, 1  ;;  %s7206_s3 = sld [smem:[#allocation277_spill]] }
  0xa2   : > { %s7207_s28 = sld [smem:[#allocation278_spill]]  ;;  %p3721_p7 = scmp.ne.s32.totalorder %s4853_s16, 0 }
  0xa3   : > { %s779_s24 = scalar_select %p778_p6, %s4853_s16, 1 }
  0xa4   : > { %s7208_s20 = sld [smem:[#allocation279_spill]] }
  0xa5   : > { %s5220_s6 = smul.u32 3, %s779_s24  ;;  %s7209_s27 = sld [smem:[#allocation280_spill]] }
  0xa6   : > { %s5238_s24 = scalar_lea.vmem [#allocation19], %s3719_s7 }
  0xa7   : > { %s781_s10 = scalar_lea.vmem %s7206_s3, %s5220_s6  ;;  %798 = sbr.rel (%p3721_p7) target bundleno = 182 (0xb6), region = 104 }
  0xa8   : > { %s785_s26 = scalar_lea.vmem %s7207_s28, %s5220_s6 }
  0xaa   : > { %s789_s29 = scalar_lea.vmem %s7208_s20, %s5220_s6 }
  0xab   : > { %s793_s9 = scalar_lea.vmem %s7209_s27, %s5220_s6 }
  0xac   : > { %v799_v0 = vld [vmem:[#allocation8] sm:$0xff]  ;;  %v800_v1 = vld [vmem:[#allocation8 + $0x8] sm:$0xff]  ;;  %v801_v2 = vld [vmem:[#allocation8 + $0x10] sm:$0xff]  ;;  %v4888_v6 = vmov 0.0  }
  0xad   : > { %815 = vst [vmem:[#allocation2] sm:$0xff] %v799_v0  ;;  %816 = vst [vmem:[#allocation2 + $0x8] sm:$0xff] %v800_v1  ;;  %v802_v3 = vld [vmem:[#allocation8 + $0x18] sm:$0xff]  ;;  %v803_v4 = vld [vmem:[#allocation8 + $0x20] sm:$0xff] }
  0xae   : > { %817 = vst [vmem:[#allocation2 + $0x10] sm:$0xff] %v801_v2  ;;  %v804_v5 = vld [vmem:[#allocation8 + $0x28] sm:$0xff]  ;;  %831 = vst [vmem:[#allocation7] sm:$0xff] %v4888_v6  ;;  %v805_v7 = vld [vmem:[#allocation8 + $0x30] sm:$0xff] }
  0xaf   : > { %818 = vst [vmem:[#allocation2 + $0x18] sm:$0xff] %v802_v3  ;;  %819 = vst [vmem:[#allocation2 + $0x20] sm:$0xff] %v803_v4  ;;  %v806_v8 = vld [vmem:[#allocation8 + $0x38] sm:$0xff]  ;;  %v807_v9 = vld [vmem:[#allocation8 + $0x40] sm:$0xff] }
  0xb0   : > { %820 = vst [vmem:[#allocation2 + $0x28] sm:$0xff] %v804_v5  ;;  %821 = vst [vmem:[#allocation2 + $0x30] sm:$0xff] %v805_v7  ;;  %v808_v10 = vld [vmem:[#allocation8 + $0x48] sm:$0xff]  ;;  %v809_v11 = vld [vmem:[#allocation8 + $0x50] sm:$0xff] }
  0xb1   : > { %822 = vst [vmem:[#allocation2 + $0x38] sm:$0xff] %v806_v8  ;;  %823 = vst [vmem:[#allocation2 + $0x40] sm:$0xff] %v807_v9  ;;  %v810_v12 = vld [vmem:[#allocation8 + $0x58] sm:$0xff]  ;;  %v811_v13 = vld [vmem:[#allocation8 + $0x60] sm:$0xff] }
  0xb2   : > { %824 = vst [vmem:[#allocation2 + $0x48] sm:$0xff] %v808_v10  ;;  %825 = vst [vmem:[#allocation2 + $0x50] sm:$0xff] %v809_v11  ;;  %v812_v14 = vld [vmem:[#allocation8 + $0x68] sm:$0xff]  ;;  %v813_v15 = vld [vmem:[#allocation8 + $0x70] sm:$0xff] }
  0xb3   : > { %826 = vst [vmem:[#allocation2 + $0x58] sm:$0xff] %v810_v12  ;;  %827 = vst [vmem:[#allocation2 + $0x60] sm:$0xff] %v811_v13  ;;  %v814_v16 = vld [vmem:[#allocation8 + $0x78] sm:$0xff] }
  0xb4   : > { %828 = vst [vmem:[#allocation2 + $0x68] sm:$0xff] %v812_v14  ;;  %829 = vst [vmem:[#allocation2 + $0x70] sm:$0xff] %v813_v15 }
  0xb5   : > { %830 = vst [vmem:[#allocation2 + $0x78] sm:$0xff] %v814_v16 }
  0xb6 PF: > { %s7210_s1 = sld [smem:[#allocation272_spill]]  ;;  %v5247_v18 = vld [vmem:[%s5196_s22] sm:$0xff]  ;;  %v5250_v19 = vld [vmem:[%s5196_s22 + $0x8] sm:$0xf]  ;;  %v5253_v20 = vld [vmem:[%s5196_s22 + $0xc] sm:$0xff]  ;;  %s5874_s6 = smov 0  }
  0xb7   : > { %7212 = vst [vmem:[#allocation33_spill] sm:$0xff] %v5247_v18  ;;  %7213 = vst [vmem:[#allocation34_spill] sm:$0xff] %v5250_v19  ;;  %v5256_v21 = vld [vmem:[%s5196_s22 + $0x14] sm:$0xf]  ;;  %v5259_v22 = vld [vmem:[%s5196_s22 + $0x18] sm:$0xff] }
  0xb8   : > { %7214 = vst [vmem:[#allocation35_spill] sm:$0xff] %v5253_v20  ;;  %7215 = vst [vmem:[#allocation36_spill] sm:$0xff] %v5256_v21  ;;  %v5262_v23 = vld [vmem:[%s5196_s22 + $0x20] sm:$0xf]  ;;  %v5265_v24 = vld [vmem:[%s5196_s22 + $0x24] sm:$0xff] }
  0xb9   : > { %7216 = vst [vmem:[#allocation37_spill] sm:$0xff] %v5259_v22  ;;  %7217 = vst [vmem:[#allocation38_spill] sm:$0xff] %v5262_v23  ;;  %v5268_v25 = vld [vmem:[%s5196_s22 + $0x2c] sm:$0xf]  ;;  %v5271_v26 = vld [vmem:[%s5196_s22 + $0x30] sm:$0xff] }
  0xba   : > { %7218 = vst [vmem:[#allocation39_spill] sm:$0xff] %v5265_v24  ;;  %7219 = vst [vmem:[#allocation40_spill] sm:$0xff] %v5268_v25  ;;  %v5274_v27 = vld [vmem:[%s5196_s22 + $0x38] sm:$0xf]  ;;  %v5277_v28 = vld [vmem:[%s5196_s22 + $0x3c] sm:$0xff] }
  0xbb   : > { %7220 = vst [vmem:[#allocation41_spill] sm:$0xff] %v5271_v26  ;;  %7221 = vst [vmem:[#allocation42_spill] sm:$0xff] %v5274_v27  ;;  %v5280_v29 = vld [vmem:[%s5196_s22 + $0x44] sm:$0xf]  ;;  %v5283_v30 = vld [vmem:[%s5196_s22 + $0x48] sm:$0xff] }
  0xbc   : > { %v5244_v17 = vld [vmem:[%s7210_s1] sm:$0xff]  ;;  %7222 = vst [vmem:[#allocation43_spill] sm:$0xff] %v5277_v28  ;;  %7223 = vst [vmem:[#allocation44_spill] sm:$0xff] %v5280_v29  ;;  %v5292_v33 = vld [vmem:[%s5196_s22 + $0x5c] sm:$0xf] }
  0xbd   : > { %7211 = vst [vmem:[#allocation32_spill] sm:$0xff] %v5244_v17  ;;  %7224 = vst [vmem:[#allocation45_spill] sm:$0xff] %v5283_v30  ;;  %v5286_v31 = vld [vmem:[%s5196_s22 + $0x50] sm:$0xf]  ;;  %v5289_v32 = vld [vmem:[%s5196_s22 + $0x54] sm:$0xff] }
  0xbe   : > { %7225 = vst [vmem:[#allocation46_spill] sm:$0xff] %v5286_v31  ;;  %7226 = vst [vmem:[#allocation47_spill] sm:$0xff] %v5289_v32  ;;  %v5295_v34 = vld [vmem:[%s5196_s22 + $0x60] sm:$0xff]  ;;  %v5298_v35 = vld [vmem:[%s5196_s22 + $0x68] sm:$0xf] }
  0xbf   : > { %7227 = vst [vmem:[#allocation48_spill] sm:$0xff] %v5292_v33  ;;  %7228 = vst [vmem:[#allocation49_spill] sm:$0xff] %v5295_v34  ;;  %v5301_v36 = vld [vmem:[%s5196_s22 + $0x6c] sm:$0xff]  ;;  %v5304_v37 = vld [vmem:[%s5196_s22 + $0x74] sm:$0xf] }
  0xc0   : > { %7229 = vst [vmem:[#allocation50_spill] sm:$0xff] %v5298_v35  ;;  %7230 = vst [vmem:[#allocation51_spill] sm:$0xff] %v5301_v36  ;;  %v5307_v38 = vld [vmem:[%s5196_s22 + $0x78] sm:$0xff]  ;;  %v5310_v39 = vld [vmem:[%s5196_s22 + $0x80] sm:$0xf] }
  0xc1   : > { %7231 = vst [vmem:[#allocation52_spill] sm:$0xff] %v5304_v37  ;;  %7232 = vst [vmem:[#allocation53_spill] sm:$0xff] %v5307_v38  ;;  %v5313_v40 = vld [vmem:[%s5196_s22 + $0x84] sm:$0xff]  ;;  %v5316_v41 = vld [vmem:[%s5196_s22 + $0x8c] sm:$0xf] }
  0xc2   : > { %7233 = vst [vmem:[#allocation54_spill] sm:$0xff] %v5310_v39  ;;  %7234 = vst [vmem:[#allocation55_spill] sm:$0xff] %v5313_v40  ;;  %v5319_v42 = vld [vmem:[%s5196_s22 + $0x90] sm:$0xff]  ;;  %v5322_v43 = vld [vmem:[%s5196_s22 + $0x98] sm:$0xf] }
  0xc3   : > { %7235 = vst [vmem:[#allocation56_spill] sm:$0xff] %v5316_v41  ;;  %7236 = vst [vmem:[#allocation57_spill] sm:$0xff] %v5319_v42  ;;  %v5325_v44 = vld [vmem:[%s5196_s22 + $0x9c] sm:$0xff]  ;;  %v5328_v45 = vld [vmem:[%s5196_s22 + $0xa4] sm:$0xf] }
  0xc4   : > { %7237 = vst [vmem:[#allocation58_spill] sm:$0xff] %v5322_v43  ;;  %7238 = vst [vmem:[#allocation59_spill] sm:$0xff] %v5325_v44  ;;  %v5331_v46 = vld [vmem:[%s5196_s22 + $0xa8] sm:$0xff]  ;;  %v5334_v47 = vld [vmem:[%s5196_s22 + $0xb0] sm:$0xf] }
  0xc5   : > { %7239 = vst [vmem:[#allocation60_spill] sm:$0xff] %v5328_v45  ;;  %7240 = vst [vmem:[#allocation61_spill] sm:$0xff] %v5331_v46  ;;  %v5337_v48 = vld [vmem:[%s5196_s22 + $0xb4] sm:$0xff]  ;;  %v5340_v49 = vld [vmem:[%s5196_s22 + $0xbc] sm:$0xf] }
  0xc6   : > { %7241 = vst [vmem:[#allocation62_spill] sm:$0xff] %v5334_v47  ;;  %7242 = vst [vmem:[#allocation63_spill] sm:$0xff] %v5337_v48  ;;  %v5343_v50 = vld [vmem:[%s5196_s22 + $0xc0] sm:$0xff]  ;;  %v5346_v51 = vld [vmem:[%s5196_s22 + $0xc8] sm:$0xf] }
  0xc7   : > { %7243 = vst [vmem:[#allocation64_spill] sm:$0xff] %v5340_v49  ;;  %7244 = vst [vmem:[#allocation65_spill] sm:$0xff] %v5343_v50  ;;  %v5349_v52 = vld [vmem:[%s5196_s22 + $0xcc] sm:$0xff]  ;;  %v5352_v53 = vld [vmem:[%s5196_s22 + $0xd4] sm:$0xf] }
  0xc8   : > { %7245 = vst [vmem:[#allocation66_spill] sm:$0xff] %v5346_v51  ;;  %7246 = vst [vmem:[#allocation67_spill] sm:$0xff] %v5349_v52  ;;  %v5355_v54 = vld [vmem:[%s5196_s22 + $0xd8] sm:$0xff]  ;;  %v5358_v55 = vld [vmem:[%s5196_s22 + $0xe0] sm:$0xf] }
  0xc9   : > { %7247 = vst [vmem:[#allocation68_spill] sm:$0xff] %v5352_v53  ;;  %7248 = vst [vmem:[#allocation69_spill] sm:$0xff] %v5355_v54  ;;  %v5361_v56 = vld [vmem:[%s5196_s22 + $0xe4] sm:$0xff]  ;;  %v5364_v57 = vld [vmem:[%s5196_s22 + $0xec] sm:$0xf] }
  0xca   : > { %7249 = vst [vmem:[#allocation70_spill] sm:$0xff] %v5358_v55  ;;  %7250 = vst [vmem:[#allocation71_spill] sm:$0xff] %v5361_v56  ;;  %v5367_v58 = vld [vmem:[%s5196_s22 + $0xf0] sm:$0xff]  ;;  %v5370_v59 = vld [vmem:[%s5196_s22 + $0xf8] sm:$0xf] }
  0xcb   : > { %7251 = vst [vmem:[#allocation72_spill] sm:$0xff] %v5364_v57  ;;  %7252 = vst [vmem:[#allocation73_spill] sm:$0xff] %v5367_v58  ;;  %v5373_v60 = vld [vmem:[%s5196_s22 + $0xfc] sm:$0xff]  ;;  %v5376_v61 = vld [vmem:[%s5196_s22 + $0x104] sm:$0xf] }
  0xcc   : > { %7253 = vst [vmem:[#allocation74_spill] sm:$0xff] %v5370_v59  ;;  %7254 = vst [vmem:[#allocation75_spill] sm:$0xff] %v5373_v60  ;;  %v5379_v62 = vld [vmem:[%s5196_s22 + $0x108] sm:$0xff]  ;;  %v5382_v63 = vld [vmem:[%s5196_s22 + $0x110] sm:$0xf] }
  0xcd   : > { %7255 = vst [vmem:[#allocation76_spill] sm:$0xff] %v5376_v61  ;;  %7256 = vst [vmem:[#allocation77_spill] sm:$0xff] %v5379_v62  ;;  %v5385_v0 = vld [vmem:[%s5196_s22 + $0x114] sm:$0xff]  ;;  %v5388_v1 = vld [vmem:[%s5196_s22 + $0x11c] sm:$0xf] }
  0xce   : > { %7257 = vst [vmem:[#allocation78_spill] sm:$0xff] %v5382_v63  ;;  %7258 = vst [vmem:[#allocation79_spill] sm:$0xff] %v5385_v0  ;;  %v5391_v2 = vld [vmem:[%s5196_s22 + $0x120] sm:$0xff]  ;;  %v5394_v3 = vld [vmem:[%s5196_s22 + $0x128] sm:$0xf] }
  0xcf   : > { %7259 = vst [vmem:[#allocation80_spill] sm:$0xff] %v5388_v1  ;;  %7260 = vst [vmem:[#allocation81_spill] sm:$0xff] %v5391_v2  ;;  %v5397_v4 = vld [vmem:[%s5196_s22 + $0x12c] sm:$0xff]  ;;  %v5400_v5 = vld [vmem:[%s5196_s22 + $0x134] sm:$0xf] }
  0xd0   : > { %7261 = vst [vmem:[#allocation82_spill] sm:$0xff] %v5394_v3  ;;  %7262 = vst [vmem:[#allocation83_spill] sm:$0xff] %v5397_v4  ;;  %v5403_v6 = vld [vmem:[%s5196_s22 + $0x138] sm:$0xff]  ;;  %v5406_v7 = vld [vmem:[%s5196_s22 + $0x140] sm:$0xf] }
  0xd1   : > { %7263 = vst [vmem:[#allocation84_spill] sm:$0xff] %v5400_v5  ;;  %7264 = vst [vmem:[#allocation85_spill] sm:$0xff] %v5403_v6  ;;  %v5409_v8 = vld [vmem:[%s5196_s22 + $0x144] sm:$0xff]  ;;  %v5412_v9 = vld [vmem:[%s5196_s22 + $0x14c] sm:$0xf] }
  0xd2   : > { %7265 = vst [vmem:[#allocation86_spill] sm:$0xff] %v5406_v7  ;;  %7266 = vst [vmem:[#allocation87_spill] sm:$0xff] %v5409_v8  ;;  %v5415_v10 = vld [vmem:[%s5196_s22 + $0x150] sm:$0xff]  ;;  %v5418_v11 = vld [vmem:[%s5196_s22 + $0x158] sm:$0xf] }
  0xd3   : > { %7267 = vst [vmem:[#allocation88_spill] sm:$0xff] %v5412_v9  ;;  %7268 = vst [vmem:[#allocation89_spill] sm:$0xff] %v5415_v10  ;;  %v5421_v12 = vld [vmem:[%s5196_s22 + $0x15c] sm:$0xff]  ;;  %v5424_v13 = vld [vmem:[%s5196_s22 + $0x164] sm:$0xf] }
  0xd4   : > { %7269 = vst [vmem:[#allocation90_spill] sm:$0xff] %v5418_v11  ;;  %7270 = vst [vmem:[#allocation91_spill] sm:$0xff] %v5421_v12  ;;  %v5427_v14 = vld [vmem:[%s5196_s22 + $0x168] sm:$0xff]  ;;  %v5430_v15 = vld [vmem:[%s5196_s22 + $0x170] sm:$0xf] }
  0xd5   : > { %7271 = vst [vmem:[#allocation92_spill] sm:$0xff] %v5424_v13  ;;  %7272 = vst [vmem:[#allocation93_spill] sm:$0xff] %v5427_v14  ;;  %v5433_v16 = vld [vmem:[%s5196_s22 + $0x174] sm:$0xff]  ;;  %v5436_v50 = vld [vmem:[%s5196_s22 + $0x17c] sm:$0xf] }
  0xd6   : > { %7273 = vst [vmem:[#allocation94_spill] sm:$0xff] %v5430_v15  ;;  %7274 = vst [vmem:[#allocation95_spill] sm:$0xff] %v5433_v16  ;;  %v5439_v52 = vld [vmem:[%s5202_s2] sm:$0xff]  ;;  %v5442_v54 = vld [vmem:[%s5202_s2 + $0x8] sm:$0xf] }
  0xd7   : > { %7275 = vst [vmem:[#allocation96_spill] sm:$0xff] %v5436_v50  ;;  %7276 = vst [vmem:[#allocation97_spill] sm:$0xff] %v5439_v52  ;;  %v5445_v56 = vld [vmem:[%s5202_s2 + $0xc] sm:$0xff]  ;;  %v5448_v58 = vld [vmem:[%s5202_s2 + $0x14] sm:$0xf] }
  0xd8   : > { %7277 = vst [vmem:[#allocation98_spill] sm:$0xff] %v5442_v54  ;;  %7278 = vst [vmem:[#allocation99_spill] sm:$0xff] %v5445_v56  ;;  %v5451_v60 = vld [vmem:[%s5202_s2 + $0x18] sm:$0xff]  ;;  %v5454_v62 = vld [vmem:[%s5202_s2 + $0x20] sm:$0xf] }
  0xd9   : > { %7279 = vst [vmem:[#allocation100_spill] sm:$0xff] %v5448_v58  ;;  %7280 = vst [vmem:[#allocation101_spill] sm:$0xff] %v5451_v60  ;;  %v5457_v0 = vld [vmem:[%s5202_s2 + $0x24] sm:$0xff]  ;;  %v5460_v52 = vld [vmem:[%s5202_s2 + $0x2c] sm:$0xf] }
  0xda   : > { %7281 = vst [vmem:[#allocation102_spill] sm:$0xff] %v5454_v62  ;;  %7282 = vst [vmem:[#allocation103_spill] sm:$0xff] %v5457_v0  ;;  %v5463_v54 = vld [vmem:[%s5202_s2 + $0x30] sm:$0xff]  ;;  %v5466_v56 = vld [vmem:[%s5202_s2 + $0x38] sm:$0xf] }
  0xdb   : > { %7283 = vst [vmem:[#allocation104_spill] sm:$0xff] %v5460_v52  ;;  %7284 = vst [vmem:[#allocation105_spill] sm:$0xff] %v5463_v54  ;;  %v5469_v58 = vld [vmem:[%s5202_s2 + $0x3c] sm:$0xff]  ;;  %v5472_v60 = vld [vmem:[%s5202_s2 + $0x44] sm:$0xf] }
  0xdc   : > { %7285 = vst [vmem:[#allocation106_spill] sm:$0xff] %v5466_v56  ;;  %7286 = vst [vmem:[#allocation107_spill] sm:$0xff] %v5469_v58  ;;  %v5475_v62 = vld [vmem:[%s5202_s2 + $0x48] sm:$0xff]  ;;  %v5478_v0 = vld [vmem:[%s5202_s2 + $0x50] sm:$0xf] }
  0xdd   : > { %7287 = vst [vmem:[#allocation108_spill] sm:$0xff] %v5472_v60  ;;  %7288 = vst [vmem:[#allocation109_spill] sm:$0xff] %v5475_v62  ;;  %v5481_v52 = vld [vmem:[%s5202_s2 + $0x54] sm:$0xff]  ;;  %v5484_v54 = vld [vmem:[%s5202_s2 + $0x5c] sm:$0xf] }
  0xde   : > { %7289 = vst [vmem:[#allocation110_spill] sm:$0xff] %v5478_v0  ;;  %7290 = vst [vmem:[#allocation111_spill] sm:$0xff] %v5481_v52  ;;  %v5487_v56 = vld [vmem:[%s5202_s2 + $0x60] sm:$0xff]  ;;  %v5490_v58 = vld [vmem:[%s5202_s2 + $0x68] sm:$0xf] }
  0xdf   : > { %7291 = vst [vmem:[#allocation112_spill] sm:$0xff] %v5484_v54  ;;  %7292 = vst [vmem:[#allocation113_spill] sm:$0xff] %v5487_v56  ;;  %v5493_v60 = vld [vmem:[%s5202_s2 + $0x6c] sm:$0xff]  ;;  %v5496_v62 = vld [vmem:[%s5202_s2 + $0x74] sm:$0xf] }
  0xe0   : > { %7293 = vst [vmem:[#allocation114_spill] sm:$0xff] %v5490_v58  ;;  %7294 = vst [vmem:[#allocation115_spill] sm:$0xff] %v5493_v60  ;;  %v5499_v0 = vld [vmem:[%s5202_s2 + $0x78] sm:$0xff]  ;;  %v5502_v52 = vld [vmem:[%s5202_s2 + $0x80] sm:$0xf] }
  0xe1   : > { %7295 = vst [vmem:[#allocation116_spill] sm:$0xff] %v5496_v62  ;;  %7296 = vst [vmem:[#allocation117_spill] sm:$0xff] %v5499_v0  ;;  %v5505_v54 = vld [vmem:[%s5202_s2 + $0x84] sm:$0xff]  ;;  %v5508_v56 = vld [vmem:[%s5202_s2 + $0x8c] sm:$0xf] }
  0xe2   : > { %7297 = vst [vmem:[#allocation118_spill] sm:$0xff] %v5502_v52  ;;  %7298 = vst [vmem:[#allocation119_spill] sm:$0xff] %v5505_v54  ;;  %v5511_v58 = vld [vmem:[%s5202_s2 + $0x90] sm:$0xff]  ;;  %v5514_v60 = vld [vmem:[%s5202_s2 + $0x98] sm:$0xf] }
  0xe3   : > { %7299 = vst [vmem:[#allocation120_spill] sm:$0xff] %v5508_v56  ;;  %7300 = vst [vmem:[#allocation121_spill] sm:$0xff] %v5511_v58  ;;  %v5517_v62 = vld [vmem:[%s5202_s2 + $0x9c] sm:$0xff]  ;;  %v5520_v17 = vld [vmem:[%s5202_s2 + $0xa4] sm:$0xf] }
  0xe4   : > { %7301 = vst [vmem:[#allocation122_spill] sm:$0xff] %v5514_v60  ;;  %7302 = vst [vmem:[#allocation123_spill] sm:$0xff] %v5517_v62  ;;  %v5523_v52 = vld [vmem:[%s5202_s2 + $0xa8] sm:$0xff]  ;;  %v5526_v2 = vld [vmem:[%s5202_s2 + $0xb0] sm:$0xf] }
  0xe5   : > { %7303 = vst [vmem:[#allocation124_spill] sm:$0xff] %v5520_v17  ;;  %7304 = vst [vmem:[#allocation125_spill] sm:$0xff] %v5523_v52  ;;  %v5529_v56 = vld [vmem:[%s5202_s2 + $0xb4] sm:$0xff]  ;;  %v5532_v4 = vld [vmem:[%s5202_s2 + $0xbc] sm:$0xf]  ;;  %v5872_v52 = vmov 0.0  }
  0xe6   : > { %7305 = vst [vmem:[#allocation126_spill] sm:$0xff] %v5526_v2  ;;  %7306 = vst [vmem:[#allocation127_spill] sm:$0xff] %v5529_v56  ;;  %v5535_v60 = vld [vmem:[%s5202_s2 + $0xc0] sm:$0xff]  ;;  %v5538_v0 = vld [vmem:[%s5202_s2 + $0xc8] sm:$0xf] }
  0xe7   : > { %7307 = vst [vmem:[#allocation128_spill] sm:$0xff] %v5532_v4  ;;  %7308 = vst [vmem:[#allocation129_spill] sm:$0xff] %v5535_v60  ;;  %v5541_v17 = vld [vmem:[%s5202_s2 + $0xcc] sm:$0xff]  ;;  %v5544_v54 = vld [vmem:[%s5202_s2 + $0xd4] sm:$0xf] }
  0xe8   : > { %7309 = vst [vmem:[#allocation130_spill] sm:$0xff] %v5538_v0  ;;  %7310 = vst [vmem:[#allocation131_spill] sm:$0xff] %v5541_v17  ;;  %v5547_v2 = vld [vmem:[%s5202_s2 + $0xd8] sm:$0xff]  ;;  %v5550_v6 = vld [vmem:[%s5202_s2 + $0xe0] sm:$0xf] }
  0xe9   : > { %7311 = vst [vmem:[#allocation132_spill] sm:$0xff] %v5544_v54  ;;  %7312 = vst [vmem:[#allocation133_spill] sm:$0xff] %v5547_v2  ;;  %v5553_v4 = vld [vmem:[%s5202_s2 + $0xe4] sm:$0xff]  ;;  %v5556_v60 = vld [vmem:[%s5202_s2 + $0xec] sm:$0xf] }
  0xea   : > { %7313 = vst [vmem:[#allocation134_spill] sm:$0xff] %v5550_v6  ;;  %7314 = vst [vmem:[#allocation135_spill] sm:$0xff] %v5553_v4  ;;  %v5559_v0 = vld [vmem:[%s5202_s2 + $0xf0] sm:$0xff]  ;;  %v5562_v17 = vld [vmem:[%s5202_s2 + $0xf8] sm:$0xf] }
  0xeb   : > { %7315 = vst [vmem:[#allocation136_spill] sm:$0xff] %v5556_v60  ;;  %7316 = vst [vmem:[#allocation137_spill] sm:$0xff] %v5559_v0  ;;  %v5565_v54 = vld [vmem:[%s5202_s2 + $0xfc] sm:$0xff]  ;;  %v5568_v2 = vld [vmem:[%s5202_s2 + $0x104] sm:$0xf] }
  0xec   : > { %7317 = vst [vmem:[#allocation138_spill] sm:$0xff] %v5562_v17  ;;  %7318 = vst [vmem:[#allocation139_spill] sm:$0xff] %v5565_v54  ;;  %v5571_v6 = vld [vmem:[%s5202_s2 + $0x108] sm:$0xff]  ;;  %v5574_v4 = vld [vmem:[%s5202_s2 + $0x110] sm:$0xf] }
  0xed   : > { %7319 = vst [vmem:[#allocation140_spill] sm:$0xff] %v5568_v2  ;;  %7320 = vst [vmem:[#allocation141_spill] sm:$0xff] %v5571_v6  ;;  %v5577_v60 = vld [vmem:[%s5202_s2 + $0x114] sm:$0xff]  ;;  %v5580_v0 = vld [vmem:[%s5202_s2 + $0x11c] sm:$0xf] }
  0xee   : > { %7321 = vst [vmem:[#allocation142_spill] sm:$0xff] %v5574_v4  ;;  %7322 = vst [vmem:[#allocation143_spill] sm:$0xff] %v5577_v60  ;;  %v5583_v17 = vld [vmem:[%s5202_s2 + $0x120] sm:$0xff]  ;;  %v5586_v54 = vld [vmem:[%s5202_s2 + $0x128] sm:$0xf] }
  0xef   : > { %7323 = vst [vmem:[#allocation144_spill] sm:$0xff] %v5580_v0  ;;  %7324 = vst [vmem:[#allocation145_spill] sm:$0xff] %v5583_v17  ;;  %v5589_v2 = vld [vmem:[%s5202_s2 + $0x12c] sm:$0xff]  ;;  %v5592_v6 = vld [vmem:[%s5202_s2 + $0x134] sm:$0xf] }
  0xf0   : > { %7325 = vst [vmem:[#allocation146_spill] sm:$0xff] %v5586_v54  ;;  %7326 = vst [vmem:[#allocation147_spill] sm:$0xff] %v5589_v2  ;;  %v5595_v4 = vld [vmem:[%s5202_s2 + $0x138] sm:$0xff]  ;;  %v5598_v60 = vld [vmem:[%s5202_s2 + $0x140] sm:$0xf] }
  0xf1   : > { %7327 = vst [vmem:[#allocation148_spill] sm:$0xff] %v5592_v6  ;;  %7328 = vst [vmem:[#allocation149_spill] sm:$0xff] %v5595_v4  ;;  %v5601_v0 = vld [vmem:[%s5202_s2 + $0x144] sm:$0xff]  ;;  %v5604_v17 = vld [vmem:[%s5202_s2 + $0x14c] sm:$0xf] }
  0xf2   : > { %7329 = vst [vmem:[#allocation150_spill] sm:$0xff] %v5598_v60  ;;  %7330 = vst [vmem:[#allocation151_spill] sm:$0xff] %v5601_v0  ;;  %v5607_v54 = vld [vmem:[%s5202_s2 + $0x150] sm:$0xff]  ;;  %v5610_v2 = vld [vmem:[%s5202_s2 + $0x158] sm:$0xf] }
  0xf3   : > { %7331 = vst [vmem:[#allocation152_spill] sm:$0xff] %v5604_v17  ;;  %7332 = vst [vmem:[#allocation153_spill] sm:$0xff] %v5607_v54  ;;  %v5613_v6 = vld [vmem:[%s5202_s2 + $0x15c] sm:$0xff]  ;;  %v5616_v4 = vld [vmem:[%s5202_s2 + $0x164] sm:$0xf] }
  0xf4   : > { %7333 = vst [vmem:[#allocation154_spill] sm:$0xff] %v5610_v2  ;;  %7334 = vst [vmem:[#allocation155_spill] sm:$0xff] %v5613_v6  ;;  %v5619_v60 = vld [vmem:[%s5202_s2 + $0x168] sm:$0xff]  ;;  %v5622_v0 = vld [vmem:[%s5202_s2 + $0x170] sm:$0xf] }
  0xf5   : > { %7335 = vst [vmem:[#allocation156_spill] sm:$0xff] %v5616_v4  ;;  %7336 = vst [vmem:[#allocation157_spill] sm:$0xff] %v5619_v60  ;;  %v5625_v17 = vld [vmem:[%s5202_s2 + $0x174] sm:$0xff]  ;;  %v5628_v54 = vld [vmem:[%s5202_s2 + $0x17c] sm:$0xf] }
  0xf6   : > { %7337 = vst [vmem:[#allocation158_spill] sm:$0xff] %v5622_v0  ;;  %7338 = vst [vmem:[#allocation159_spill] sm:$0xff] %v5625_v17  ;;  %v5631_v2 = vld [vmem:[%s5204_s14] sm:$0xff]  ;;  %v5634_v6 = vld [vmem:[%s5204_s14 + $0x8] sm:$0xf] }
  0xf7   : > { %7339 = vst [vmem:[#allocation160_spill] sm:$0xff] %v5628_v54  ;;  %7340 = vst [vmem:[#allocation161_spill] sm:$0xff] %v5631_v2  ;;  %v5637_v4 = vld [vmem:[%s5204_s14 + $0xc] sm:$0xff]  ;;  %v5640_v60 = vld [vmem:[%s5204_s14 + $0x14] sm:$0xf] }
  0xf8   : > { %7341 = vst [vmem:[#allocation162_spill] sm:$0xff] %v5634_v6  ;;  %7342 = vst [vmem:[#allocation163_spill] sm:$0xff] %v5637_v4  ;;  %v5643_v0 = vld [vmem:[%s5204_s14 + $0x18] sm:$0xff]  ;;  %v5646_v17 = vld [vmem:[%s5204_s14 + $0x20] sm:$0xf] }
  0xf9   : > { %7343 = vst [vmem:[#allocation164_spill] sm:$0xff] %v5640_v60  ;;  %7344 = vst [vmem:[#allocation165_spill] sm:$0xff] %v5643_v0  ;;  %v5649_v54 = vld [vmem:[%s5204_s14 + $0x24] sm:$0xff]  ;;  %v5652_v2 = vld [vmem:[%s5204_s14 + $0x2c] sm:$0xf] }
  0xfa   : > { %7345 = vst [vmem:[#allocation166_spill] sm:$0xff] %v5646_v17  ;;  %7346 = vst [vmem:[#allocation167_spill] sm:$0xff] %v5649_v54  ;;  %v5655_v6 = vld [vmem:[%s5204_s14 + $0x30] sm:$0xff]  ;;  %v5658_v4 = vld [vmem:[%s5204_s14 + $0x38] sm:$0xf] }
  0xfb   : > { %7347 = vst [vmem:[#allocation168_spill] sm:$0xff] %v5652_v2  ;;  %7348 = vst [vmem:[#allocation169_spill] sm:$0xff] %v5655_v6  ;;  %v5661_v60 = vld [vmem:[%s5204_s14 + $0x3c] sm:$0xff]  ;;  %v5664_v0 = vld [vmem:[%s5204_s14 + $0x44] sm:$0xf] }
  0xfc   : > { %7349 = vst [vmem:[#allocation170_spill] sm:$0xff] %v5658_v4  ;;  %7350 = vst [vmem:[#allocation171_spill] sm:$0xff] %v5661_v60  ;;  %v5667_v17 = vld [vmem:[%s5204_s14 + $0x48] sm:$0xff]  ;;  %v5670_v54 = vld [vmem:[%s5204_s14 + $0x50] sm:$0xf] }
  0xfd   : > { %7351 = vst [vmem:[#allocation172_spill] sm:$0xff] %v5664_v0  ;;  %7352 = vst [vmem:[#allocation173_spill] sm:$0xff] %v5667_v17  ;;  %v5673_v2 = vld [vmem:[%s5204_s14 + $0x54] sm:$0xff]  ;;  %v5676_v6 = vld [vmem:[%s5204_s14 + $0x5c] sm:$0xf] }
  0xfe   : > { %7353 = vst [vmem:[#allocation174_spill] sm:$0xff] %v5670_v54  ;;  %7354 = vst [vmem:[#allocation175_spill] sm:$0xff] %v5673_v2  ;;  %v5679_v4 = vld [vmem:[%s5204_s14 + $0x60] sm:$0xff]  ;;  %v5682_v60 = vld [vmem:[%s5204_s14 + $0x68] sm:$0xf] }
  0xff   : > { %7355 = vst [vmem:[#allocation176_spill] sm:$0xff] %v5676_v6  ;;  %7356 = vst [vmem:[#allocation177_spill] sm:$0xff] %v5679_v4  ;;  %v5685_v8 = vld [vmem:[%s5204_s14 + $0x6c] sm:$0xff]  ;;  %v5688_v0 = vld [vmem:[%s5204_s14 + $0x74] sm:$0xf] }
 0x100   : > { %7357 = vst [vmem:[#allocation178_spill] sm:$0xff] %v5682_v60  ;;  %7358 = vst [vmem:[#allocation179_spill] sm:$0xff] %v5685_v8  ;;  %v5691_v17 = vld [vmem:[%s5204_s14 + $0x78] sm:$0xff]  ;;  %v5694_v54 = vld [vmem:[%s5204_s14 + $0x80] sm:$0xf] }
 0x101   : > { %7359 = vst [vmem:[#allocation180_spill] sm:$0xff] %v5688_v0  ;;  %7360 = vst [vmem:[#allocation181_spill] sm:$0xff] %v5691_v17  ;;  %v5697_v2 = vld [vmem:[%s5204_s14 + $0x84] sm:$0xff]  ;;  %v5700_v6 = vld [vmem:[%s5204_s14 + $0x8c] sm:$0xf] }
 0x102   : > { %7361 = vst [vmem:[#allocation182_spill] sm:$0xff] %v5694_v54  ;;  %7362 = vst [vmem:[#allocation183_spill] sm:$0xff] %v5697_v2  ;;  %v5703_v4 = vld [vmem:[%s5204_s14 + $0x90] sm:$0xff]  ;;  %v5706_v60 = vld [vmem:[%s5204_s14 + $0x98] sm:$0xf] }
 0x103   : > { %7363 = vst [vmem:[#allocation184_spill] sm:$0xff] %v5700_v6  ;;  %7364 = vst [vmem:[#allocation185_spill] sm:$0xff] %v5703_v4  ;;  %v5709_v0 = vld [vmem:[%s5204_s14 + $0x9c] sm:$0xff]  ;;  %v5712_v8 = vld [vmem:[%s5204_s14 + $0xa4] sm:$0xf] }
 0x104   : > { %7365 = vst [vmem:[#allocation186_spill] sm:$0xff] %v5706_v60  ;;  %7366 = vst [vmem:[#allocation187_spill] sm:$0xff] %v5709_v0  ;;  %v5715_v54 = vld [vmem:[%s5204_s14 + $0xa8] sm:$0xff]  ;;  %v5718_v17 = vld [vmem:[%s5204_s14 + $0xb0] sm:$0xf]  ;;  %v1029_v60 = vlaneseq }
 0x105   : > { %7367 = vst [vmem:[#allocation188_spill] sm:$0xff] %v5712_v8  ;;  %7368 = vst [vmem:[#allocation189_spill] sm:$0xff] %v5715_v54  ;;  %v5721_v6 = vld [vmem:[%s5204_s14 + $0xb4] sm:$0xff]  ;;  %v5724_v2 = vld [vmem:[%s5204_s14 + $0xbc] sm:$0xf] }
 0x106   : > { %7369 = vst [vmem:[#allocation190_spill] sm:$0xff] %v5718_v17  ;;  %7370 = vst [vmem:[#allocation191_spill] sm:$0xff] %v5721_v6  ;;  %v5727_v4 = vld [vmem:[%s5210_s21] sm:$0xff]  ;;  %v5730_v0 = vld [vmem:[%s5210_s21 + $0x8] sm:$0xf] }
 0x107   : > { %7371 = vst [vmem:[#allocation192_spill] sm:$0xff] %v5724_v2  ;;  %7372 = vst [vmem:[#allocation193_spill] sm:$0xff] %v5727_v4  ;;  %v5733_v8 = vld [vmem:[%s5210_s21 + $0xc] sm:$0xff]  ;;  %v5736_v54 = vld [vmem:[%s5210_s21 + $0x14] sm:$0xf] }
 0x108   : > { %7373 = vst [vmem:[#allocation194_spill] sm:$0xff] %v5730_v0  ;;  %7374 = vst [vmem:[#allocation195_spill] sm:$0xff] %v5733_v8  ;;  %v5739_v17 = vld [vmem:[%s5210_s21 + $0x18] sm:$0xff]  ;;  %v5742_v6 = vld [vmem:[%s5210_s21 + $0x20] sm:$0xf] }
 0x109   : > { %7375 = vst [vmem:[#allocation196_spill] sm:$0xff] %v5736_v54  ;;  %7376 = vst [vmem:[#allocation197_spill] sm:$0xff] %v5739_v17  ;;  %v5745_v2 = vld [vmem:[%s5210_s21 + $0x24] sm:$0xff]  ;;  %v5748_v4 = vld [vmem:[%s5210_s21 + $0x2c] sm:$0xf] }
 0x10a   : > { %7377 = vst [vmem:[#allocation198_spill] sm:$0xff] %v5742_v6  ;;  %7378 = vst [vmem:[#allocation199_spill] sm:$0xff] %v5745_v2  ;;  %v5751_v0 = vld [vmem:[%s5210_s21 + $0x30] sm:$0xff]  ;;  %v5754_v8 = vld [vmem:[%s5210_s21 + $0x38] sm:$0xf]  ;;  %v1030_v6 = vshrl.u32 %v1029_v60, 7 }
 0x10b   : > { %7379 = vst [vmem:[#allocation200_spill] sm:$0xff] %v5748_v4  ;;  %7380 = vst [vmem:[#allocation201_spill] sm:$0xff] %v5751_v0  ;;  %v5757_v54 = vld [vmem:[%s5210_s21 + $0x3c] sm:$0xff]  ;;  %v5760_v58 = vld [vmem:[%s5210_s21 + $0x44] sm:$0xf] }
 0x10c   : > { %7381 = vst [vmem:[#allocation202_spill] sm:$0xff] %v5754_v8  ;;  %7382 = vst [vmem:[#allocation203_spill] sm:$0xff] %v5757_v54  ;;  %v5763_v17 = vld [vmem:[%s5210_s21 + $0x48] sm:$0xff]  ;;  %v5766_v2 = vld [vmem:[%s5210_s21 + $0x50] sm:$0xf]  ;;  %v5814_v10 = vsub.s32 2, %v1030_v6 }
 0x10d   : > { %7383 = vst [vmem:[#allocation204_spill] sm:$0xff] %v5760_v58  ;;  %7384 = vst [vmem:[#allocation205_spill] sm:$0xff] %v5763_v17  ;;  %v5769_v4 = vld [vmem:[%s5210_s21 + $0x54] sm:$0xff]  ;;  %v5772_v62 = vld [vmem:[%s5210_s21 + $0x5c] sm:$0xf] }
 0x10e   : > { %7385 = vst [vmem:[#allocation206_spill] sm:$0xff] %v5766_v2  ;;  %7386 = vst [vmem:[#allocation207_spill] sm:$0xff] %v5769_v4  ;;  %v5775_v0 = vld [vmem:[%s5210_s21 + $0x60] sm:$0xff]  ;;  %v5778_v8 = vld [vmem:[%s5210_s21 + $0x68] sm:$0xf] }
 0x10f   : > { %7387 = vst [vmem:[#allocation208_spill] sm:$0xff] %v5772_v62  ;;  %7388 = vst [vmem:[#allocation209_spill] sm:$0xff] %v5775_v0  ;;  %v5781_v58 = vld [vmem:[%s5210_s21 + $0x6c] sm:$0xff]  ;;  %v5784_v54 = vld [vmem:[%s5210_s21 + $0x74] sm:$0xf]  ;;  %v5803_v0 = vsub.s32 1, %v1030_v6 }
 0x110   : > { %7389 = vst [vmem:[#allocation210_spill] sm:$0xff] %v5778_v8  ;;  %7390 = vst [vmem:[#allocation211_spill] sm:$0xff] %v5781_v58  ;;  %v5787_v60 = vld [vmem:[%s5210_s21 + $0x78] sm:$0xff]  ;;  %v5790_v2 = vld [vmem:[%s5210_s21 + $0x80] sm:$0xf]  ;;  %v5801_v8 = vsub.s32 0, %v1030_v6 }
 0x111   : > { %7391 = vst [vmem:[#allocation212_spill] sm:$0xff] %v5784_v54  ;;  %7392 = vst [vmem:[#allocation213_spill] sm:$0xff] %v5787_v60  ;;  %v5793_v62 = vld [vmem:[%s5210_s21 + $0x84] sm:$0xff]  ;;  %v5796_v17 = vld [vmem:[%s5210_s21 + $0x8c] sm:$0xf] }
 0x112   : > { %7393 = vst [vmem:[#allocation214_spill] sm:$0xff] %v5790_v2  ;;  %7394 = vst [vmem:[#allocation215_spill] sm:$0xff] %v5793_v62  ;;  %v5799_v4 = vld [vmem:[%s5210_s21 + $0x90] sm:$0xff]  ;;  %v5806_v58 = vld [vmem:[%s5210_s21 + $0x98] sm:$0xf] }
 0x113   : > { %7395 = vst [vmem:[#allocation216_spill] sm:$0xff] %v5796_v17  ;;  %7396 = vst [vmem:[#allocation217_spill] sm:$0xff] %v5799_v4  ;;  %v5809_v54 = vld [vmem:[%s5210_s21 + $0x9c] sm:$0xff]  ;;  %v5812_v60 = vld [vmem:[%s5210_s21 + $0xa4] sm:$0xf] }
 0x114   : > { %7397 = vst [vmem:[#allocation218_spill] sm:$0xff] %v5801_v8  ;;  %7398 = vst [vmem:[#allocation219_spill] sm:$0xff] %v5803_v0  ;;  %v5817_v2 = vld [vmem:[%s5210_s21 + $0xa8] sm:$0xff]  ;;  %v5820_v62 = vld [vmem:[%s5210_s21 + $0xb0] sm:$0xf] }
 0x115   : > { %7399 = vst [vmem:[#allocation220_spill] sm:$0xff] %v5806_v58  ;;  %7400 = vst [vmem:[#allocation221_spill] sm:$0xff] %v5809_v54  ;;  %v5823_v12 = vld [vmem:[%s5210_s21 + $0xb4] sm:$0xff]  ;;  %v5826_v17 = vld [vmem:[%s5210_s21 + $0xbc] sm:$0xf] }
 0x116   : > { %7401 = vst [vmem:[#allocation222_spill] sm:$0xff] %v5812_v60  ;;  %7402 = vst [vmem:[#allocation223_spill] sm:$0xff] %v5814_v10  ;;  %v5833_v4 = vld [vmem:[%s781_s10] sm:$0x7] }
 0x117   : > { %7403 = vst [vmem:[#allocation224_spill] sm:$0xff] %v5817_v2  ;;  %7404 = vst [vmem:[#allocation225_spill] sm:$0xff] %v5820_v62  ;;  %v5840_v6 = vld [vmem:[%s785_s26] sm:$0x7] }
 0x118   : > { %7405 = vst [vmem:[#allocation226_spill] sm:$0xff] %v5823_v12  ;;  %7406 = vst [vmem:[#allocation227_spill] sm:$0xff] %v5826_v17  ;;  %v1027_v58 = vld [vmem:[%s789_s29] sm:$0x7]  ;;  %v5870_v12 = vmov 0.0  }
 0x119   : > { %7408 = vst [vmem:[#allocation228_spill] sm:$0xff] %v5833_v4  ;;  %7410 = vst [vmem:[#allocation229_spill] sm:$0xff] %v5840_v6  ;;  %v1044_v60 = vld [vmem:[%s793_s9] sm:$0x7]  ;;  %v5853_v62 = vrot.slane %v1027_v58, %v5801_v8  ;;  %v5856_v4 = vrot.slane %v1027_v58, %v5803_v0  ;;  %v5859_v17 = vrot.slane %v1027_v58, %v5814_v10 }
 0x11a   : > { %v5862_v6 = vrot.slane %v1044_v60, %v5801_v8  ;;  %v5865_v54 = vrot.slane %v1044_v60, %v5803_v0  ;;  %v5868_v2 = vrot.slane %v1044_v60, %v5814_v10 }
 0x11b   : > { %7413 = vst [vmem:[#allocation230_spill] sm:$0xff] %v5853_v62  ;;  %7414 = vst [vmem:[#allocation231_spill] sm:$0xff] %v5859_v17 }
 0x11c   : > { %7415 = vst [vmem:[#allocation232_spill] sm:$0xff] %v5862_v6  ;;  %7416 = vst [vmem:[#allocation233_spill] sm:$0xff] %v5865_v54 }
 0x11d   : > { %7417 = vst [vmem:[#allocation234_spill] sm:$0xff] %v5868_v2 }
 0x11e LB: >> { %v7419_v0 = vld [vmem:[#allocation219_spill] sm:$0xff]  ;;  %v7421_v8 = vld [vmem:[#allocation218_spill] sm:$0xff]  ;;  %v7426_v38 = vld [vmem:[#allocation53_spill] sm:$0xff]  ;;  %s3722_s10 = sshll.u32 %s4873_s6, 5  ;;  %s5943_s27 = sshll.u32 %s4873_s6, 2  ;;  %vm4891_vm4 = vmmov 0   ;;  %v4869_v52 = vphi %v5872_v52, %v7714_v52   ;;  %v4865_v12 = vphi %v5870_v12, %v7713_v12   ;;  %s4873_s6 = sphi %s5874_s6, %s1066_s6  }
 0x11f   : >> { %v7420_v10 = vld [vmem:[#allocation223_spill] sm:$0xff]  ;;  %v7428_v34 = vld [vmem:[#allocation49_spill] sm:$0xff]  ;;  %v7441_v50 = vld [vmem:[#allocation96_spill] sm:$0xff]  ;;  %s1074_s26 = sshra.s32 %s3722_s10, 3  ;;  %s3931_s9 = sadd.s32 4, %s5943_s27 }
 0x120   : >> { %v7422_v56 = vld [vmem:[#allocation127_spill] sm:$0xff]  ;;  %v7430_v30 = vld [vmem:[#allocation45_spill] sm:$0xff]  ;;  %v7442_v15 = vld [vmem:[#allocation94_spill] sm:$0xff]  ;;  %s3932_s29 = sshll.u32 %s1074_s26, 4  ;;  %s1072_s7 = ssub.s32 8, %s3931_s9 }
 0x121   : >> { %v7423_v48 = vld [vmem:[#allocation63_spill] sm:$0xff]  ;;  %v7432_v26 = vld [vmem:[#allocation41_spill] sm:$0xff]  ;;  %v3776_v6 = vcombine.low %v7442_v15, %v7441_v50  ;;  %v7443_v49 = vld [vmem:[#allocation64_spill] sm:$0xff]  ;;  %s5912_s25 = scalar_lea.vmem [#allocation2], %s3932_s29  ;;  %s3724_s23 = sshll.u32 %s1072_s7, 3 }
 0x122   : >> { %v7418_v62 = vld [vmem:[#allocation230_spill] sm:$0xff]  ;;  %v7424_v44 = vld [vmem:[#allocation59_spill] sm:$0xff]  ;;  %v7434_v22 = vld [vmem:[#allocation37_spill] sm:$0xff]  ;;  %s5972_s1 = sshra.s32 %s3724_s23, 3  ;;  %s1881_s2 = ssub.s32 7, %s5943_s27 }
 0x123   : >> { %v7425_v40 = vld [vmem:[#allocation55_spill] sm:$0xff]  ;;  %v7436_v18 = vld [vmem:[#allocation33_spill] sm:$0xff]  ;;  %v7444_v47 = vld [vmem:[#allocation62_spill] sm:$0xff]  ;;  %3937 = vmatprep.subr.bf16.mxu1 %v3776_v6  ;;  %s3933_s22 = sshll.u32 %s5972_s1, 4  ;;  %s2611_s14 = sadd.s32 2, %s5943_s27 }
 0x124   : >> { %v7427_v36 = vld [vmem:[#allocation51_spill] sm:$0xff]  ;;  %v7438_v14 = vld [vmem:[#allocation93_spill] sm:$0xff]  ;;  %v3745_v17 = vcombine.high %v7426_v38, %v7425_v40  ;;  %v7445_v13 = vld [vmem:[#allocation92_spill] sm:$0xff]  ;;  %v3744_v15 = vcombine.low %v7426_v38, %v7425_v40  ;;  %s6006_s3 = scalar_lea.vmem [#allocation2], %s3933_s22  ;;  %s2849_s15 = sadd.s32 3, %s5943_s27  ;;  %v1882_v38 = vpack.c.bf16 %v4869_v52, %v4869_v52 }
 0x125   : >> { %v7429_v32 = vld [vmem:[#allocation47_spill] sm:$0xff]  ;;  %v7439_v42 = vld [vmem:[#allocation57_spill] sm:$0xff]  ;;  %v7446_v11 = vld [vmem:[#allocation90_spill] sm:$0xff]  ;;  %s2373_s0 = sadd.s32 1, %s5943_s27  ;;  %s2374_s28 = ssub.s32 6, %s5943_s27 }
 0x126   : >> { %v7431_v28 = vld [vmem:[#allocation43_spill] sm:$0xff]  ;;  %v7440_v46 = vld [vmem:[#allocation61_spill] sm:$0xff]  ;;  %v3748_v2 = vcombine.high %v7439_v42, %v7424_v44  ;;  %v3747_v54 = vcombine.low %v7439_v42, %v7424_v44  ;;  %v7447_v45 = vld [vmem:[#allocation60_spill] sm:$0xff]  ;;  %v3742_v42 = vcombine.high %v7428_v34, %v7427_v36  ;;  %s2612_s8 = ssub.s32 5, %s5943_s27  ;;  %s2850_s13 = ssub.s32 4, %s5943_s27 }
 0x127   : >> { %v7433_v24 = vld [vmem:[#allocation39_spill] sm:$0xff]  ;;  %v3751_v58 = vcombine.high %v7440_v46, %v7423_v48  ;;  %v3750_v60 = vcombine.low %v7440_v46, %v7423_v48  ;;  %v3752_v46 = vcombine.low %v7444_v47, %v7443_v49  ;;  %v7448_v43 = vld [vmem:[#allocation58_spill] sm:$0xff]  ;;  %v7449_v9 = vld [vmem:[#allocation88_spill] sm:$0xff]  ;;  %s6568_s20 = scalar_lea.vmem [#allocation3], %s3722_s10  ;;  %s3878_s21 = sshll.u32 %s1881_s2, 3 }
 0x128   : >> { %v7435_v20 = vld [vmem:[#allocation35_spill] sm:$0xff]  ;;  %v7450_v7 = vld [vmem:[#allocation86_spill] sm:$0xff]  ;;  %v1082_v6 = vld [vmem:[%s5912_s25 + $0x18] sm:$0xff]  ;;  %s2371_s4 = scalar_lea.vmem [#allocation4], %s3878_s21  ;;  %s3886_s10 = sshll.u32 %s2374_s28, 3 }
 0x129   : >> { %v7437_v16 = vld [vmem:[#allocation95_spill] sm:$0xff]  ;;  %1380 = vmatprep.subr.bf16.mxu0 %v3751_v58  ;;  %v3773_v58 = vcombine.low %v7446_v11, %v7445_v13  ;;  %3938 = vmatpush3.bf16.msra.mxu1 %v3752_v46  ;;  %v1080_v46 = vld [vmem:[%s5912_s25 + $0x8] sm:$0xff]  ;;  %v7451_v41 = vld [vmem:[#allocation56_spill] sm:$0xff]  ;;  %v7023_v11 = vmov 0   ;;  %s2609_s26 = scalar_lea.vmem [#allocation4], %s3886_s10  ;;  %s3894_s29 = sshll.u32 %s2612_s8, 3 }
 0x12a   : >> { %1381 = vmatpush1.bf16.msra.mxu0 %v3750_v60  ;;  %v3749_v60 = vcombine.low %v7448_v43, %v7447_v45  ;;  %v7452_v39 = vld [vmem:[#allocation54_spill] sm:$0xff]  ;;  %v7453_v5 = vld [vmem:[#allocation84_spill] sm:$0xff]  ;;  %4437 = vset.pattern.permute.xlu0 %v7023_v11  ;;  %v7477_v13 = vld [vmem:[#allocation121_spill] sm:$0xff]  ;;  %s3902_s9 = sshll.u32 %s2850_s13, 3  ;;  %s1066_s6 = sadd.s32 1, %s4873_s6  }
 0x12b   : >> { %1382 = vmatprep.subr.bf16.mxu0 %v3748_v2  ;;  %3939 = vmatprep.subr.bf16.mxu1 %v3773_v58  ;;  %v3770_v2 = vcombine.low %v7450_v7, %v7449_v9  ;;  %v3741_v58 = vcombine.low %v7428_v34, %v7427_v36  ;;  %v7454_v3 = vld [vmem:[#allocation82_spill] sm:$0xff]  ;;  %v3739_v7 = vcombine.high %v7430_v30, %v7429_v32  ;;  %v7455_v37 = vld [vmem:[#allocation52_spill] sm:$0xff]  ;;  %v7606_v40 = vld [vmem:[#allocation217_spill] sm:$0xff]  ;;  %s3085_s7 = scalar_lea.vmem [#allocation4], %s3902_s9  ;;  %p1063_p4 = scmp.ge.s32.totalorder %s1066_s6, 2  }
 0x12c   : >> { %v1088_v9 = vpack.c.bf16 %v1082_v6, %v1080_v46  ;;  %v7456_v35 = vld [vmem:[#allocation50_spill] sm:$0xff]  ;;  %v7457_v1 = vld [vmem:[#allocation80_spill] sm:$0xff]  ;;  %4438 = vset.pattern.permute.xlu1 %v7023_v11  ;;  %v3735_v6 = vcombine.low %v7432_v26, %v7431_v28  ;;  %v7475_v11 = vld [vmem:[#allocation89_spill] sm:$0xff]  ;;  %p3919_p9 = scmp.ge.s32.totalorder (%p1063_p4), %s4853_s16, 1 }
 0x12d   : >> { %3940 = vmatpush3.bf16.msra.mxu1 %v3749_v60  ;;  %v3743_v60 = vcombine.low %v7456_v35, %v7455_v37  ;;  %v7458_v63 = vld [vmem:[#allocation78_spill] sm:$0xff]  ;;  %v7459_v33 = vld [vmem:[#allocation48_spill] sm:$0xff]  ;;  %v7610_v43 = vld [vmem:[#allocation213_spill] sm:$0xff] }
 0x12e   : >> { %1383 = vmatpush1.bf16.msra.mxu0 %v3747_v54  ;;  %v3746_v54 = vcombine.low %v7452_v39, %v7451_v41  ;;  %3941 = vmatprep.subr.bf16.mxu1 %v3770_v2  ;;  %v3736_v2 = vcombine.high %v7432_v26, %v7431_v28  ;;  %v7460_v31 = vld [vmem:[#allocation46_spill] sm:$0xff]  ;;  %v7461_v61 = vld [vmem:[#allocation76_spill] sm:$0xff]  ;;  %v7487_v26 = vld [vmem:[#allocation113_spill] sm:$0xff] }
 0x12f   : >> { %1384 = vmatprep.subr.bf16.mxu0 %v3745_v17  ;;  %v3767_v17 = vcombine.low %v7454_v3, %v7453_v5  ;;  %1465 = vmatprep.mubr.bf16.mxu1 %v1088_v9  ;;  %v3740_v46 = vcombine.low %v7460_v31, %v7459_v33  ;;  %v7462_v59 = vld [vmem:[#allocation74_spill] sm:$0xff]  ;;  %v7463_v29 = vld [vmem:[#allocation44_spill] sm:$0xff]  ;;  %v7618_v48 = vld [vmem:[#allocation205_spill] sm:$0xff] }
 0x130   : >> { %1412 = vmatprep.mubr.bf16.mxu0 %v1088_v9  ;;  %v7464_v27 = vld [vmem:[#allocation42_spill] sm:$0xff]  ;;  %v7465_v57 = vld [vmem:[#allocation72_spill] sm:$0xff] }
 0x131   : >> { %3942 = vmatpush3.bf16.msra.mxu1 %v3746_v54  ;;  %v3761_v54 = vcombine.low %v7462_v59, %v7461_v61  ;;  %v3737_v9 = vcombine.low %v7464_v27, %v7463_v29  ;;  %v7466_v55 = vld [vmem:[#allocation70_spill] sm:$0xff]  ;;  %v7467_v25 = vld [vmem:[#allocation40_spill] sm:$0xff]  ;;  %v2783_v29 = vstv %s2611_s14 }
 0x132   : >> { %1385 = vmatpush1.bf16.msra.mxu0 %v3744_v15  ;;  %v3738_v15 = vcombine.low %v7430_v30, %v7429_v32  ;;  %3943 = vmatprep.subr.bf16.mxu1 %v3767_v17  ;;  %v3758_v17 = vcombine.low %v7466_v55, %v7465_v57  ;;  %v7468_v23 = vld [vmem:[#allocation38_spill] sm:$0xff]  ;;  %v7469_v53 = vld [vmem:[#allocation68_spill] sm:$0xff] }
 0x133   : >> { %1386 = vmatprep.subr.bf16.mxu0 %v3742_v42  ;;  %v3764_v42 = vcombine.low %v7458_v63, %v7457_v1  ;;  %v7470_v51 = vld [vmem:[#allocation66_spill] sm:$0xff]  ;;  %v7471_v21 = vld [vmem:[#allocation36_spill] sm:$0xff] }
 0x134   : >> { %v7472_v19 = vld [vmem:[#allocation34_spill] sm:$0xff]  ;;  %v1086_v5 = vld [vmem:[%s5912_s25 + $0x38] sm:$0xff] }
 0x135   : >> { %3944 = vmatpush3.bf16.msra.mxu1 %v3743_v60  ;;  %v3730_v60 = vcombine.high %v7436_v18, %v7435_v20  ;;  %v1084_v3 = vld [vmem:[%s5912_s25 + $0x28] sm:$0xff]  ;;  %v7588_v32 = vld [vmem:[#allocation172_spill] sm:$0xff] }
 0x136   : >> { %1387 = vmatpush1.bf16.msra.mxu0 %v3741_v58  ;;  %3945 = vmatprep.subr.bf16.mxu1 %v3764_v42  ;;  %v3732_v58 = vcombine.low %v7434_v22, %v7433_v24  ;;  %v3729_v42 = vcombine.low %v7436_v18, %v7435_v20  ;;  %v7481_v18 = vld [vmem:[#allocation117_spill] sm:$0xff]  ;;  %v7589_v33 = vld [vmem:[#allocation170_spill] sm:$0xff]  ;;  %v7595_v35 = vld [vmem:[#allocation168_spill] sm:$0xff] }
 0x137   : >> { %1388 = vmatprep.subr.bf16.mxu0 %v3739_v7  ;;  %v3733_v7 = vcombine.high %v7434_v22, %v7433_v24  ;;  %v7483_v20 = vld [vmem:[#allocation81_spill] sm:$0xff]  ;;  %v1085_v22 = vld [vmem:[%s5912_s25 + $0x30] sm:$0xff]  ;;  %v7596_v36 = vld [vmem:[#allocation166_spill] sm:$0xff] }
 0x138   : >> { %v7619_v50 = vld [vmem:[#allocation212_spill] sm:$0xff]  ;;  %v7624_v55 = vld [vmem:[#allocation206_spill] sm:$0xff] }
 0x139   : >> { %3946 = vmatpush3.bf16.msra.mxu1 %v3740_v46  ;;  %v3775_v46 = vcombine.high %v7438_v14, %v7437_v16  ;;  %v7628_v57 = vld [vmem:[#allocation204_spill] sm:$0xff]  ;;  %v7633_v61 = vld [vmem:[#allocation198_spill] sm:$0xff] }
 0x13a   : >> { %1389 = vmatpush1.bf16.msra.mxu0 %v3738_v15  ;;  %3947 = vmatprep.subr.bf16.mxu1 %v3761_v54  ;;  %v3734_v15 = vcombine.low %v7468_v23, %v7467_v25  ;;  %v1079_v54 = vld [vmem:[%s5912_s25] sm:$0xff]  ;;  %v7485_v23 = vmov 0   ;;  %v7486_v25 = vld [vmem:[#allocation115_spill] sm:$0xff]  ;;  %v7635_v63 = vld [vmem:[#allocation194_spill] sm:$0xff] }
 0x13b   : >> { %1390 = vmatprep.subr.bf16.mxu0 %v3736_v2  ;;  %v3755_v2 = vcombine.low %v7470_v51, %v7469_v53  ;;  %v3790_v27 = vcombine.high %v7487_v26, %v7486_v25  ;;  %v7620_v51 = vld [vmem:[#allocation210_spill] sm:$0xff] }
 0x13d   : >> { %3948 = vmatpush3.bf16.msra.mxu1 %v3737_v9  ;;  %v3774_v9 = vcombine.low %v7438_v14, %v7437_v16 }
 0x13e   : >> { %1391 = vmatpush1.bf16.msra.mxu0 %v3735_v6  ;;  %3949 = vmatprep.subr.bf16.mxu1 %v3758_v17  ;;  %v3731_v6 = vcombine.low %v7472_v19, %v7471_v21  ;;  %v7482_v19 = vld [vmem:[#allocation83_spill] sm:$0xff]  ;;  %v1083_v21 = vld [vmem:[%s5912_s25 + $0x20] sm:$0xff] }
 0x13f   : >> { %1392 = vmatprep.subr.bf16.mxu0 %v3733_v7  ;;  %v1081_v7 = vld [vmem:[%s5912_s25 + $0x10] sm:$0xff]  ;;  %v3765_v24 = vcombine.low %v7483_v20, %v7482_v19  ;;  %v6019_v28 = vpack.c.bf16 %v1085_v22, %v1083_v21  ;;  %s2847_s25 = scalar_lea.vmem [#allocation4], %s3894_s29 }
 0x140   : >> { %v7490_v22 = vld [vmem:[#allocation111_spill] sm:$0xff] }
 0x141   : >> { %3950 = vmatpush3.bf16.msra.mxu1 %v3734_v15  ;;  %v5974_v15 = vpack.c.bf16 %v1081_v7, %v1079_v54  ;;  %v7478_v54 = vld [vmem:[#allocation87_spill] sm:$0xff]  ;;  %v7479_v7 = vld [vmem:[#allocation85_spill] sm:$0xff] }
 0x142   : >> { %1393 = vmatpush1.bf16.msra.mxu0 %v3732_v58  ;;  %3951 = vmatprep.subr.bf16.mxu1 %v3755_v2  ;;  %v7473_v58 = vld [vmem:[#allocation125_spill] sm:$0xff]  ;;  %v3769_v16 = vcombine.high %v7479_v7, %v7478_v54 }
 0x143   : >> { %1394 = vmatprep.subr.bf16.mxu0 %v3730_v60  ;;  %v3799_v17 = vcombine.high %v7473_v58, %v7422_v56  ;;  %v7474_v60 = vld [vmem:[#allocation91_spill] sm:$0xff] }
 0x144   : >> { %v3772_v1 = vcombine.high %v7475_v11, %v7474_v60  ;;  %v3771_v2 = vcombine.low %v7475_v11, %v7474_v60  ;;  %v7480_v11 = vld [vmem:[#allocation119_spill] sm:$0xff]  ;;  %v7632_v60 = vld [vmem:[#allocation200_spill] sm:$0xff] }
 0x145   : >> { %3952 = vmatpush3.bf16.msra.mxu1 %v3731_v6  ;;  %v5987_v6 = vpack.c.bf16 %v1086_v5, %v1084_v3  ;;  %v3793_v3 = vcombine.high %v7481_v18, %v7480_v11  ;;  %v2310_v5 = vstv %s1881_s2 }
 0x146   : >> { %1395 = vmatpush1.bf16.msra.mxu0 %v3729_v42  ;;  %v3798_v42 = vcombine.low %v7473_v58, %v7422_v56  ;;  %1766 = vmatprep.subr.bf16.mxu1 %v3799_v17  ;;  %v2308_v17 = vstv %s5943_s27  ;;  %v7629_v58 = vld [vmem:[#allocation202_spill] sm:$0xff] }
 0x147   : >> { %1396 = vmatprep.subr.bf16.mxu0 %v3775_v46  ;;  %v7476_v46 = vld [vmem:[#allocation123_spill] sm:$0xff] }
 0x148   : >> { %v3796_v14 = vcombine.high %v7477_v13, %v7476_v46  ;;  %1466 = vmatmul.mubr.bf16.vlgmr.msra.gmra.mxu1 %v5974_v15 }
 0x149   : >> { %1767 = vmatpush1.bf16.msra.mxu1 %v3798_v42  ;;  %1473 = vmatprep.mubr.bf16.mxu1 %v5987_v6  ;;  %v3766_v42 = vcombine.high %v7483_v20, %v7482_v19  ;;  %v7501_v20 = vld [vmem:[#allocation65_spill] sm:$0xff] }
 0x14a   : >> { %1397 = vmatpush2.bf16.msra.mxu0 %v3774_v9  ;;  %v3795_v9 = vcombine.low %v7477_v13, %v7476_v46  ;;  %1768 = vmatprep.subr.bf16.mxu1 %v3796_v14  ;;  %v1099_v13 = vld [vmem:[%s6006_s3 + $0x18] sm:$0xff]  ;;  %v3792_v14 = vcombine.low %v7481_v18, %v7480_v11 }
 0x14b   : >> { %1398 = vmatprep.subr.bf16.mxu0 %v3772_v1  ;;  %v3768_v1 = vcombine.low %v7479_v7, %v7478_v54  ;;  %v7484_v7 = vld [vmem:[#allocation32_spill] sm:$0xff] }
 0x14c   : >> { %vm2309_vm0 = vcmp.lt.s32.totalorder %v2308_v17, %v7484_v7  ;;  %vm2311_vm1 = vcmp.lt.s32.totalorder %v2310_v5, %v7484_v7  ;;  %v7489_v17 = vld [vmem:[#allocation77_spill] sm:$0xff]  ;;  %vm2784_vm2 = vcmp.lt.s32.totalorder %v2783_v29, %v7484_v7  ;;  %v7623_v54 = vld [vmem:[#allocation208_spill] sm:$0xff] }
 0x14d   : >> { %1769 = vmatpush1.bf16.msra.mxu1 %v3795_v9  ;;  %v7488_v9 = vld [vmem:[#allocation79_spill] sm:$0xff]  ;;  %v7495_v29 = vld [vmem:[#allocation105_spill] sm:$0xff] }
 0x14e   : >> { %1399 = vmatpush2.bf16.msra.mxu0 %v3771_v2  ;;  %v1097_v2 = vld [vmem:[%s6006_s3 + $0x8] sm:$0xff]  ;;  %1770 = vmatprep.subr.bf16.mxu1 %v3793_v3  ;;  %v3763_v30 = vcombine.high %v7489_v17, %v7488_v9  ;;  %v3789_v3 = vcombine.low %v7487_v26, %v7486_v25  ;;  %v3762_v21 = vcombine.low %v7489_v17, %v7488_v9  ;;  %v7497_v17 = vld [vmem:[#allocation69_spill] sm:$0xff] }
 0x14f   : >> { %1400 = vmatprep.subr.bf16.mxu0 %v3769_v16  ;;  %v2333_v16 = vsel %vm2309_vm0, 1, %v7485_v23  ;;  %v6023_v11 = vpack.c.bf16 %v1099_v13, %v1097_v2  ;;  %v7491_v13 = vld [vmem:[#allocation109_spill] sm:$0xff]  ;;  %v7505_v25 = vld [vmem:[#allocation158_spill] sm:$0xff] }
 0x150   : >> { %2335 = vperm.xlu0 %4437, %v2333_v16   ;;  %1474 = vmatmul.mubr.bf16.gmra.mxu1 %v6019_v28  ;;  %v3787_v5 = vcombine.high %v7491_v13, %v7490_v22  ;;  %v7493_v2 = vld [vmem:[#allocation73_spill] sm:$0xff]  ;;  %v3786_v18 = vcombine.low %v7491_v13, %v7490_v22  ;;  %v7500_v13 = vld [vmem:[#allocation67_spill] sm:$0xff] }
 0x151   : >> { %1771 = vmatpush1.bf16.msra.mxu1 %v3792_v14  ;;  %1798 = vmatprep.mubr.bf16.mxu1 %v6023_v11  ;;  %v2808_v14 = vsel %vm2784_vm2, 1, %v7485_v23  ;;  %v7503_v22 = vld [vmem:[#allocation97_spill] sm:$0xff] }
 0x152   : >> { %1401 = vmatpush2.bf16.msra.mxu0 %v3768_v1  ;;  %v2360_v1 = vsel %vm2311_vm1, 1, %v7485_v23  ;;  %1772 = vmatprep.subr.bf16.mxu1 %v3790_v27  ;;  %v7494_v27 = vld [vmem:[#allocation107_spill] sm:$0xff]  ;;  %vm4893_vm1 = vmmov (%p1063_p4), 0  }
 0x153   : >> { %1402 = vmatprep.subr.bf16.mxu0 %v3766_v42  ;;  %v7492_v42 = vld [vmem:[#allocation75_spill] sm:$0xff]  ;;  %v3784_v9 = vcombine.high %v7495_v29, %v7494_v27 }
 0x154   : >> { %v3760_v16 = vcombine.high %v7493_v2, %v7492_v42  ;;  %2362 = vperm.xlu0 %4437, %v2360_v1   ;;  %v3783_v1 = vcombine.low %v7495_v29, %v7494_v27  ;;  %v7507_v27 = vld [vmem:[#allocation126_spill] sm:$0xff] }
 0x155   : >> { %1773 = vmatpush1.bf16.msra.mxu1 %v3789_v3 }
 0x156   : >> { %1403 = vmatpush2.bf16.msra.mxu0 %v3765_v24  ;;  %v3759_v24 = vcombine.low %v7493_v2, %v7492_v42  ;;  %1774 = vmatprep.subr.bf16.mxu1 %v3787_v5  ;;  %v7499_v2 = vld [vmem:[#allocation101_spill] sm:$0xff]  ;;  %v7607_v42 = vld [vmem:[#allocation227_spill] sm:$0xff] }
 0x157   : >> { %1404 = vmatprep.subr.bf16.mxu0 %v3763_v30  ;;  %v7496_v30 = vld [vmem:[#allocation71_spill] sm:$0xff] }
 0x158   : >> { %v3757_v19 = vcombine.high %v7497_v17, %v7496_v30  ;;  %2810 = vperm.xlu0 %4437, %v2808_v14   ;;  %v3756_v3 = vcombine.low %v7497_v17, %v7496_v30  ;;  %v7586_v30 = vld [vmem:[#allocation165_spill] sm:$0xff] }
 0x159   : >> { %1775 = vmatpush1.bf16.msra.mxu1 %v3786_v18  ;;  %v3753_v18 = vcombine.low %v7501_v20, %v7500_v13 }
 0x15a   : >> { %1405 = vmatpush2.bf16.msra.mxu0 %v3762_v21  ;;  %1776 = vmatprep.subr.bf16.mxu1 %v3784_v9  ;;  %v7498_v21 = vld [vmem:[#allocation103_spill] sm:$0xff]  ;;  %v7504_v9 = vld [vmem:[#allocation160_spill] sm:$0xff] }
 0x15b   : >> { %1406 = vmatprep.subr.bf16.mxu0 %v3760_v16  ;;  %v3781_v5 = vcombine.high %v7499_v2, %v7498_v21  ;;  %v3754_v16 = vcombine.high %v7501_v20, %v7500_v13  ;;  %v3780_v14 = vcombine.low %v7499_v2, %v7498_v21  ;;  %v3824_v26 = vcombine.low %v7505_v25, %v7504_v9  ;;  %v7509_v13 = vld [vmem:[#allocation154_spill] sm:$0xff]  ;;  %v7510_v20 = vld [vmem:[#allocation159_spill] sm:$0xff]  ;;  %v7511_v21 = vld [vmem:[#allocation157_spill] sm:$0xff] }
 0x15c   : >> { %v3823_v29 = vcombine.high %v7511_v21, %v7510_v20  ;;  %v3822_v25 = vcombine.low %v7511_v21, %v7510_v20  ;;  %v7517_v9 = vld [vmem:[#allocation150_spill] sm:$0xff]  ;;  %v7522_v20 = vld [vmem:[#allocation151_spill] sm:$0xff]  ;;  %v7523_v21 = vld [vmem:[#allocation149_spill] sm:$0xff] }
 0x15d   : >> { %1777 = vmatpush1.bf16.msra.mxu1 %v3783_v1  ;;  %v7506_v1 = vld [vmem:[#allocation128_spill] sm:$0xff] }
 0x15e   : >> { %1407 = vmatpush2.bf16.msra.mxu0 %v3759_v24  ;;  %1778 = vmatprep.subr.bf16.mxu1 %v3781_v5  ;;  %v7502_v24 = vld [vmem:[#allocation99_spill] sm:$0xff]  ;;  %v3800_v2 = vcombine.low %v7507_v27, %v7506_v1 }
 0x15f   : >> { %1408 = vmatprep.subr.bf16.mxu0 %v3757_v19  ;;  %v3778_v17 = vcombine.high %v7503_v22, %v7502_v24  ;;  %v3777_v19 = vcombine.low %v7503_v22, %v7502_v24  ;;  %v7552_v22 = vld [vmem:[#allocation191_spill] sm:$0xff] }
 0x161   : >> { %1779 = vmatpush1.bf16.msra.mxu1 %v3780_v14  ;;  %v7513_v14 = vld [vmem:[#allocation122_spill] sm:$0xff] }
 0x162   : >> { %1409 = vmatpush2.bf16.msra.mxu0 %v3756_v3  ;;  %1780 = vmatprep.subr.bf16.mxu1 %v3778_v17  ;;  %v7508_v3 = vld [vmem:[#allocation156_spill] sm:$0xff]  ;;  %v7514_v17 = vld [vmem:[#allocation155_spill] sm:$0xff] }
 0x163   : >> { %1410 = vmatprep.subr.bf16.mxu0 %v3754_v16  ;;  %v3821_v5 = vcombine.low %v7509_v13, %v7508_v3  ;;  %v7512_v16 = vld [vmem:[#allocation124_spill] sm:$0xff] }
 0x164   : >> { %v7516_v13 = vld [vmem:[#allocation152_spill] sm:$0xff] }
 0x165   : >> { %1781 = vmatpush1.bf16.msra.mxu1 %v3777_v19  ;;  %v3818_v1 = vcombine.low %v7517_v9, %v7516_v13  ;;  %v7518_v19 = vld [vmem:[#allocation120_spill] sm:$0xff]  ;;  %v7527_v9 = vld [vmem:[#allocation145_spill] sm:$0xff] }
 0x166   : >> { %1411 = vmatpush2.bf16.msra.mxu0 %v3753_v18  ;;  %v3797_v18 = vcombine.low %v7513_v14, %v7512_v16  ;;  %1782 = vmatprep.subr.bf16.mxu1 %v3823_v29  ;;  %v7520_v16 = vld [vmem:[#allocation148_spill] sm:$0xff]  ;;  %v3816_v29 = vcombine.low %v7523_v21, %v7522_v20 }
 0x167   : >> { %3965 = vmatprep.subr.bf16.mxu0 %v3824_v26  ;;  %v7515_v26 = vld [vmem:[#allocation153_spill] sm:$0xff] }
 0x168   : >> { %v3820_v27 = vcombine.high %v7515_v26, %v7514_v17 }
 0x169   : >> { %1413 = vmatmul.mubr.bf16.vlgmr.msra.gmra.mxu0 %v5974_v15  ;;  %1783 = vmatpush2.bf16.msra.mxu1 %v3822_v25  ;;  %v3819_v15 = vcombine.low %v7515_v26, %v7514_v17  ;;  %v7524_v25 = vld [vmem:[#allocation116_spill] sm:$0xff] }
 0x16a   : >> { %3966 = vmatpush3.bf16.msra.mxu0 %v3800_v2  ;;  %1422 = vmatprep.mubr.bf16.mxu0 %v5987_v6  ;;  %v7519_v2 = vld [vmem:[#allocation118_spill] sm:$0xff]  ;;  %v7534_v17 = vld [vmem:[#allocation140_spill] sm:$0xff] }
 0x16b   : >> { %3967 = vmatprep.subr.bf16.mxu0 %v3821_v5  ;;  %v3794_v3 = vcombine.low %v7519_v2, %v7518_v19  ;;  %1784 = vmatprep.subr.bf16.mxu1 %v3820_v27  ;;  %v7521_v6 = vld [vmem:[#allocation146_spill] sm:$0xff]  ;;  %v3817_v5 = vcombine.high %v7523_v21, %v7522_v20  ;;  %v7526_v27 = vld [vmem:[#allocation147_spill] sm:$0xff]  ;;  %v7528_v19 = vld [vmem:[#allocation144_spill] sm:$0xff] }
 0x16c   : >> { %v3815_v14 = vcombine.low %v7521_v6, %v7520_v16  ;;  %v7529_v2 = vld [vmem:[#allocation142_spill] sm:$0xff] }
 0x16d   : >> { %1785 = vmatpush2.bf16.msra.mxu1 %v3819_v15  ;;  %v3812_v16 = vcombine.low %v7529_v2, %v7528_v19  ;;  %v7530_v15 = vld [vmem:[#allocation112_spill] sm:$0xff]  ;;  %v7535_v20 = vld [vmem:[#allocation138_spill] sm:$0xff] }
 0x16e   : >> { %3968 = vmatpush3.bf16.msra.mxu0 %v3797_v18  ;;  %v7525_v18 = vld [vmem:[#allocation114_spill] sm:$0xff]  ;;  %1786 = vmatprep.subr.bf16.mxu1 %v3817_v5 }
 0x16f   : >> { %3969 = vmatprep.subr.bf16.mxu0 %v3818_v1  ;;  %v3791_v13 = vcombine.low %v7525_v18, %v7524_v25  ;;  %v3814_v1 = vcombine.high %v7527_v9, %v7526_v27  ;;  %v7532_v25 = vld [vmem:[#allocation143_spill] sm:$0xff]  ;;  %v7533_v18 = vld [vmem:[#allocation141_spill] sm:$0xff]  ;;  %v7537_v19 = vld [vmem:[#allocation106_spill] sm:$0xff] }
 0x170   : >> { %v3810_v5 = vcombine.low %v7533_v18, %v7532_v25 }
 0x171   : >> { %1423 = vmatmul.mubr.bf16.gmra.mxu0 %v6019_v28  ;;  %1787 = vmatpush2.bf16.msra.mxu1 %v3816_v29  ;;  %v3813_v28 = vcombine.low %v7527_v9, %v7526_v27  ;;  %v7536_v29 = vld [vmem:[#allocation108_spill] sm:$0xff]  ;;  %v7539_v9 = vld [vmem:[#allocation137_spill] sm:$0xff] }
 0x172   : >> { %3970 = vmatpush3.bf16.msra.mxu0 %v3794_v3  ;;  %1851 = vmatprep.mubr.bf16.mxu0 %v6023_v11  ;;  %v7531_v3 = vld [vmem:[#allocation110_spill] sm:$0xff]  ;;  %v3811_v11 = vcombine.high %v7533_v18, %v7532_v25  ;;  %v3785_v2 = vcombine.low %v7537_v19, %v7536_v29  ;;  %v7545_v29 = vld [vmem:[#allocation133_spill] sm:$0xff]  ;;  %v7546_v18 = vld [vmem:[#allocation132_spill] sm:$0xff]  ;;  %v7573_v25 = vmov 0.0  }
 0x173   : >> { %3971 = vmatprep.subr.bf16.mxu0 %v3815_v14  ;;  %v3788_v6 = vcombine.low %v7531_v3, %v7530_v15  ;;  %1788 = vmatprep.subr.bf16.mxu1 %v3814_v1  ;;  %v3809_v14 = vcombine.low %v7535_v20, %v7534_v17  ;;  %v7540_v15 = vld [vmem:[#allocation136_spill] sm:$0xff]  ;;  %v7579_v27 = vld [vmem:[#allocation169_spill] sm:$0xff] }
 0x174   : >> { %v7542_v17 = vld [vmem:[#allocation104_spill] sm:$0xff] }
 0x175   : >> { %1789 = vmatpush2.bf16.msra.mxu1 %v3813_v28  ;;  %v7543_v28 = vld [vmem:[#allocation102_spill] sm:$0xff] }
 0x176   : >> { %3972 = vmatpush3.bf16.msra.mxu0 %v3791_v13  ;;  %1790 = vmatprep.subr.bf16.mxu1 %v3811_v11  ;;  %v7538_v13 = vld [vmem:[#allocation139_spill] sm:$0xff] }
 0x177   : >> { %3973 = vmatprep.subr.bf16.mxu0 %v3812_v16  ;;  %v3808_v1 = vcombine.high %v7539_v9, %v7538_v13  ;;  %v7541_v16 = vld [vmem:[#allocation134_spill] sm:$0xff]  ;;  %v3807_v20 = vcombine.low %v7539_v9, %v7538_v13  ;;  %v7544_v11 = vld [vmem:[#allocation135_spill] sm:$0xff]  ;;  %v1096_v9 = vld [vmem:[%s6006_s3] sm:$0xff] }
 0x178   : >> { %v3806_v3 = vcombine.low %v7541_v16, %v7540_v15  ;;  %v3805_v19 = vcombine.high %v7545_v29, %v7544_v11  ;;  %v7548_v15 = vld [vmem:[#allocation100_spill] sm:$0xff]  ;;  %v1098_v13 = vld [vmem:[%s6006_s3 + $0x10] sm:$0xff] }
 0x179   : >> { %1791 = vmatpush2.bf16.msra.mxu1 %v3810_v5  ;;  %v3804_v5 = vcombine.low %v7545_v29, %v7544_v11 }
 0x17a   : >> { %3974 = vmatpush3.bf16.msra.mxu0 %v3788_v6  ;;  %v3782_v6 = vcombine.low %v7543_v28, %v7542_v17  ;;  %1792 = vmatprep.subr.bf16.mxu1 %v3808_v1  ;;  %v7550_v17 = vld [vmem:[#allocation131_spill] sm:$0xff]  ;;  %v7551_v1 = vld [vmem:[#allocation129_spill] sm:$0xff] }
 0x17b   : >> { %3975 = vmatprep.subr.bf16.mxu0 %v3809_v14  ;;  %v7547_v14 = vld [vmem:[#allocation130_spill] sm:$0xff]  ;;  %v3802_v28 = vcombine.high %v7551_v1, %v7550_v17 }
 0x17c   : >> { %v3803_v21 = vcombine.low %v7547_v14, %v7546_v18  ;;  %v1101_v18 = vld [vmem:[%s6006_s3 + $0x28] sm:$0xff]  ;;  %v1104_v14 = vpack.c.bf16 %v1098_v13, %v1096_v9  ;;  %v7556_v9 = vld [vmem:[#allocation192_spill] sm:$0xff] }
 0x17d   : >> { %1793 = vmatpush2.bf16.msra.mxu1 %v3807_v20  ;;  %v1103_v20 = vld [vmem:[%s6006_s3 + $0x38] sm:$0xff]  ;;  %v7557_v13 = vld [vmem:[#allocation190_spill] sm:$0xff] }
 0x17e   : >> { %3976 = vmatpush3.bf16.msra.mxu0 %v3785_v2  ;;  %v7549_v2 = vld [vmem:[#allocation98_spill] sm:$0xff]  ;;  %1794 = vmatprep.subr.bf16.mxu1 %v3805_v19 }
 0x17f   : >> { %3977 = vmatprep.subr.bf16.mxu0 %v3806_v3  ;;  %v3779_v16 = vcombine.low %v7549_v2, %v7548_v15  ;;  %v7553_v3 = vld [vmem:[#allocation189_spill] sm:$0xff]  ;;  %v1107_v15 = vpack.c.bf16 %v1103_v20, %v1101_v18  ;;  %v1102_v18 = vld [vmem:[%s6006_s3 + $0x30] sm:$0xff] }
 0x180   : >> { %v6132_v24 = vcombine.high %v7553_v3, %v7552_v22  ;;  %v6140_v19 = vcombine.low %v7553_v3, %v7552_v22  ;;  %v7555_v2 = vld [vmem:[#allocation185_spill] sm:$0xff]  ;;  %v7558_v20 = vld [vmem:[#allocation183_spill] sm:$0xff] }
 0x181   : >> { %1795 = vmatpush2.bf16.msra.mxu1 %v3804_v5  ;;  %v6149_v5 = vcombine.low %v7557_v13, %v7556_v9  ;;  %v7560_v13 = vld [vmem:[#allocation188_spill] sm:$0xff] }
 0x182   : >> { %3978 = vmatpush3.bf16.msra.mxu0 %v3782_v6  ;;  %v3801_v6 = vcombine.low %v7551_v1, %v7550_v17  ;;  %1796 = vmatprep.subr.bf16.mxu1 %v3802_v28  ;;  %v1100_v28 = vld [vmem:[%s6006_s3 + $0x20] sm:$0xff] }
 0x183   : >> { %3979 = vmatprep.subr.bf16.mxu0 %v3803_v21  ;;  %v7554_v21 = vld [vmem:[#allocation187_spill] sm:$0xff]  ;;  %v7559_v1 = vld [vmem:[#allocation181_spill] sm:$0xff]  ;;  %v1106_v9 = vpack.c.bf16 %v1102_v18, %v1100_v28 }
 0x184   : >> { %v6145_v11 = vcombine.high %v7555_v2, %v7554_v21  ;;  %v6161_v3 = vcombine.high %v7559_v1, %v7558_v20  ;;  %v6173_v22 = vcombine.low %v7559_v1, %v7558_v20  ;;  %v7564_v28 = vld [vmem:[#allocation177_spill] sm:$0xff] }
 0x185   : >> { %1797 = vmatpush2.bf16.msra.mxu1 %v3801_v6  ;;  %v7074_v6 = vmov 0.0   ;;  %v7571_v20 = vld [vmem:[#allocation173_spill] sm:$0xff] }
 0x186   : >> { %3980 = vmatpush3.bf16.msra.mxu0 %v3779_v16  ;;  %v6154_v16 = vcombine.low %v7555_v2, %v7554_v21  ;;  %4083 = vmatprep.subr.bf16.mxu1 %v7074_v6  ;;  %v7561_v2 = vld [vmem:[#allocation186_spill] sm:$0xff]  ;;  %v3021_v21 = vstv %s2849_s15  ;;  %7562 = vst [vmem:[#allocation235_spill] sm:$0xff] %v6173_v22 }
 0x187   : >> { %2011 = vmatprep.subr.bf16.mxu0 %v6132_v24  ;;  %v6168_v17 = vcombine.low %v7561_v2, %v7560_v13  ;;  %vm3022_vm3 = vcmp.lt.s32.totalorder %v3021_v21, %v7484_v7  ;;  %v7567_v13 = vld [vmem:[#allocation182_spill] sm:$0xff] }
 0x188   : >> { %1799 = vmatmul.mubr.bf16.vlgmr.msra.gmra.mxu1 %v1104_v14  ;;  %v3046_v2 = vsel %vm3022_vm3, 1, %v7485_v23 }
 0x189   : >> { %1852 = vmatmul.mubr.bf16.vlgmr.msra.gmra.mxu0 %v1104_v14  ;;  %4084 = vmatpush3.bf16.msra.mxu1 %v6149_v5  ;;  %v7563_v14 = vld [vmem:[#allocation179_spill] sm:$0xff] }
 0x18a   : >> { %2012 = vmatpush1.bf16.msra.mxu0 %v6140_v19  ;;  %1859 = vmatprep.mubr.bf16.mxu0 %v1107_v15  ;;  %v6180_v18 = vcombine.high %v7564_v28, %v7563_v14  ;;  %v6191_v21 = vcombine.low %v7564_v28, %v7563_v14 }
 0x18b   : >> { %2013 = vmatprep.subr.bf16.mxu0 %v6145_v11  ;;  %1808 = vmatprep.mubr.bf16.mxu1 %v1107_v15  ;;  %v7566_v15 = vld [vmem:[#allocation184_spill] sm:$0xff] }
 0x18c   : >> { %4085 = vmatprep.subr.bf16.mxu1 %v7074_v6  ;;  %7565 = vst [vmem:[#allocation236_spill] sm:$0xff] %v6180_v18  ;;  %3048 = vperm.xlu0 %4437, %v3046_v2   ;;  %v6186_v1 = vcombine.low %v7567_v13, %v7566_v15  ;;  %7569 = vst [vmem:[#allocation238_spill] sm:$0xff] %v6191_v21  ;;  %v7570_v6 = vld [vmem:[#allocation175_spill] sm:$0xff]  ;;  %v7574_v15 = vld [vmem:[#allocation180_spill] sm:$0xff] }
 0x18d   : >> { %4086 = vmatpush3.bf16.msra.mxu1 %v6168_v17  ;;  %v6197_v2 = vcombine.high %v7571_v20, %v7570_v6  ;;  %v7575_v13 = vld [vmem:[#allocation178_spill] sm:$0xff]  ;;  %v6210_v14 = vcombine.low %v7571_v20, %v7570_v6  ;;  %v7585_v20 = vld [vmem:[#allocation167_spill] sm:$0xff] }
 0x18e   : >> { %2014 = vmatpush1.bf16.msra.mxu0 %v6154_v16  ;;  %7568 = vst [vmem:[#allocation237_spill] sm:$0xff] %v6186_v1  ;;  %4087 = vmatprep.subr.bf16.mxu1 %v7573_v25  ;;  %v6203_v26 = vcombine.low %v7575_v13, %v7574_v15  ;;  %v7581_v15 = vld [vmem:[#allocation176_spill] sm:$0xff]  ;;  %v7582_v13 = vld [vmem:[#allocation174_spill] sm:$0xff]  ;;  %v6232_v31 = vcombine.high %v7586_v30, %v7585_v20 }
 0x18f   : >> { %2015 = vmatprep.subr.bf16.mxu0 %v6161_v3  ;;  %7572 = vst [vmem:[#allocation239_spill] sm:$0xff] %v6197_v2  ;;  %7577 = vst [vmem:[#allocation241_spill] sm:$0xff] %v6210_v14  ;;  %v6221_v29 = vcombine.low %v7582_v13, %v7581_v15  ;;  %v6237_v15 = vcombine.low %v7589_v33, %v7588_v32  ;;  %v6242_v13 = vcombine.low %v7586_v30, %v7585_v20  ;;  %v7599_v20 = vld [vmem:[#allocation226_spill] sm:$0xff]  ;;  %v7600_v30 = vld [vmem:[#allocation224_spill] sm:$0xff] }
 0x190   : >> { %1809 = vmatmul.mubr.bf16.gmra.mxu1 %v1106_v9  ;;  %7576 = vst [vmem:[#allocation240_spill] sm:$0xff] %v6203_v26  ;;  %7587 = vst [vmem:[#allocation245_spill] sm:$0xff] %v6232_v31  ;;  %v6253_v32 = vcombine.low %v7596_v36, %v7595_v35  ;;  %v6264_v37 = vcombine.high %v7600_v30, %v7599_v20  ;;  %v7602_v35 = vld [vmem:[#allocation164_spill] sm:$0xff]  ;;  %v7603_v36 = vld [vmem:[#allocation162_spill] sm:$0xff] }
 0x191   : >> { %1860 = vmatmul.mubr.bf16.gmra.mxu0 %v1106_v9  ;;  %4088 = vmatpush3.bf16.msra.mxu1 %v6186_v1  ;;  %v7578_v9 = vld [vmem:[#allocation171_spill] sm:$0xff]  ;;  %7583 = vst [vmem:[#allocation243_spill] sm:$0xff] %v6221_v29  ;;  %7590 = vst [vmem:[#allocation246_spill] sm:$0xff] %v6237_v15  ;;  %v6271_v39 = vcombine.low %v7603_v36, %v7602_v35  ;;  %v7608_v35 = vld [vmem:[#allocation225_spill] sm:$0xff] }
 0x192   : >> { %2016 = vmatpush1.bf16.msra.mxu0 %v6173_v22  ;;  %2043 = vmatprep.mubr.bf16.mxu0 %v7485_v23  ;;  %v6216_v28 = vcombine.high %v7579_v27, %v7578_v9  ;;  %v6226_v6 = vcombine.low %v7579_v27, %v7578_v9  ;;  %7591 = vst [vmem:[#allocation247_spill] sm:$0xff] %v6242_v13  ;;  %v7592_v9 = vld [vmem:[#allocation163_spill] sm:$0xff]  ;;  %v7593_v27 = vld [vmem:[#allocation161_spill] sm:$0xff]  ;;  %7597 = vst [vmem:[#allocation249_spill] sm:$0xff] %v6253_v32 }
 0x193   : >> { %2017 = vmatprep.subr.bf16.mxu0 %v6180_v18  ;;  %4099 = vmatprep.mubr.msk.bf16.mxu1 %vm4891_vm4, %v7573_v25  ;;  %v6248_v34 = vcombine.high %v7593_v27, %v7592_v9  ;;  %v6258_v33 = vcombine.low %v7593_v27, %v7592_v9  ;;  %7601 = vst [vmem:[#allocation251_spill] sm:$0xff] %v6264_v37  ;;  %7604 = vst [vmem:[#allocation252_spill] sm:$0xff] %v6271_v39  ;;  %v7605_v27 = vld [vmem:[#allocation221_spill] sm:$0xff] }
 0x194   : >> { %4089 = vmatprep.subr.bf16.mxu1 %v7573_v25  ;;  %7580 = vst [vmem:[#allocation242_spill] sm:$0xff] %v6216_v28  ;;  %7584 = vst [vmem:[#allocation244_spill] sm:$0xff] %v6226_v6  ;;  %v6276_v9 = vcombine.low %v7600_v30, %v7599_v20  ;;  %v6282_v41 = vcombine.high %v7606_v40, %v7605_v27  ;;  %v6287_v36 = vcombine.low %v7608_v35, %v7607_v42  ;;  %v7609_v30 = vld [vmem:[#allocation215_spill] sm:$0xff]  ;;  %v7611_v42 = vld [vmem:[#allocation222_spill] sm:$0xff] }
 0x195   : >> { %4090 = vmatpush3.bf16.msra.mxu1 %v6203_v26  ;;  %7594 = vst [vmem:[#allocation248_spill] sm:$0xff] %v6248_v34  ;;  %7598 = vst [vmem:[#allocation250_spill] sm:$0xff] %v6258_v33  ;;  %v6292_v20 = vcombine.low %v7606_v40, %v7605_v27  ;;  %v6298_v44 = vcombine.high %v7610_v43, %v7609_v30  ;;  %v7612_v35 = vld [vmem:[#allocation220_spill] sm:$0xff]  ;;  %v6311_v27 = vcombine.low %v7610_v43, %v7609_v30  ;;  %v7614_v40 = vld [vmem:[#allocation209_spill] sm:$0xff] }
 0x196   : >> { %2018 = vmatpush1.bf16.msra.mxu0 %v6191_v21  ;;  %4091 = vmatprep.subr.bf16.mxu1 %v7573_v25  ;;  %v6304_v45 = vcombine.low %v7612_v35, %v7611_v42  ;;  %v7615_v42 = vld [vmem:[#allocation216_spill] sm:$0xff]  ;;  %v7616_v35 = vld [vmem:[#allocation214_spill] sm:$0xff]  ;;  %v7617_v43 = vld [vmem:[#allocation207_spill] sm:$0xff] }
 0x197   : >> { %2019 = vmatprep.subr.bf16.mxu0 %v6197_v2  ;;  %v6322_v47 = vcombine.low %v7616_v35, %v7615_v42  ;;  %v6333_v49 = vcombine.high %v7618_v48, %v7617_v43  ;;  %v6338_v42 = vcombine.low %v7620_v51, %v7619_v50  ;;  %v6343_v35 = vcombine.low %v7618_v48, %v7617_v43  ;;  %v7625_v43 = vld [vmem:[#allocation199_spill] sm:$0xff]  ;;  %v7626_v48 = vld [vmem:[#allocation197_spill] sm:$0xff] }
 0x198   : >> { %v6354_v50 = vcombine.low %v7624_v55, %v7623_v54  ;;  %v6365_v56 = vcombine.high %v7626_v48, %v7625_v43  ;;  %v6370_v55 = vcombine.low %v7629_v58, %v7628_v57  ;;  %v6375_v54 = vcombine.low %v7626_v48, %v7625_v43  ;;  %v7634_v48 = vld [vmem:[#allocation196_spill] sm:$0xff] }
 0x199   : >> { %4092 = vmatpush3.bf16.msra.mxu1 %v6221_v29  ;;  %v6386_v57 = vcombine.low %v7633_v61, %v7632_v60  ;;  %v2092_v43 = vpack.c.bf16 %v4865_v12, %v4865_v12 }
 0x19a   : >> { %2020 = vmatpush1.bf16.msra.mxu0 %v6210_v14  ;;  %4093 = vmatprep.subr.bf16.mxu1 %v7573_v25  ;;  %7627 = vst [vmem:[#allocation253_spill] sm:$0xff] %v6365_v56 }
 0x19b   : >> { %2021 = vmatprep.subr.bf16.mxu0 %v6216_v28 }
 0x19d   : >> { %4094 = vmatpush3.bf16.msra.mxu1 %v6237_v15 }
 0x19e   : >> { %2022 = vmatpush1.bf16.msra.mxu0 %v6226_v6  ;;  %4095 = vmatprep.subr.bf16.mxu1 %v7573_v25 }
 0x19f   : >> { %2023 = vmatprep.subr.bf16.mxu0 %v6232_v31 }
 0x1a1   : >> { %4096 = vmatpush3.bf16.msra.mxu1 %v6253_v32 }
 0x1a2   : >> { %2024 = vmatpush1.bf16.msra.mxu0 %v6242_v13  ;;  %4097 = vmatprep.subr.bf16.mxu1 %v7573_v25 }
 0x1a3   : >> { %2025 = vmatprep.subr.bf16.mxu0 %v6248_v34 }
 0x1a5   : >> { %4098 = vmatpush3.bf16.msra.mxu1 %v6271_v39 }
 0x1a6   : >> { %2026 = vmatpush1.bf16.msra.mxu0 %v6258_v33  ;;  %4103 = vmatprep.subr.bf16.mxu1 %v7573_v25 }
 0x1a7   : >> { %2221 = vmatprep.subr.bf16.mxu0 %v6264_v37 }
 0x1a8   : >> { %4100 = vmatmul.mubr.bf16.vlgmr.msra.gmra.mxu1 %v1882_v38 }
 0x1a9   : >> { %2044 = vmatmul.mubr.bf16.vlgmr.msra.gmra.mxu0 %v1882_v38  ;;  %4104 = vmatpush3.bf16.msra.mxu1 %v6287_v36  ;;  %v7613_v38 = vld [vmem:[#allocation211_spill] sm:$0xff] }
 0x1aa   : >> { %2222 = vmatpush1.bf16.msra.mxu0 %v6276_v9  ;;  %2253 = vmatprep.mubr.bf16.mxu0 %v7485_v23  ;;  %v6317_v46 = vcombine.high %v7614_v40, %v7613_v38  ;;  %v6327_v30 = vcombine.low %v7614_v40, %v7613_v38  ;;  %v7621_v38 = vld [vmem:[#allocation203_spill] sm:$0xff]  ;;  %v7622_v40 = vld [vmem:[#allocation201_spill] sm:$0xff] }
 0x1ab   : >> { %2223 = vmatprep.subr.bf16.mxu0 %v6282_v41  ;;  %4119 = vmatprep.mubr.msk.bf16.mxu1 %vm4891_vm4, %v7573_v25  ;;  %v6349_v53 = vcombine.high %v7622_v40, %v7621_v38  ;;  %v6359_v51 = vcombine.low %v7622_v40, %v7621_v38  ;;  %v7630_v38 = vld [vmem:[#allocation195_spill] sm:$0xff]  ;;  %v7631_v40 = vld [vmem:[#allocation193_spill] sm:$0xff] }
 0x1ac   : >> { %4105 = vmatprep.subr.bf16.mxu1 %v7573_v25  ;;  %v6381_v59 = vcombine.high %v7631_v40, %v7630_v38  ;;  %v6391_v58 = vcombine.low %v7631_v40, %v7630_v38 }
 0x1ad   : >> { %4106 = vmatpush3.bf16.msra.mxu1 %v6304_v45 }
 0x1ae   : >> { %2224 = vmatpush1.bf16.msra.mxu0 %v6292_v20  ;;  %4107 = vmatprep.subr.bf16.mxu1 %v7573_v25 }
 0x1af   : >> { %2225 = vmatprep.subr.bf16.mxu0 %v6298_v44 }
 0x1b1   : >> { %4108 = vmatpush3.bf16.msra.mxu1 %v6322_v47 }
 0x1b2   : >> { %2226 = vmatpush1.bf16.msra.mxu0 %v6311_v27  ;;  %4109 = vmatprep.subr.bf16.mxu1 %v7573_v25 }
 0x1b3   : >> { %2227 = vmatprep.subr.bf16.mxu0 %v6317_v46 }
 0x1b5   : >> { %4110 = vmatpush3.bf16.msra.mxu1 %v6338_v42 }
 0x1b6   : >> { %2228 = vmatpush1.bf16.msra.mxu0 %v6327_v30  ;;  %4111 = vmatprep.subr.bf16.mxu1 %v7573_v25 }
 0x1b7   : >> { %2229 = vmatprep.subr.bf16.mxu0 %v6333_v49 }
 0x1b9   : >> { %4112 = vmatpush3.bf16.msra.mxu1 %v6354_v50 }
 0x1ba   : >> { %2230 = vmatpush1.bf16.msra.mxu0 %v6343_v35  ;;  %4113 = vmatprep.subr.bf16.mxu1 %v7573_v25 }
 0x1bb   : >> { %2231 = vmatprep.subr.bf16.mxu0 %v6349_v53 }
 0x1bd   : >> { %4114 = vmatpush3.bf16.msra.mxu1 %v6370_v55 }
 0x1be   : >> { %2232 = vmatpush1.bf16.msra.mxu0 %v6359_v51  ;;  %4115 = vmatprep.subr.bf16.mxu1 %v7573_v25 }
 0x1bf   : >> { %2233 = vmatprep.subr.bf16.mxu0 %v6365_v56  ;;  %v6400_v56 = vcombine.low %v7635_v63, %v7634_v48  ;;  %v7636_v63 = vld [vmem:[#allocation228_spill] sm:$0xff] }
 0x1c0   : >> { %v6448_v60 = vrot.slane %v7636_v63, %v7420_v10 }
 0x1c1   : >> { %4116 = vmatpush3.bf16.msra.mxu1 %v6386_v57 }
 0x1c2   : >> { %2234 = vmatpush1.bf16.msra.mxu0 %v6375_v54  ;;  %4117 = vmatprep.subr.bf16.mxu1 %v7573_v25 }
 0x1c3   : >> { %2235 = vmatprep.subr.bf16.mxu0 %v6381_v59 }
 0x1c5   : >> { %4118 = vmatpush3.bf16.msra.mxu1 %v6400_v56 }
 0x1c6   : >> { %2236 = vmatpush1.bf16.msra.mxu0 %v6391_v58  ;;  %4123 = vmatprep.subr.bf16.mxu1 %v7573_v25 }
 0x1c7   : >> { %2376 = vmatprep.subr.bf16.mxu0 %v6132_v24 }
 0x1c8   : >> { %4120 = vmatmul.mubr.bf16.vlgmr.msra.gmra.mxu1 %v2092_v43 }
 0x1c9   : >> { %2254 = vmatmul.mubr.bf16.vlgmr.msra.gmra.mxu0 %v2092_v43  ;;  %4124 = vmatpush3.bf16.msra.mxu1 %v6149_v5 }
 0x1ca   : >> { %2377 = vmatpush1.bf16.msra.mxu0 %v6140_v19  ;;  %2408 = vmatprep.mubr.bf16.mxu0 %v7485_v23 }
 0x1cb   : >> { %2378 = vmatprep.subr.bf16.mxu0 %v6145_v11  ;;  %4139 = vmatprep.mubr.msk.bf16.mxu1 %vm4891_vm4, %v7573_v25 }
 0x1cc   : >> { %4125 = vmatprep.subr.bf16.mxu1 %v7573_v25 }
 0x1cd   : >> { %4126 = vmatpush3.bf16.msra.mxu1 %v6168_v17 }
 0x1ce   : >> { %2379 = vmatpush1.bf16.msra.mxu0 %v6154_v16  ;;  %4127 = vmatprep.subr.bf16.mxu1 %v7573_v25 }
 0x1cf   : >> { %2380 = vmatprep.subr.bf16.mxu0 %v6161_v3 }
 0x1d1   : >> { %4128 = vmatpush3.bf16.msra.mxu1 %v6186_v1 }
 0x1d2   : >> { %2381 = vmatpush1.bf16.msra.mxu0 %v6173_v22  ;;  %4129 = vmatprep.subr.bf16.mxu1 %v7573_v25 }
 0x1d3   : >> { %2382 = vmatprep.subr.bf16.mxu0 %v6180_v18 }
 0x1d5   : >> { %4130 = vmatpush3.bf16.msra.mxu1 %v6203_v26  ;;  %v3023_v26 = vstv %s2850_s13 }
 0x1d6   : >> { %2383 = vmatpush1.bf16.msra.mxu0 %v6191_v21  ;;  %4131 = vmatprep.subr.bf16.mxu1 %v7573_v25  ;;  %vm3024_vm8 = vcmp.lt.s32.totalorder %v3023_v26, %v7484_v7 }
 0x1d7   : >> { %2384 = vmatprep.subr.bf16.mxu0 %v6197_v2 }
 0x1d9   : >> { %4132 = vmatpush3.bf16.msra.mxu1 %v6221_v29 }
 0x1da   : >> { %2385 = vmatpush1.bf16.msra.mxu0 %v6210_v14  ;;  %4133 = vmatprep.subr.bf16.mxu1 %v7573_v25 }
 0x1db   : >> { %2386 = vmatprep.subr.bf16.mxu0 %v6216_v28 }
 0x1dd   : >> { %4134 = vmatpush3.bf16.msra.mxu1 %v6237_v15 }
 0x1de   : >> { %2387 = vmatpush1.bf16.msra.mxu0 %v6226_v6  ;;  %4135 = vmatprep.subr.bf16.mxu1 %v7573_v25 }
 0x1df   : >> { %2388 = vmatprep.subr.bf16.mxu0 %v6232_v31 }
 0x1e1   : >> { %4136 = vmatpush3.bf16.msra.mxu1 %v6253_v32 }
 0x1e2   : >> { %2389 = vmatpush1.bf16.msra.mxu0 %v6242_v13  ;;  %4137 = vmatprep.subr.bf16.mxu1 %v7573_v25 }
 0x1e3   : >> { %2390 = vmatprep.subr.bf16.mxu0 %v6248_v34 }
 0x1e5   : >> { %4138 = vmatpush3.bf16.msra.mxu1 %v6271_v39 }
 0x1e6   : >> { %2391 = vmatpush1.bf16.msra.mxu0 %v6258_v33  ;;  %4143 = vmatprep.subr.bf16.mxu1 %v7573_v25 }
 0x1e7   : >> { %2458 = vmatprep.subr.bf16.mxu0 %v6264_v37 }
 0x208   : >> { %v6442_v43 = vpop.f32.mrf.mxu1 }
 0x20a   : >> { %v6444_v48 = vpop.f32.mrf.mxu1 }
 0x20c   : >> { %v3956_v61 = vpop.f32.mrf.mxu1 }
 0x20e   : >> { %v3957_v38 = vpop.f32.mrf.mxu1 }
 0x20f   : >> { %v3958_v40 = vadd.f32 %v3957_v38, %v3956_v61 }
 0x210   : >> { %v3959_v34 = vpop.f32.mrf.mxu1 }
 0x211   : >> { %v6451_v33 = vadd.f32 %v3958_v40, %v6448_v60  ;;  %v6465_v40 = vrot.slane %v7636_v63, %v7421_v8 }
 0x212   : >> { %v3960_v37 = vpop.f32.mrf.mxu1 }
 0x213   : >> { %7637 = vst [vmem:[#allocation254_spill] sm:$0xff] %v6451_v33  ;;  %v3961_v32 = vadd.f32 %v3960_v37, %v3959_v34  ;;  %v6469_v37 = vrot.slane %v7636_v63, %v7419_v0 }
 0x214   : >> { %v3962_v39 = vpop.f32.mrf.mxu1 }
 0x215   : >> { %v6454_v13 = vadd.f32 %v3961_v32, %v6448_v60 }
 0x216   : >> { %v3963_v31 = vpop.f32.mrf.mxu1 }
 0x217   : >> { %7638 = vst [vmem:[#allocation255_spill] sm:$0xff] %v6454_v13  ;;  %v3964_v15 = vadd.f32 %v3963_v31, %v3962_v39 }
 0x219   : >> { %v6457_v6 = vadd.f32 %v3964_v15, %v6448_v60 }
 0x21b   : >> { %7639 = vst [vmem:[#allocation256_spill] sm:$0xff] %v6457_v6 }
 0x229   : >> { %v6459_v28 = vpop.f32.mrf.mxu0 }
 0x22b   : >> { %v6461_v29 = vpop.f32.mrf.mxu0 }
 0x22d   : >> { %v1418_v34 = vpop.f32.mrf.mxu0 }
 0x22e   : >> { %v6472_v31 = vadd.f32 %v1418_v34, %v6465_v40 }
 0x22f   : >> { %v1420_v39 = vpop.f32.mrf.mxu0 }
 0x230   : >> { %7640 = vst [vmem:[#allocation257_spill] sm:$0xff] %v6472_v31  ;;  %v6475_v15 = vadd.f32 %v1420_v39, %v6469_v37  ;;  %v2545_v39 = vstv %s2373_s0 }
 0x231   : >> { %v1424_v32 = vpop.f32.mrf.mxu0  ;;  %vm2546_vm5 = vcmp.lt.s32.totalorder %v2545_v39, %v7484_v7 }
 0x232   : >> { %7641 = vst [vmem:[#allocation258_spill] sm:$0xff] %v6475_v15  ;;  %v6478_v38 = vadd.f32 %v1424_v32, %v6465_v40  ;;  %v2547_v32 = vstv %s2374_s28 }
 0x233   : >> { %v1426_v61 = vpop.f32.mrf.mxu0  ;;  %vm2548_vm6 = vcmp.lt.s32.totalorder %v2547_v32, %v7484_v7 }
 0x234   : >> { %7642 = vst [vmem:[#allocation259_spill] sm:$0xff] %v6478_v38  ;;  %v6481_v6 = vadd.f32 %v1426_v61, %v6469_v37  ;;  %v7646_v61 = vld [vmem:[#allocation229_spill] sm:$0xff]  ;;  %v2597_v32 = vsel %vm2548_vm6, 1, %v7485_v23 }
 0x235   : >> { %v1428_v13 = vpop.f32.mrf.mxu0  ;;  %v6509_v15 = vrot.slane %v7646_v61, %v7419_v0 }
 0x236   : >> { %7643 = vst [vmem:[#allocation260_spill] sm:$0xff] %v6481_v6  ;;  %v6484_v63 = vadd.f32 %v1428_v13, %v6465_v40  ;;  %v6496_v6 = vrot.slane %v7646_v61, %v7421_v8  ;;  %v6502_v13 = vrot.slane %v7646_v61, %v7420_v10 }
 0x237   : >> { %v1430_v33 = vpop.f32.mrf.mxu0 }
 0x238   : >> { %7644 = vst [vmem:[#allocation261_spill] sm:$0xff] %v6484_v63  ;;  %v6487_v34 = vadd.f32 %v1430_v33, %v6469_v37  ;;  %v2570_v33 = vsel %vm2546_vm5, 1, %v7485_v23 }
 0x239   : >> { %2572 = vperm.xlu1 %4438, %v2570_v33  }
 0x23a   : >> { %7645 = vst [vmem:[#allocation262_spill] sm:$0xff] %v6487_v34  ;;  %v2785_v34 = vstv %s2612_s8 }
 0x23b   : >> { %vm2786_vm7 = vcmp.lt.s32.totalorder %v2785_v34, %v7484_v7 }
 0x23c   : >> { %v2835_v61 = vsel %vm2786_vm7, 1, %v7485_v23 }
 0x23d   : >> { %2599 = vperm.xlu1 %4438, %v2597_v32  }
 0x241   : >> { %2837 = vperm.xlu1 %4438, %v2835_v61  }
 0x248   : >> { %v1800_v39 = vpop.f32.mrf.mxu1 }
 0x249   : >> { %v3981_v38 = vpop.f32.mrf.mxu0  ;;  %v6514_v14 = vadd.f32 %v1800_v39, %v6496_v6 }
 0x24a   : >> { %v1802_v2 = vpop.f32.mrf.mxu1 }
 0x24b   : >> { %v3982_v63 = vpop.f32.mrf.mxu0  ;;  %7647 = vst [vmem:[#allocation263_spill] sm:$0xff] %v6514_v14  ;;  %v6523_v33 = vadd.f32 %v1802_v2, %v6509_v15 }
 0x24c   : >> { %v3983_v8 = vadd.f32 %v3982_v63, %v3981_v38  ;;  %v1804_v38 = vpop.f32.mrf.mxu1 }
 0x24d   : >> { %v3984_v31 = vpop.f32.mrf.mxu0  ;;  %7649 = vst [vmem:[#allocation265_spill] sm:$0xff] %v6523_v33  ;;  %v6527_v39 = vadd.f32 %v1804_v38, %v6496_v6 }
 0x24e   : >> { %v6518_v10 = vadd.f32 %v3983_v8, %v6502_v13  ;;  %v1806_v34 = vpop.f32.mrf.mxu1 }
 0x24f   : >> { %v3985_v0 = vpop.f32.mrf.mxu0  ;;  %7650 = vst [vmem:[#allocation266_spill] sm:$0xff] %v6527_v39  ;;  %v6534_v14 = vadd.f32 %v1806_v34, %v6509_v15 }
 0x250   : >> { %7648 = vst [vmem:[#allocation264_spill] sm:$0xff] %v6518_v10  ;;  %v3986_v63 = vadd.f32 %v3985_v0, %v3984_v31  ;;  %v1810_v0 = vpop.f32.mrf.mxu1  ;;  %v3073_v31 = vsel %vm3024_vm8, 1, %v7485_v23 }
 0x251   : >> { %v3987_v21 = vpop.f32.mrf.mxu0  ;;  %7652 = vst [vmem:[#allocation268_spill] sm:$0xff] %v6534_v14  ;;  %v6538_v33 = vadd.f32 %v1810_v0, %v6496_v6  ;;  %3075 = vperm.xlu1 %4438, %v3073_v31   ;;  %v1417_v31 = vadd.f32 %v6461_v29, %v6469_v37  ;;  %v7657_v29 = vld [vmem:[#allocation232_spill] sm:$0xff] }
 0x252   : >> { %v6531_v8 = vadd.f32 %v3986_v63, %v6502_v13  ;;  %v1812_v26 = vpop.f32.mrf.mxu1 }
 0x253   : >> { %v3988_v10 = vpop.f32.mrf.mxu0  ;;  %7653 = vst [vmem:[#allocation269_spill] sm:$0xff] %v6538_v33  ;;  %v6544_v7 = vadd.f32 %v1812_v26, %v6509_v15 }
 0x254   : >> { %7651 = vst [vmem:[#allocation267_spill] sm:$0xff] %v6531_v8  ;;  %v3989_v2 = vadd.f32 %v3988_v10, %v3987_v21  ;;  %v1814_v61 = vpop.f32.mrf.mxu1  ;;  %v1415_v8 = vadd.f32 %v6459_v28, %v6465_v40 }
 0x255   : >> { %v3990_v32 = vpop.f32.mrf.mxu0  ;;  %7655 = vst [vmem:[#allocation271_spill] sm:$0xff] %v6544_v7 }
 0x256   : >> { %v6541_v38 = vadd.f32 %v3989_v2, %v6502_v13  ;;  %v1816_v10 = vpop.f32.mrf.mxu1 }
 0x257   : >> { %v3991_v63 = vpop.f32.mrf.mxu0 }
 0x258   : >> { %7654 = vst [vmem:[#allocation270_spill] sm:$0xff] %v6541_v38  ;;  %v6546_v34 = vadd.f32 %v3991_v63, %v3990_v32 }
 0x268   : >> { %v2086_v2 = vpop.f32.mrf.mxu1 }
 0x269   : >> { %v2045_v21 = vpop.f32.mrf.mxu0 }
 0x26a   : >> { %v2046_v0 = vadd.f32 %v2045_v21, %v7418_v62  ;;  %v4101_v26 = vpop.f32.mrf.mxu1  ;;  %v7656_v21 = vld [vmem:[#allocation231_spill] sm:$0xff] }
 0x26b   : >> { %v2047_v14 = vpop.f32.mrf.mxu0 }
 0x26c   : >> { %v2312_v39 = vadd.f32 %v2046_v0, %v1415_v8  ;;  %v2048_v18 = vadd.f32 %v2047_v14, %v5856_v4  ;;  %v2089_v32 = vpop.f32.mrf.mxu1  ;;  %v2087_v0 = vadd.f32 %v2086_v2, %v7656_v21 }
 0x26d   : >> { %v2049_v38 = vpop.f32.mrf.mxu0 }
 0x26e   : >> { %v3874_v33 = vmul.f32 -1.442695, %v2312_v39  ;;  %v2319_v63 = vadd.f32 %v2048_v18, %v1417_v31  ;;  %v4102_v1 = vpop.f32.mrf.mxu1  ;;  %v3955_v39 = vadd.f32 %v6444_v48, %v6442_v43 }
 0x26f   : >> { %v2050_v7 = vpop.f32.mrf.mxu0 }
 0x270   : >> { %4439 = vpow2.f32 %v3874_v33  ;;  %v3875_v22 = vmul.f32 -1.442695, %v2319_v63  ;;  %v1815_v7 = vadd.f32 %v1814_v61, %v6496_v6  ;;  %v1817_v6 = vadd.f32 %v1816_v10, %v6509_v15 }
 0x272   : >> { %4441 = vpow2.f32 %v3875_v22  ;;  %v1468_v22 = vadd.f32 %v3955_v39, %v6448_v60 }
 0x27d   : >> { %v4440_v28 = vpop.eup %4439 }
 0x27e   : >> { %v2316_v40 = vadd.f32 1.0, %v4440_v28  ;;  %v7658_v28 = vld [vmem:[#allocation233_spill] sm:$0xff] }
 0x27f   : >> { %v4442_v8 = vpop.eup %4441 }
 0x280   : >> { %4443 = vrcp.f32 %v2316_v40  ;;  %v2323_v14 = vadd.f32 1.0, %v4442_v8 }
 0x282   : >> { %4445 = vrcp.f32 %v2323_v14 }
 0x288   : >> { %v2296_v1 = vpop.f32.mrf.mxu1 }
 0x289   : >> { %v2255_v38 = vpop.f32.mrf.mxu0 }
 0x28a   : >> { %v2256_v37 = vadd.f32 %v2255_v38, %v7657_v29  ;;  %v4121_v48 = vpop.f32.mrf.mxu1 }
 0x28b   : >> { %v2257_v33 = vpop.f32.mrf.mxu0 }
 0x28c   : >> { %v2339_v18 = vadd.f32 %v2256_v37, %v1815_v7  ;;  %v2258_v43 = vadd.f32 %v2257_v33, %v7658_v28  ;;  %v2299_v2 = vpop.f32.mrf.mxu1  ;;  %v2336_v33 = vpop.permute.xlu0 %2335 }
 0x28d   : >> { %v4444_v26 = vpop.eup %4443  ;;  %v2259_v31 = vpop.f32.mrf.mxu0  ;;  %vm2337_vm9 = vcmp.eq.s32.totalorder %v2336_v33, 1  ;;  %v7663_v33 = vld [vmem:[#allocation236_spill] sm:$0xff] }
 0x28e   : >> { %v2326_v32 = vmul.f32 %v4444_v26, %v2087_v0  ;;  %v3876_v63 = vmul.f32 -1.442695, %v2339_v18  ;;  %v2346_v8 = vadd.f32 %v2258_v43, %v1817_v6  ;;  %v4122_v38 = vpop.f32.mrf.mxu1 }
 0x28f   : >> { %v2260_v40 = vpop.f32.mrf.mxu0  ;;  %v4446_v60 = vpop.eup %4445 }
 0x290   : >> { %v2327_v61 = vadd.f32 %v2326_v32, %v1468_v22  ;;  %4447 = vpow2.f32 %v3876_v63  ;;  %v3877_v7 = vmul.f32 -1.442695, %v2346_v8  ;;  %v2329_v0 = vsub.f32 1.0, %v4446_v60  ;;  %v7659_v63 = vld [vmem:[#allocation234_spill] sm:$0xff] }
 0x291   : >> { %v2331_v26 = vmul.f32 %v4869_v52, %v4446_v60  ;;  %v2297_v43 = vadd.f32 %v2296_v1, %v7659_v63  ;;  %v1865_v40 = vadd.f32 %v6546_v34, %v6502_v13  ;;  %v7660_v34 = vld [vmem:[#allocation253_spill] sm:$0xff] }
 0x292   : >> { %4449 = vtanh.f32 %v2327_v61 }
 0x293   : >> { %4451 = vpow2.f32 %v3877_v7  ;;  %v2363_v7 = vpop.permute.xlu0 %2362 }
 0x294   : >> { %vm2364_vm10 = vcmp.eq.s32.totalorder %v2363_v7, 1 }
 0x29d   : >> { %v4448_v39 = vpop.eup %4447 }
 0x29e   : >> { %v2343_v14 = vadd.f32 1.0, %v4448_v39 }
 0x29f   : >> { %v4450_v37 = vpop.eup %4449 }
 0x2a0   : >> { %4453 = vrcp.f32 %v2343_v14  ;;  %v2330_v18 = vmul.f32 %v4450_v37, %v2329_v0  ;;  %v4452_v32 = vpop.eup %4451  ;;  %v7662_v37 = vld [vmem:[#allocation237_spill] sm:$0xff] }
 0x2a2   : >> { %v2332_v15 = vadd.f32 %v2331_v26, %v2330_v18  ;;  %v7664_v18 = vld [vmem:[#allocation238_spill] sm:$0xff]  ;;  %v7665_v26 = vld [vmem:[#allocation240_spill] sm:$0xff] }
 0x2a4   : >> { %v6564_v10 = vsel %vm2337_vm9, %v2332_v15, %v4869_v52  ;;  %v2366_v22 = vsel %vm2337_vm9, %v2332_v15, 0.0  ;;  %v2350_v52 = vadd.f32 1.0, %v4452_v32  ;;  %v7666_v15 = vld [vmem:[#allocation239_spill] sm:$0xff]  ;;  %v7669_v32 = vld [vmem:[#allocation242_spill] sm:$0xff] }
 0x2a5   : >> { %2368 = vst [vmem:[%s6568_s20] sm:$0xff] %v2366_v22  ;;  %v2375_v31 = vpack.c.bf16 %v6564_v10, %v6564_v10  ;;  %v7667_v22 = vld [vmem:[#allocation241_spill] sm:$0xff] }
 0x2a6   : >> { %4455 = vrcp.f32 %v2350_v52  ;;  %v7670_v52 = vld [vmem:[#allocation244_spill] sm:$0xff] }
 0x2a7   : >> { %2409 = vmatmul.mubr.bf16.vlgmr.msra.gmra.mxu0 %v2375_v31  ;;  %4140 = vmatmul.mubr.bf16.vlgmr.msra.gmra.mxu1 %v2375_v31  ;;  %v7668_v31 = vld [vmem:[#allocation243_spill] sm:$0xff] }
 0x2a8   : >> { %2459 = vmatpush1.bf16.msra.mxu0 %v6276_v9  ;;  %4144 = vmatpush3.bf16.msra.mxu1 %v6287_v36 }
 0x2a9   : >> { %2460 = vmatprep.subr.bf16.mxu0 %v6282_v41  ;;  %4145 = vmatprep.subr.bf16.mxu1 %v7573_v25 }
 0x2aa   : >> { %2490 = vmatprep.mubr.bf16.mxu0 %v7485_v23  ;;  %4159 = vmatprep.mubr.msk.bf16.mxu1 %vm4891_vm4, %v7573_v25 }
 0x2ac   : >> { %2461 = vmatpush1.bf16.msra.mxu0 %v6292_v20  ;;  %4146 = vmatpush3.bf16.msra.mxu1 %v6304_v45 }
 0x2ad   : >> { %v4454_v48 = vpop.eup %4453  ;;  %2462 = vmatprep.subr.bf16.mxu0 %v6298_v44  ;;  %4147 = vmatprep.subr.bf16.mxu1 %v7573_v25 }
 0x2ae   : >> { %v2353_v6 = vmul.f32 %v4454_v48, %v2297_v43  ;;  %v7671_v43 = vld [vmem:[#allocation246_spill] sm:$0xff]  ;;  %v7672_v48 = vld [vmem:[#allocation245_spill] sm:$0xff] }
 0x2b0   : >> { %v2354_v1 = vadd.f32 %v2353_v6, %v1865_v40  ;;  %2463 = vmatpush1.bf16.msra.mxu0 %v6311_v27  ;;  %4148 = vmatpush3.bf16.msra.mxu1 %v6322_v47  ;;  %v7673_v40 = vld [vmem:[#allocation247_spill] sm:$0xff]  ;;  %v7674_v6 = vld [vmem:[#allocation249_spill] sm:$0xff] }
 0x2b1   : >> { %2464 = vmatprep.subr.bf16.mxu0 %v6317_v46  ;;  %4149 = vmatprep.subr.bf16.mxu1 %v7573_v25 }
 0x2b2   : >> { %4457 = vtanh.f32 %v2354_v1  ;;  %v7675_v1 = vld [vmem:[#allocation248_spill] sm:$0xff] }
 0x2b3   : >> { %v4456_v13 = vpop.eup %4455 }
 0x2b4   : >> { %2465 = vmatpush1.bf16.msra.mxu0 %v6327_v30  ;;  %4150 = vmatpush3.bf16.msra.mxu1 %v6338_v42  ;;  %v2356_v61 = vsub.f32 1.0, %v4456_v13  ;;  %v2358_v38 = vmul.f32 %v4865_v12, %v4456_v13  ;;  %v7676_v13 = vld [vmem:[#allocation250_spill] sm:$0xff] }
 0x2b5   : >> { %2466 = vmatprep.subr.bf16.mxu0 %v6333_v49  ;;  %4151 = vmatprep.subr.bf16.mxu1 %v7573_v25 }
 0x2b8   : >> { %2467 = vmatpush1.bf16.msra.mxu0 %v6343_v35  ;;  %4152 = vmatpush3.bf16.msra.mxu1 %v6354_v50 }
 0x2b9   : >> { %2468 = vmatprep.subr.bf16.mxu0 %v6349_v53  ;;  %4153 = vmatprep.subr.bf16.mxu1 %v7573_v25 }
 0x2bc   : >> { %2469 = vmatpush1.bf16.msra.mxu0 %v6359_v51  ;;  %4154 = vmatpush3.bf16.msra.mxu1 %v6370_v55 }
 0x2bd   : >> { %2470 = vmatprep.subr.bf16.mxu0 %v7660_v34  ;;  %4155 = vmatprep.subr.bf16.mxu1 %v7573_v25 }
 0x2bf   : >> { %v4458_v2 = vpop.eup %4457 }
 0x2c0   : >> { %2471 = vmatpush1.bf16.msra.mxu0 %v6375_v54  ;;  %4156 = vmatpush3.bf16.msra.mxu1 %v6386_v57  ;;  %v2357_v8 = vmul.f32 %v4458_v2, %v2356_v61  ;;  %v7677_v61 = vld [vmem:[#allocation252_spill] sm:$0xff]  ;;  %v7678_v2 = vld [vmem:[#allocation251_spill] sm:$0xff] }
 0x2c1   : >> { %2472 = vmatprep.subr.bf16.mxu0 %v6381_v59  ;;  %4157 = vmatprep.subr.bf16.mxu1 %v7573_v25 }
 0x2c2   : >> { %v2359_v60 = vadd.f32 %v2358_v38, %v2357_v8 }
 0x2c4   : >> { %2473 = vmatpush1.bf16.msra.mxu0 %v6391_v58  ;;  %4158 = vmatpush3.bf16.msra.mxu1 %v6400_v56  ;;  %v6613_v39 = vsel %vm2364_vm10, %v2359_v60, %v4865_v12  ;;  %v2369_v14 = vsel %vm2364_vm10, %v2359_v60, 0.0  ;;  %v7661_v12 = vld [vmem:[#allocation235_spill] sm:$0xff] }
 0x2c5   : >> { %v2457_v0 = vpack.c.bf16 %v6613_v39, %v6613_v39  ;;  %2614 = vmatprep.subr.bf16.mxu0 %v6132_v24  ;;  %4163 = vmatprep.subr.bf16.mxu1 %v7573_v25  ;;  %2372 = vst [vmem:[%s2371_s4] sm:$0xff] %v2369_v14 }
 0x2c7   : >> { %2491 = vmatmul.mubr.bf16.vlgmr.msra.gmra.mxu0 %v2457_v0  ;;  %4160 = vmatmul.mubr.bf16.vlgmr.msra.gmra.mxu1 %v2457_v0  ;;  %v7679_v0 = vld [vmem:[#allocation257_spill] sm:$0xff] }
 0x2c8   : >> { %2615 = vmatpush1.bf16.msra.mxu0 %v6140_v19  ;;  %4164 = vmatpush3.bf16.msra.mxu1 %v6149_v5 }
 0x2c9   : >> { %2616 = vmatprep.subr.bf16.mxu0 %v6145_v11  ;;  %4165 = vmatprep.subr.bf16.mxu1 %v7573_v25 }
 0x2ca   : >> { %2646 = vmatprep.mubr.bf16.mxu0 %v7485_v23  ;;  %4179 = vmatprep.mubr.msk.bf16.mxu1 %vm4891_vm4, %v7573_v25 }
 0x2cc   : >> { %2617 = vmatpush1.bf16.msra.mxu0 %v6154_v16  ;;  %4166 = vmatpush3.bf16.msra.mxu1 %v6168_v17 }
 0x2cd   : >> { %2618 = vmatprep.subr.bf16.mxu0 %v6161_v3  ;;  %4167 = vmatprep.subr.bf16.mxu1 %v7573_v25 }
 0x2d0   : >> { %2619 = vmatpush1.bf16.msra.mxu0 %v7661_v12  ;;  %4168 = vmatpush3.bf16.msra.mxu1 %v7662_v37 }
 0x2d1   : >> { %2620 = vmatprep.subr.bf16.mxu0 %v7663_v33  ;;  %4169 = vmatprep.subr.bf16.mxu1 %v7573_v25 }
 0x2d4   : >> { %2621 = vmatpush1.bf16.msra.mxu0 %v7664_v18  ;;  %4170 = vmatpush3.bf16.msra.mxu1 %v7665_v26 }
 0x2d5   : >> { %2622 = vmatprep.subr.bf16.mxu0 %v7666_v15  ;;  %4171 = vmatprep.subr.bf16.mxu1 %v7573_v25 }
 0x2d8   : >> { %2623 = vmatpush1.bf16.msra.mxu0 %v7667_v22  ;;  %4172 = vmatpush3.bf16.msra.mxu1 %v7668_v31 }
 0x2d9   : >> { %2624 = vmatprep.subr.bf16.mxu0 %v7669_v32  ;;  %4173 = vmatprep.subr.bf16.mxu1 %v7573_v25 }
 0x2dc   : >> { %2625 = vmatpush1.bf16.msra.mxu0 %v7670_v52  ;;  %4174 = vmatpush3.bf16.msra.mxu1 %v7671_v43 }
 0x2dd   : >> { %2626 = vmatprep.subr.bf16.mxu0 %v7672_v48  ;;  %4175 = vmatprep.subr.bf16.mxu1 %v7573_v25 }
 0x2e0   : >> { %2627 = vmatpush1.bf16.msra.mxu0 %v7673_v40  ;;  %4176 = vmatpush3.bf16.msra.mxu1 %v7674_v6 }
 0x2e1   : >> { %2628 = vmatprep.subr.bf16.mxu0 %v7675_v1  ;;  %4177 = vmatprep.subr.bf16.mxu1 %v7573_v25 }
 0x2e4   : >> { %2629 = vmatpush1.bf16.msra.mxu0 %v7676_v13  ;;  %4178 = vmatpush3.bf16.msra.mxu1 %v7677_v61  ;;  %v7680_v61 = vld [vmem:[#allocation258_spill] sm:$0xff] }
 0x2e5   : >> { %2696 = vmatprep.subr.bf16.mxu0 %v7678_v2  ;;  %4183 = vmatprep.subr.bf16.mxu1 %v7573_v25 }
 0x367   : >> { %v2410_v8 = vpop.f32.mrf.mxu0  ;;  %v2451_v38 = vpop.f32.mrf.mxu1 }
 0x368   : >> { %v2411_v7 = vadd.f32 %v2410_v8, %v7418_v62 }
 0x369   : >> { %v2412_v60 = vpop.f32.mrf.mxu0  ;;  %v4141_v14 = vpop.f32.mrf.mxu1 }
 0x36a   : >> { %v2549_v6 = vadd.f32 %v2411_v7, %v7679_v0  ;;  %v2413_v43 = vadd.f32 %v2412_v60, %v5856_v4  ;;  %v2452_v7 = vadd.f32 %v2451_v38, %v7656_v21  ;;  %v7682_v0 = vld [vmem:[#allocation254_spill] sm:$0xff] }
 0x36b   : >> { %v2414_v40 = vpop.f32.mrf.mxu0  ;;  %v2454_v1 = vpop.f32.mrf.mxu1 }
 0x36c   : >> { %v3879_v48 = vmul.f32 -1.442695, %v2549_v6  ;;  %v2556_v2 = vadd.f32 %v2413_v43, %v7680_v61 }
 0x36d   : >> { %v2415_v13 = vpop.f32.mrf.mxu0  ;;  %v4142_v52 = vpop.f32.mrf.mxu1 }
 0x36e   : >> { %4459 = vpow2.f32 %v3879_v48  ;;  %v3880_v32 = vmul.f32 -1.442695, %v2556_v2  ;;  %v7681_v13 = vld [vmem:[#allocation269_spill] sm:$0xff] }
 0x370   : >> { %4461 = vpow2.f32 %v3880_v32 }
 0x37b   : >> { %v4460_v31 = vpop.eup %4459 }
 0x37c   : >> { %v2553_v22 = vadd.f32 1.0, %v4460_v31 }
 0x37d   : >> { %v4462_v8 = vpop.eup %4461 }
 0x37e   : >> { %4463 = vrcp.f32 %v2553_v22  ;;  %v2560_v15 = vadd.f32 1.0, %v4462_v8 }
 0x380   : >> { %4465 = vrcp.f32 %v2560_v15  ;;  %v2573_v15 = vpop.permute.xlu1 %2572 }
 0x381   : >> { %vm2574_vm11 = vcmp.eq.s32.totalorder %v2573_v15, 1 }
 0x387   : >> { %v2492_v62 = vpop.f32.mrf.mxu0  ;;  %v2533_v14 = vpop.f32.mrf.mxu1 }
 0x388   : >> { %v2493_v40 = vadd.f32 %v2492_v62, %v7657_v29  ;;  %v7683_v62 = vld [vmem:[#allocation271_spill] sm:$0xff] }
 0x389   : >> { %v2494_v1 = vpop.f32.mrf.mxu0  ;;  %v4161_v6 = vpop.f32.mrf.mxu1 }
 0x38a   : >> { %v2576_v52 = vadd.f32 %v2493_v40, %v7681_v13  ;;  %v2495_v22 = vadd.f32 %v2494_v1, %v7658_v28 }
 0x38b   : >> { %v4464_v48 = vpop.eup %4463  ;;  %v2496_v60 = vpop.f32.mrf.mxu0 }
 0x38c   : >> { %v2536_v43 = vpop.f32.mrf.mxu1  ;;  %v2563_v61 = vmul.f32 %v4464_v48, %v2452_v7  ;;  %v3881_v32 = vmul.f32 -1.442695, %v2576_v52  ;;  %v2583_v6 = vadd.f32 %v2495_v22, %v7683_v62  ;;  %v7684_v62 = vld [vmem:[#allocation270_spill] sm:$0xff] }
 0x38d   : >> { %v2497_v31 = vpop.f32.mrf.mxu0  ;;  %v4466_v40 = vpop.eup %4465 }
 0x38e   : >> { %v4162_v2 = vpop.f32.mrf.mxu1  ;;  %v2564_v8 = vadd.f32 %v2563_v61, %v7682_v0  ;;  %4467 = vpow2.f32 %v3881_v32  ;;  %v3882_v38 = vmul.f32 -1.442695, %v2583_v6  ;;  %v2566_v43 = vsub.f32 1.0, %v4466_v40 }
 0x38f   : >> { %v2568_v1 = vmul.f32 %v4466_v40, %v6564_v10 }
 0x390   : >> { %4469 = vtanh.f32 %v2564_v8 }
 0x391   : >> { %4471 = vpow2.f32 %v3882_v38 }
 0x39b   : >> { %v4468_v13 = vpop.eup %4467 }
 0x39c   : >> { %v2580_v60 = vadd.f32 1.0, %v4468_v13 }
 0x39d   : >> { %v4470_v7 = vpop.eup %4469 }
 0x39e   : >> { %4473 = vrcp.f32 %v2580_v60  ;;  %v2567_v52 = vmul.f32 %v4470_v7, %v2566_v43  ;;  %v4472_v31 = vpop.eup %4471  ;;  %v2600_v43 = vpop.permute.xlu1 %2599 }
 0x39f   : >> { %v2587_v2 = vadd.f32 1.0, %v4472_v31  ;;  %vm2601_vm12 = vcmp.eq.s32.totalorder %v2600_v43, 1 }
 0x3a0   : >> { %v2569_v48 = vadd.f32 %v2568_v1, %v2567_v52 }
 0x3a1   : >> { %4475 = vrcp.f32 %v2587_v2 }
 0x3a2   : >> { %v6666_v61 = vsel %vm2574_vm11, %v2569_v48, %v6564_v10  ;;  %v2603_v32 = vsel %vm2574_vm11, %v2569_v48, 0.0  ;;  %v2534_v10 = vadd.f32 %v2533_v14, %v7659_v63 }
 0x3a3   : >> { %3885 = vst [vmem:[%s6568_s20 + $0x8] sm:$0xff] %v2603_v32  ;;  %v2613_v22 = vpack.c.bf16 %v6666_v61, %v6666_v61 }
 0x3a5   : >> { %2647 = vmatmul.mubr.bf16.vlgmr.msra.gmra.mxu0 %v2613_v22  ;;  %4180 = vmatmul.mubr.bf16.vlgmr.msra.gmra.mxu1 %v2613_v22  ;;  %v7698_v22 = vld [vmem:[#allocation230_spill] sm:$0xff] }
 0x3a6   : >> { %2697 = vmatpush1.bf16.msra.mxu0 %v6276_v9  ;;  %4184 = vmatpush3.bf16.msra.mxu1 %v6287_v36 }
 0x3a7   : >> { %2698 = vmatprep.subr.bf16.mxu0 %v6282_v41  ;;  %4185 = vmatprep.subr.bf16.mxu1 %v7573_v25 }
 0x3a8   : >> { %2728 = vmatprep.mubr.bf16.mxu0 %v7485_v23  ;;  %4199 = vmatprep.mubr.msk.bf16.mxu1 %vm4891_vm4, %v7573_v25 }
 0x3aa   : >> { %2699 = vmatpush1.bf16.msra.mxu0 %v6292_v20  ;;  %4186 = vmatpush3.bf16.msra.mxu1 %v6304_v45 }
 0x3ab   : >> { %v4474_v0 = vpop.eup %4473  ;;  %2700 = vmatprep.subr.bf16.mxu0 %v6298_v44  ;;  %4187 = vmatprep.subr.bf16.mxu1 %v7573_v25 }
 0x3ac   : >> { %v2590_v8 = vmul.f32 %v4474_v0, %v2534_v10  ;;  %v7699_v0 = vld [vmem:[#allocation259_spill] sm:$0xff] }
 0x3ae   : >> { %v2591_v6 = vadd.f32 %v2590_v8, %v7684_v62  ;;  %2701 = vmatpush1.bf16.msra.mxu0 %v6311_v27  ;;  %4188 = vmatpush3.bf16.msra.mxu1 %v6322_v47  ;;  %v4476_v14 = vpop.eup %4475 }
 0x3af   : >> { %2702 = vmatprep.subr.bf16.mxu0 %v6317_v46  ;;  %4189 = vmatprep.subr.bf16.mxu1 %v7573_v25  ;;  %v2593_v38 = vsub.f32 1.0, %v4476_v14  ;;  %v2595_v60 = vmul.f32 %v4476_v14, %v6613_v39 }
 0x3b0   : >> { %4477 = vtanh.f32 %v2591_v6 }
 0x3b2   : >> { %2703 = vmatpush1.bf16.msra.mxu0 %v6327_v30  ;;  %4190 = vmatpush3.bf16.msra.mxu1 %v6338_v42 }
 0x3b3   : >> { %2704 = vmatprep.subr.bf16.mxu0 %v6333_v49  ;;  %4191 = vmatprep.subr.bf16.mxu1 %v7573_v25 }
 0x3b6   : >> { %2705 = vmatpush1.bf16.msra.mxu0 %v6343_v35  ;;  %4192 = vmatpush3.bf16.msra.mxu1 %v6354_v50 }
 0x3b7   : >> { %2706 = vmatprep.subr.bf16.mxu0 %v6349_v53  ;;  %4193 = vmatprep.subr.bf16.mxu1 %v7573_v25 }
 0x3ba   : >> { %2707 = vmatpush1.bf16.msra.mxu0 %v6359_v51  ;;  %4194 = vmatpush3.bf16.msra.mxu1 %v6370_v55 }
 0x3bb   : >> { %2708 = vmatprep.subr.bf16.mxu0 %v7660_v34  ;;  %4195 = vmatprep.subr.bf16.mxu1 %v7573_v25 }
 0x3bd   : >> { %v4478_v40 = vpop.eup %4477 }
 0x3be   : >> { %v2594_v13 = vmul.f32 %v4478_v40, %v2593_v38  ;;  %2709 = vmatpush1.bf16.msra.mxu0 %v6375_v54  ;;  %4196 = vmatpush3.bf16.msra.mxu1 %v6386_v57 }
 0x3bf   : >> { %2710 = vmatprep.subr.bf16.mxu0 %v6381_v59  ;;  %4197 = vmatprep.subr.bf16.mxu1 %v7573_v25 }
 0x3c0   : >> { %v2596_v7 = vadd.f32 %v2595_v60, %v2594_v13  ;;  %v7700_v60 = vld [vmem:[#allocation260_spill] sm:$0xff] }
 0x3c2   : >> { %v6708_v15 = vsel %vm2601_vm12, %v2596_v7, %v6613_v39  ;;  %v2607_v52 = vsel %vm2601_vm12, %v2596_v7, 0.0  ;;  %2711 = vmatpush1.bf16.msra.mxu0 %v6391_v58  ;;  %4198 = vmatpush3.bf16.msra.mxu1 %v6400_v56  ;;  %v7692_v39 = vld [vmem:[#allocation247_spill] sm:$0xff] }
 0x3c3   : >> { %2610 = vst [vmem:[%s2609_s26] sm:$0xff] %v2607_v52  ;;  %v2695_v1 = vpack.c.bf16 %v6708_v15, %v6708_v15  ;;  %2852 = vmatprep.subr.bf16.mxu0 %v6132_v24  ;;  %4203 = vmatprep.subr.bf16.mxu1 %v7573_v25  ;;  %v7685_v24 = vld [vmem:[#allocation239_spill] sm:$0xff] }
 0x3c5   : >> { %2729 = vmatmul.mubr.bf16.vlgmr.msra.gmra.mxu0 %v2695_v1  ;;  %4200 = vmatmul.mubr.bf16.vlgmr.msra.gmra.mxu1 %v2695_v1 }
 0x3c6   : >> { %2853 = vmatpush1.bf16.msra.mxu0 %v6140_v19  ;;  %4204 = vmatpush3.bf16.msra.mxu1 %v6149_v5  ;;  %v7689_v19 = vld [vmem:[#allocation244_spill] sm:$0xff]  ;;  %v7690_v5 = vld [vmem:[#allocation246_spill] sm:$0xff] }
 0x3c7   : >> { %2854 = vmatprep.subr.bf16.mxu0 %v6145_v11  ;;  %4205 = vmatprep.subr.bf16.mxu1 %v7573_v25  ;;  %v7686_v11 = vld [vmem:[#allocation241_spill] sm:$0xff] }
 0x3c8   : >> { %2884 = vmatprep.mubr.bf16.mxu0 %v7485_v23  ;;  %4219 = vmatprep.mubr.msk.bf16.mxu1 %vm4891_vm4, %v7573_v25 }
 0x3ca   : >> { %2855 = vmatpush1.bf16.msra.mxu0 %v6154_v16  ;;  %4206 = vmatpush3.bf16.msra.mxu1 %v6168_v17  ;;  %v7687_v17 = vld [vmem:[#allocation243_spill] sm:$0xff]  ;;  %v7691_v16 = vld [vmem:[#allocation245_spill] sm:$0xff] }
 0x3cb   : >> { %2856 = vmatprep.subr.bf16.mxu0 %v6161_v3  ;;  %4207 = vmatprep.subr.bf16.mxu1 %v7573_v25  ;;  %v7688_v3 = vld [vmem:[#allocation242_spill] sm:$0xff] }
 0x3ce   : >> { %2857 = vmatpush1.bf16.msra.mxu0 %v7661_v12  ;;  %4208 = vmatpush3.bf16.msra.mxu1 %v7662_v37  ;;  %v7693_v12 = vld [vmem:[#allocation249_spill] sm:$0xff]  ;;  %v7694_v37 = vld [vmem:[#allocation248_spill] sm:$0xff] }
 0x3cf   : >> { %2858 = vmatprep.subr.bf16.mxu0 %v7663_v33  ;;  %4209 = vmatprep.subr.bf16.mxu1 %v7573_v25  ;;  %v7695_v33 = vld [vmem:[#allocation250_spill] sm:$0xff] }
 0x3d2   : >> { %2859 = vmatpush1.bf16.msra.mxu0 %v7664_v18  ;;  %4210 = vmatpush3.bf16.msra.mxu1 %v7665_v26  ;;  %v7696_v18 = vld [vmem:[#allocation252_spill] sm:$0xff]  ;;  %v7697_v26 = vld [vmem:[#allocation251_spill] sm:$0xff] }
 0x3d3   : >> { %2860 = vmatprep.subr.bf16.mxu0 %v7685_v24  ;;  %4211 = vmatprep.subr.bf16.mxu1 %v7573_v25 }
 0x3d6   : >> { %2861 = vmatpush1.bf16.msra.mxu0 %v7686_v11  ;;  %4212 = vmatpush3.bf16.msra.mxu1 %v7687_v17 }
 0x3d7   : >> { %2862 = vmatprep.subr.bf16.mxu0 %v7688_v3  ;;  %4213 = vmatprep.subr.bf16.mxu1 %v7573_v25 }
 0x3da   : >> { %2863 = vmatpush1.bf16.msra.mxu0 %v7689_v19  ;;  %4214 = vmatpush3.bf16.msra.mxu1 %v7690_v5 }
 0x3db   : >> { %2864 = vmatprep.subr.bf16.mxu0 %v7691_v16  ;;  %4215 = vmatprep.subr.bf16.mxu1 %v7573_v25 }
 0x3de   : >> { %2865 = vmatpush1.bf16.msra.mxu0 %v7692_v39  ;;  %4216 = vmatpush3.bf16.msra.mxu1 %v7693_v12  ;;  %v7701_v12 = vld [vmem:[#allocation266_spill] sm:$0xff] }
 0x3df   : >> { %2866 = vmatprep.subr.bf16.mxu0 %v7694_v37  ;;  %4217 = vmatprep.subr.bf16.mxu1 %v7573_v25 }
 0x3e2   : >> { %2867 = vmatpush1.bf16.msra.mxu0 %v7695_v33  ;;  %4218 = vmatpush3.bf16.msra.mxu1 %v7696_v18 }
 0x3e3   : >> { %2934 = vmatprep.subr.bf16.mxu0 %v7697_v26  ;;  %4223 = vmatprep.subr.bf16.mxu1 %v7573_v25 }
 0x465   : >> { %v2648_v48 = vpop.f32.mrf.mxu0  ;;  %v2689_v32 = vpop.f32.mrf.mxu1 }
 0x466   : >> { %v2649_v31 = vadd.f32 %v2648_v48, %v7698_v22  ;;  %v2690_v39 = vadd.f32 %v2689_v32, %v7656_v21 }
 0x467   : >> { %v2650_v2 = vpop.f32.mrf.mxu0  ;;  %v4181_v10 = vpop.f32.mrf.mxu1 }
 0x468   : >> { %v2787_v8 = vadd.f32 %v2649_v31, %v7699_v0  ;;  %v2651_v38 = vadd.f32 %v2650_v2, %v5856_v4 }
 0x469   : >> { %v2652_v62 = vpop.f32.mrf.mxu0  ;;  %v2692_v6 = vpop.f32.mrf.mxu1 }
 0x46a   : >> { %v3887_v14 = vmul.f32 -1.442695, %v2787_v8  ;;  %v2794_v43 = vadd.f32 %v2651_v38, %v7700_v60  ;;  %v7702_v8 = vld [vmem:[#allocation255_spill] sm:$0xff]  ;;  %v7703_v6 = vld [vmem:[#allocation268_spill] sm:$0xff] }
 0x46b   : >> { %v2653_v40 = vpop.f32.mrf.mxu0  ;;  %v4182_v13 = vpop.f32.mrf.mxu1 }
 0x46c   : >> { %4479 = vpow2.f32 %v3887_v14  ;;  %v3888_v7 = vmul.f32 -1.442695, %v2794_v43 }
 0x46e   : >> { %4481 = vpow2.f32 %v3888_v7 }
 0x479   : >> { %v4480_v52 = vpop.eup %4479 }
 0x47a   : >> { %v2791_v1 = vadd.f32 1.0, %v4480_v52 }
 0x47b   : >> { %v4482_v24 = vpop.eup %4481 }
 0x47c   : >> { %4483 = vrcp.f32 %v2791_v1  ;;  %v2798_v3 = vadd.f32 1.0, %v4482_v24  ;;  %v2811_v1 = vpop.permute.xlu0 %2810 }
 0x47d   : >> { %vm2812_vm13 = vcmp.eq.s32.totalorder %v2811_v1, 1 }
 0x47e   : >> { %4485 = vrcp.f32 %v2798_v3 }
 0x485   : >> { %v2730_v11 = vpop.f32.mrf.mxu0  ;;  %v2771_v17 = vpop.f32.mrf.mxu1 }
 0x486   : >> { %v2731_v19 = vadd.f32 %v2730_v11, %v7657_v29 }
 0x487   : >> { %v2732_v5 = vpop.f32.mrf.mxu0  ;;  %v4201_v16 = vpop.f32.mrf.mxu1 }
 0x488   : >> { %v2814_v37 = vadd.f32 %v2731_v19, %v7701_v12  ;;  %v2733_v2 = vadd.f32 %v2732_v5, %v7658_v28 }
 0x489   : >> { %v4484_v33 = vpop.eup %4483  ;;  %v2734_v18 = vpop.f32.mrf.mxu0 }
 0x48a   : >> { %v2774_v26 = vpop.f32.mrf.mxu1  ;;  %v2801_v48 = vmul.f32 %v4484_v33, %v2690_v39  ;;  %v3889_v31 = vmul.f32 -1.442695, %v2814_v37  ;;  %v2821_v14 = vadd.f32 %v2733_v2, %v7703_v6 }
 0x48b   : >> { %v2735_v10 = vpop.f32.mrf.mxu0  ;;  %v4486_v38 = vpop.eup %4485 }
 0x48c   : >> { %v4202_v0 = vpop.f32.mrf.mxu1  ;;  %v2802_v62 = vadd.f32 %v2801_v48, %v7702_v8  ;;  %4487 = vpow2.f32 %v3889_v31  ;;  %v3890_v32 = vmul.f32 -1.442695, %v2821_v14  ;;  %v2804_v60 = vsub.f32 1.0, %v4486_v38 }
 0x48d   : >> { %v2806_v52 = vmul.f32 %v4486_v38, %v6666_v61 }
 0x48e   : >> { %4489 = vtanh.f32 %v2802_v62  ;;  %v7707_v62 = vld [vmem:[#allocation263_spill] sm:$0xff] }
 0x48f   : >> { %4491 = vpow2.f32 %v3890_v32 }
 0x499   : >> { %v4488_v40 = vpop.eup %4487 }
 0x49a   : >> { %v2818_v13 = vadd.f32 1.0, %v4488_v40 }
 0x49b   : >> { %v4490_v43 = vpop.eup %4489 }
 0x49c   : >> { %4493 = vrcp.f32 %v2818_v13  ;;  %v2805_v7 = vmul.f32 %v4490_v43, %v2804_v60  ;;  %v4492_v5 = vpop.eup %4491 }
 0x49d   : >> { %v2825_v16 = vadd.f32 1.0, %v4492_v5 }
 0x49e   : >> { %v2807_v24 = vadd.f32 %v2806_v52, %v2805_v7  ;;  %v7708_v52 = vld [vmem:[#allocation256_spill] sm:$0xff] }
 0x49f   : >> { %4495 = vrcp.f32 %v2825_v16 }
 0x4a0   : >> { %v6763_v11 = vsel %vm2812_vm13, %v2807_v24, %v6666_v61  ;;  %v2841_v3 = vsel %vm2812_vm13, %v2807_v24, 0.0  ;;  %v2772_v61 = vadd.f32 %v2771_v17, %v7659_v63  ;;  %v7706_v17 = vld [vmem:[#allocation262_spill] sm:$0xff]  ;;  %v7709_v24 = vld [vmem:[#allocation265_spill] sm:$0xff] }
 0x4a1   : >> { %3893 = vst [vmem:[%s6568_s20 + $0x10] sm:$0xff] %v2841_v3  ;;  %v2851_v19 = vpack.c.bf16 %v6763_v11, %v6763_v11 }
 0x4a3   : >> { %2885 = vmatmul.mubr.bf16.vlgmr.msra.gmra.mxu0 %v2851_v19  ;;  %4220 = vmatmul.mubr.bf16.vlgmr.msra.gmra.mxu1 %v2851_v19 }
 0x4a4   : >> { %2935 = vmatpush1.bf16.msra.mxu0 %v6276_v9  ;;  %4224 = vmatpush3.bf16.msra.mxu1 %v6287_v36  ;;  %v7704_v9 = vld [vmem:[#allocation267_spill] sm:$0xff] }
 0x4a5   : >> { %2936 = vmatprep.subr.bf16.mxu0 %v6282_v41  ;;  %4225 = vmatprep.subr.bf16.mxu1 %v7573_v25 }
 0x4a6   : >> { %2966 = vmatprep.mubr.bf16.mxu0 %v7485_v23  ;;  %4239 = vmatprep.mubr.msk.bf16.mxu1 %vm4891_vm4, %v7573_v25 }
 0x4a8   : >> { %2937 = vmatpush1.bf16.msra.mxu0 %v6292_v20  ;;  %4226 = vmatpush3.bf16.msra.mxu1 %v6304_v45 }
 0x4a9   : >> { %v4494_v39 = vpop.eup %4493  ;;  %2938 = vmatprep.subr.bf16.mxu0 %v6298_v44  ;;  %4227 = vmatprep.subr.bf16.mxu1 %v7573_v25 }
 0x4aa   : >> { %v2828_v41 = vmul.f32 %v4494_v39, %v2772_v61 }
 0x4ac   : >> { %v2829_v36 = vadd.f32 %v2828_v41, %v7704_v9  ;;  %2939 = vmatpush1.bf16.msra.mxu0 %v6311_v27  ;;  %4228 = vmatpush3.bf16.msra.mxu1 %v6322_v47  ;;  %v4496_v23 = vpop.eup %4495  ;;  %v3049_v9 = vpop.permute.xlu0 %3048 }
 0x4ad   : >> { %2940 = vmatprep.subr.bf16.mxu0 %v6317_v46  ;;  %4229 = vmatprep.subr.bf16.mxu1 %v7573_v25  ;;  %v2831_v44 = vsub.f32 1.0, %v4496_v23  ;;  %vm3050_vm15 = vcmp.eq.s32.totalorder %v3049_v9, 1 }
 0x4ae   : >> { %4497 = vtanh.f32 %v2829_v36 }
 0x4b0   : >> { %2941 = vmatpush1.bf16.msra.mxu0 %v6327_v30  ;;  %4230 = vmatpush3.bf16.msra.mxu1 %v6338_v42 }
 0x4b1   : >> { %2942 = vmatprep.subr.bf16.mxu0 %v6333_v49  ;;  %4231 = vmatprep.subr.bf16.mxu1 %v7573_v25  ;;  %v2833_v49 = vmul.f32 %v4496_v23, %v6708_v15 }
 0x4b4   : >> { %2943 = vmatpush1.bf16.msra.mxu0 %v6343_v35  ;;  %4232 = vmatpush3.bf16.msra.mxu1 %v6354_v50 }
 0x4b5   : >> { %2944 = vmatprep.subr.bf16.mxu0 %v6349_v53  ;;  %4233 = vmatprep.subr.bf16.mxu1 %v7573_v25  ;;  %v2838_v53 = vpop.permute.xlu1 %2837 }
 0x4b6   : >> { %vm2839_vm14 = vcmp.eq.s32.totalorder %v2838_v53, 1 }
 0x4b8   : >> { %2945 = vmatpush1.bf16.msra.mxu0 %v6359_v51  ;;  %4234 = vmatpush3.bf16.msra.mxu1 %v6370_v55  ;;  %v7705_v51 = vld [vmem:[#allocation261_spill] sm:$0xff] }
 0x4b9   : >> { %2946 = vmatprep.subr.bf16.mxu0 %v7660_v34  ;;  %4235 = vmatprep.subr.bf16.mxu1 %v7573_v25 }
 0x4bb   : >> { %v4498_v45 = vpop.eup %4497 }
 0x4bc   : >> { %2947 = vmatpush1.bf16.msra.mxu0 %v6375_v54  ;;  %4236 = vmatpush3.bf16.msra.mxu1 %v6386_v57  ;;  %v2832_v47 = vmul.f32 %v4498_v45, %v2831_v44 }
 0x4bd   : >> { %2948 = vmatprep.subr.bf16.mxu0 %v6381_v59  ;;  %4237 = vmatprep.subr.bf16.mxu1 %v7573_v25 }
 0x4be   : >> { %v2834_v46 = vadd.f32 %v2833_v49, %v2832_v47 }
 0x4c0   : >> { %2949 = vmatpush1.bf16.msra.mxu0 %v6391_v58  ;;  %4238 = vmatpush3.bf16.msra.mxu1 %v6400_v56  ;;  %v6807_v30 = vsel %vm2839_vm14, %v2834_v46, %v6708_v15  ;;  %v2845_v27 = vsel %vm2839_vm14, %v2834_v46, 0.0 }
 0x4c1   : >> { %2848 = vst [vmem:[%s2847_s25] sm:$0xff] %v2845_v27  ;;  %v2933_v20 = vpack.c.bf16 %v6807_v30, %v6807_v30 }
 0x4c3   : >> { %2967 = vmatmul.mubr.bf16.vlgmr.msra.gmra.mxu0 %v2933_v20  ;;  %4240 = vmatmul.mubr.bf16.vlgmr.msra.gmra.mxu1 %v2933_v20 }
 0x563   : >> { %v2886_v59 = vpop.f32.mrf.mxu0  ;;  %v2927_v25 = vpop.f32.mrf.mxu1 }
 0x564   : >> { %v2887_v42 = vadd.f32 %v2886_v59, %v7698_v22  ;;  %v2928_v8 = vadd.f32 %v2927_v25, %v7656_v21  ;;  %v7711_v59 = vld [vmem:[#allocation264_spill] sm:$0xff] }
 0x565   : >> { %v2888_v35 = vpop.f32.mrf.mxu0  ;;  %v4221_v50 = vpop.f32.mrf.mxu1  ;;  %v4524_v21 = vld [vmem:[%s5212_s19 + $0x28] sm:$0xff] (%p1063_p4)  }
 0x566   : >> { %v3025_v55 = vadd.f32 %v2887_v42, %v7705_v51  ;;  %v2889_v58 = vadd.f32 %v2888_v35, %v5856_v4  ;;  %v3076_v51 = vpop.permute.xlu1 %3075  ;;  %v4523_v4 = vld [vmem:[%s5238_s24 + $0x28] sm:$0xff] (%p1063_p4)  }
 0x567   : >> { %v2890_v56 = vpop.f32.mrf.mxu0  ;;  %v2930_v54 = vpop.f32.mrf.mxu1  ;;  %vm3077_vm0 = vcmp.eq.s32.totalorder %v3076_v51, 1 }
 0x568   : >> { %v3895_v57 = vmul.f32 -1.442695, %v3025_v55  ;;  %v3032_v12 = vadd.f32 %v2889_v58, %v7706_v17  ;;  %v4892_v58 = vmov (%p1063_p4), 0.0   ;;  %v4522_v17 = vld [vmem:[%s5212_s19 + $0x30] sm:$0xff] (%p1063_p4)  }
 0x569   : >> { %v2891_v34 = vpop.f32.mrf.mxu0  ;;  %v4222_v15 = vpop.f32.mrf.mxu1  ;;  %4243 = vmatprep.subr.bf16.mxu0 (%p1063_p4), %v4892_v58  ;;  %4263 = vmatprep.subr.bf16.mxu1 (%p1063_p4), %v4892_v58 }
 0x56a   : >> { %4499 = vpow2.f32 %v3895_v57  ;;  %v3896_v37 = vmul.f32 -1.442695, %v3032_v12  ;;  %v4520_v34 = vld [vmem:[%s5212_s19 + $0x38] sm:$0xff] (%p1063_p4)   ;;  %v4521_v15 = vld [vmem:[%s5238_s24 + $0x30] sm:$0xff] (%p1063_p4)   ;;  %4259 = vmatprep.mubr.msk.bf16.mxu0 (%p1063_p4), %vm4893_vm1, %v4892_v58  ;;  %4279 = vmatprep.mubr.msk.bf16.mxu1 (%p1063_p4), %vm4893_vm1, %v4892_v58 }
 0x56b   : > { %4264 = vmatpush3.bf16.msra.mxu1 (%p1063_p4), %v4520_v34 }
 0x56c   : >> { %4501 = vpow2.f32 %v3896_v37  ;;  %4265 = vmatprep.subr.bf16.mxu1 (%p1063_p4), %v4892_v58  ;;  %v4529_v37 = vld [vmem:[%s5238_s24 + $0x10] sm:$0xff] (%p1063_p4)  }
 0x56f   : > { %4266 = vmatpush3.bf16.msra.mxu1 (%p1063_p4), %v4522_v17 }
 0x570   : > { %4267 = vmatprep.subr.bf16.mxu1 (%p1063_p4), %v4892_v58 }
 0x573   : > { %4268 = vmatpush3.bf16.msra.mxu1 (%p1063_p4), %v4524_v21 }
 0x574   : > { %4269 = vmatprep.subr.bf16.mxu1 (%p1063_p4), %v4892_v58 }
 0x577   : >> { %v4500_v33 = vpop.eup %4499 }
 0x578   : >> { %v3029_v18 = vadd.f32 1.0, %v4500_v33  ;;  %v4530_v33 = vld [vmem:[%s5212_s19 + $0x10] sm:$0xff] (%p1063_p4)  }
 0x579   : >> { %v4502_v22 = vpop.eup %4501 }
 0x57a   : >> { %4503 = vrcp.f32 %v3029_v18  ;;  %v3036_v31 = vadd.f32 1.0, %v4502_v22  ;;  %v4531_v18 = vld [vmem:[%s5238_s24 + $0x8] sm:$0xff] (%p1063_p4)  }
 0x57b   : > { %v4532_v22 = vld [vmem:[%s5212_s19 + $0x8] sm:$0xff] (%p1063_p4)  }
 0x57c   : >> { %4505 = vrcp.f32 %v3036_v31 }
 0x583   : >> { %v2968_v26 = vpop.f32.mrf.mxu0  ;;  %v3009_v48 = vpop.f32.mrf.mxu1 }
 0x584   : >> { %v2969_v2 = vadd.f32 %v2968_v26, %v7657_v29  ;;  %v3010_v46 = vadd.f32 %v3009_v48, %v7659_v63  ;;  %v4525_v29 = vld [vmem:[%s5238_s24 + $0x20] sm:$0xff] (%p1063_p4)   ;;  %v4527_v63 = vld [vmem:[%s5238_s24 + $0x18] sm:$0xff] (%p1063_p4)  }
 0x585   : >> { %v2970_v10 = vpop.f32.mrf.mxu0  ;;  %v4241_v0 = vpop.f32.mrf.mxu1  ;;  %v4533_v26 = vld [vmem:[%s5238_s24] sm:$0xff] (%p1063_p4)  }
 0x586   : >> { %v3052_v6 = vadd.f32 %v2969_v2, %v7707_v62  ;;  %v2971_v60 = vadd.f32 %v2970_v10, %v7658_v28  ;;  %v4526_v28 = vld [vmem:[%s5212_s19 + $0x20] sm:$0xff] (%p1063_p4)   ;;  %v3087_v0 = vld [vmem:[#allocation7] sm:$0xff] (%p1063_p4) }
 0x587   : >> { %v4504_v14 = vpop.eup %4503  ;;  %v2972_v32 = vpop.f32.mrf.mxu0  ;;  %4270 = vmatpush3.bf16.msra.mxu1 (%p1063_p4), %v4526_v28  ;;  %v4534_v48 = vld [vmem:[%s5212_s19] sm:$0xff] (%p1063_p4)  }
 0x588   : >> { %v3012_v38 = vpop.f32.mrf.mxu1  ;;  %v3039_v40 = vmul.f32 %v4504_v14, %v2928_v8  ;;  %v3897_v13 = vmul.f32 -1.442695, %v3052_v6  ;;  %v3059_v3 = vadd.f32 %v2971_v60, %v7709_v24  ;;  %4271 = vmatprep.subr.bf16.mxu1 (%p1063_p4), %v4892_v58 }
 0x589   : >> { %v2973_v43 = vpop.f32.mrf.mxu0  ;;  %v4506_v5 = vpop.eup %4505 }
 0x58a   : >> { %v4242_v7 = vpop.f32.mrf.mxu1  ;;  %v3040_v1 = vadd.f32 %v3039_v40, %v7708_v52  ;;  %4507 = vpow2.f32 %v3897_v13  ;;  %v3898_v19 = vmul.f32 -1.442695, %v3059_v3  ;;  %v3042_v61 = vsub.f32 1.0, %v4506_v5 }
 0x58b   : >> { %v3044_v23 = vmul.f32 %v4506_v5, %v6763_v11 }
 0x58c   : >> { %4509 = vtanh.f32 %v3040_v1 }
 0x58d   : >> { %4511 = vpow2.f32 %v3898_v19 }
 0x597   : >> { %v4508_v16 = vpop.eup %4507 }
 0x598   : >> { %v3056_v39 = vadd.f32 1.0, %v4508_v16 }
 0x599   : >> { %v4510_v41 = vpop.eup %4509 }
 0x59a   : >> { %v3043_v36 = vmul.f32 %v4510_v41, %v3042_v61  ;;  %4513 = vrcp.f32 %v3056_v39  ;;  %v4512_v49 = vpop.eup %4511 }
 0x59b   : >> { %v3063_v53 = vadd.f32 1.0, %v4512_v49 }
 0x59c   : >> { %v3045_v44 = vadd.f32 %v3044_v23, %v3043_v36 }
 0x59d   : >> { %4515 = vrcp.f32 %v3063_v53 }
 0x59e   : >> { %v6823_v52 = vsel %vm3050_vm15, %v3045_v44, %v6763_v11   ;;  %v3079_v47 = vsel %vm3050_vm15, %v3045_v44, 0.0 }
 0x59f   : >> { %v7710_v45 = vmov %v6823_v52  ;;  %3901 = vst [vmem:[%s6568_s20 + $0x18] sm:$0xff] %v3079_v47 }
 0x5a0   : >> { %v7714_v52 = vmov %v7710_v45  ;;  %v3088_v2 = vpack.c.bf16 (%p1063_p4), %v7710_v45, %v7710_v45 }
 0x5a7   : >> { %v4514_v27 = vpop.eup %4513 }
 0x5a8   : >> { %v3066_v20 = vmul.f32 %v4514_v27, %v3010_v46 }
 0x5aa   : >> { %v3067_v25 = vadd.f32 %v3066_v20, %v7711_v59  ;;  %v4516_v42 = vpop.eup %4515 }
 0x5ab   : >> { %v3069_v35 = vsub.f32 1.0, %v4516_v42  ;;  %v3071_v55 = vmul.f32 %v4516_v42, %v6807_v30 }
 0x5ac   : >> { %4517 = vtanh.f32 %v3067_v25 }
 0x5b9   : >> { %v4518_v50 = vpop.eup %4517 }
 0x5ba   : >> { %v3070_v11 = vmul.f32 %v4518_v50, %v3069_v35 }
 0x5bc   : >> { %v3072_v56 = vadd.f32 %v3071_v55, %v3070_v11  ;;  %1065 = sbr.rel (!%p1063_p4) target bundleno = 286 (0x11e), region = 228 }
 0x5be   : >> { %v6832_v12 = vsel %vm3077_vm0, %v3072_v56, %v6807_v30   ;;  %v3083_v57 = vsel %vm3077_vm0, %v3072_v56, 0.0  ;;  %v4519_v30 = vld [vmem:[%s5238_s24 + $0x38] sm:$0xff] (%p1063_p4)  }
 0x5bf   : >> { %v7712_v54 = vmov %v6832_v12  ;;  %3086 = vst [vmem:[%s3085_s7] sm:$0xff] %v3083_v57  ;;  %4244 = vmatpush3.bf16.msra.mxu0 (%p1063_p4), %v4519_v30 }
 0x5c0   : >> { %v7713_v12 = vmov %v7712_v54  ;;  %4245 = vmatprep.subr.bf16.mxu0 (%p1063_p4), %v4892_v58  ;;  %v3105_v31 = vpack.c.bf16 (%p1063_p4), %v7712_v54, %v7712_v54 }
 0x5c1   : > { %v4528_v12 = vld [vmem:[%s5212_s19 + $0x18] sm:$0xff]  }
 0x5c2   : > { %4272 = vmatpush3.bf16.msra.mxu1 %v4528_v12 }
 0x5c3   : > { %4246 = vmatpush3.bf16.msra.mxu0 %v4521_v15  ;;  %4273 = vmatprep.subr.bf16.mxu1 %v4892_v58 }
 0x5c4   : > { %4247 = vmatprep.subr.bf16.mxu0 %v4892_v58 }
 0x5c6   : > { %4274 = vmatpush3.bf16.msra.mxu1 %v4530_v33 }
 0x5c7   : > { %4248 = vmatpush3.bf16.msra.mxu0 %v4523_v4  ;;  %4275 = vmatprep.subr.bf16.mxu1 %v4892_v58 }
 0x5c8   : > { %4249 = vmatprep.subr.bf16.mxu0 %v4892_v58 }
 0x5ca   : > { %4276 = vmatpush3.bf16.msra.mxu1 %v4532_v22 }
 0x5cb   : > { %4250 = vmatpush3.bf16.msra.mxu0 %v4525_v29  ;;  %4277 = vmatprep.subr.bf16.mxu1 %v4892_v58 }
 0x5cc   : > { %4251 = vmatprep.subr.bf16.mxu0 %v4892_v58 }
 0x5ce   : > { %4278 = vmatpush3.bf16.msra.mxu1 %v4534_v48 }
 0x5cf   : > { %4252 = vmatpush3.bf16.msra.mxu0 %v4527_v63 }
 0x5d0   : > { %4253 = vmatprep.subr.bf16.mxu0 %v4892_v58 }
 0x5d1   : > { %4280 = vmatmul.mubr.bf16.vlgmr.msra.gmra.mxu1 %v3088_v2 }
 0x5d3   : > { %4254 = vmatpush3.bf16.msra.mxu0 %v4529_v37 }
 0x5d4   : > { %4255 = vmatprep.subr.bf16.mxu0 %v4892_v58 }
 0x5d7   : > { %4256 = vmatpush3.bf16.msra.mxu0 %v4531_v18 }
 0x5d8   : > { %4257 = vmatprep.subr.bf16.mxu0 %v4892_v58 }
 0x5db   : > { %4258 = vmatpush3.bf16.msra.mxu0 %v4533_v26 }
 0x5de   : > { %4260 = vmatmul.mubr.bf16.vlgmr.msra.gmra.mxu0 %v3105_v31 }
 0x691   : > { %v3292_v8 = vpop.f32.mrf.mxu1 }
 0x693   : > { %v4281_v14 = vpop.f32.mrf.mxu1 }
 0x695   : > { %v3295_v40 = vpop.f32.mrf.mxu1 }
 0x697   : > { %v4282_v60 = vpop.f32.mrf.mxu1 }
 0x69e   : > { %v3204_v10 = vpop.f32.mrf.mxu0 }
 0x69f   : > { %v3293_v62 = vadd.f32 %v3292_v8, %v3204_v10 }
 0x6a0   : > { %v4261_v6 = vpop.f32.mrf.mxu0  ;;  %3303 = sbr.rel (%p3919_p9) target bundleno = 1710 (0x6ae), region = 115 }
 0x6a1   : > { %v3298_v32 = vadd.f32 %v3293_v62, %v3087_v0 }
 0x6a2   : > { %v3207_v38 = vpop.f32.mrf.mxu0 }
 0x6a3   : > { %3299 = vst [vmem:[#allocation7] sm:$0xff] %v3298_v32 }
 0x6a4   : > { %v4262_v13 = vpop.f32.mrf.mxu0 }
 0x6a5   : > { %v3304_v43 = vld [vmem:[#allocation3] sm:$0xff]  ;;  %v3305_v7 = vld [vmem:[#allocation3 + $0x8] sm:$0xff]  ;;  %v3306_v52 = vld [vmem:[#allocation3 + $0x10] sm:$0xff] }
 0x6a6   : > { %3312 = vst [vmem:[#allocation2] sm:$0xff] %v3304_v43  ;;  %3313 = vst [vmem:[#allocation2 + $0x10] sm:$0xff] %v3305_v7  ;;  %v3307_v1 = vld [vmem:[#allocation3 + $0x18] sm:$0xff]  ;;  %v3308_v24 = vld [vmem:[#allocation3 + $0x20] sm:$0xff] }
 0x6a7   : > { %3314 = vst [vmem:[#allocation2 + $0x20] sm:$0xff] %v3306_v52  ;;  %v3309_v3 = vld [vmem:[#allocation3 + $0x28] sm:$0xff]  ;;  %3315 = vst [vmem:[#allocation2 + $0x30] sm:$0xff] %v3307_v1  ;;  %v3310_v19 = vld [vmem:[#allocation3 + $0x30] sm:$0xff] }
 0x6a8   : > { %3316 = vst [vmem:[#allocation2 + $0x40] sm:$0xff] %v3308_v24  ;;  %3317 = vst [vmem:[#allocation2 + $0x50] sm:$0xff] %v3309_v3  ;;  %v3311_v5 = vld [vmem:[#allocation3 + $0x38] sm:$0xff]  ;;  %v3320_v16 = vld [vmem:[#allocation4] sm:$0xff] }
 0x6a9   : > { %3318 = vst [vmem:[#allocation2 + $0x60] sm:$0xff] %v3310_v19  ;;  %3319 = vst [vmem:[#allocation2 + $0x70] sm:$0xff] %v3311_v5  ;;  %v3321_v61 = vld [vmem:[#allocation4 + $0x8] sm:$0xff]  ;;  %v3322_v39 = vld [vmem:[#allocation4 + $0x10] sm:$0xff] }
 0x6aa   : > { %3328 = vst [vmem:[#allocation2 + $0x8] sm:$0xff] %v3320_v16  ;;  %v3323_v41 = vld [vmem:[#allocation4 + $0x18] sm:$0xff]  ;;  %3329 = vst [vmem:[#allocation2 + $0x18] sm:$0xff] %v3321_v61  ;;  %v3324_v9 = vld [vmem:[#allocation4 + $0x20] sm:$0xff] }
 0x6ab   : > { %3330 = vst [vmem:[#allocation2 + $0x28] sm:$0xff] %v3322_v39  ;;  %3331 = vst [vmem:[#allocation2 + $0x38] sm:$0xff] %v3323_v41  ;;  %v3325_v36 = vld [vmem:[#allocation4 + $0x28] sm:$0xff]  ;;  %v3326_v23 = vld [vmem:[#allocation4 + $0x30] sm:$0xff] }
 0x6ac   : > { %3332 = vst [vmem:[#allocation2 + $0x48] sm:$0xff] %v3324_v9  ;;  %3333 = vst [vmem:[#allocation2 + $0x58] sm:$0xff] %v3325_v36  ;;  %v3327_v44 = vld [vmem:[#allocation4 + $0x38] sm:$0xff] }
 0x6ad   : > { %3334 = vst [vmem:[#allocation2 + $0x68] sm:$0xff] %v3326_v23  ;;  %3335 = vst [vmem:[#allocation2 + $0x78] sm:$0xff] %v3327_v44 }
 0x6ae PF: > { %p3920_p10 = scmp.ne.s32.totalorder %s4853_s16, 1 }
 0x6af   : > { %s7715_s24 = sld [smem:[#allocation282_spill]] (!%p3920_p10) }
 0x6b0   : > { %3339 = sbr.rel (%p3920_p10) target bundleno = 1743 (0x6cf), region = 119 }
 0x6b5   : > { %v3340_v45 = vld [vmem:[#allocation3] sm:$0xff]  ;;  %v3341_v47 = vld [vmem:[#allocation3 + $0x8] sm:$0xff]  ;;  %v3342_v49 = vld [vmem:[#allocation3 + $0x10] sm:$0xff] }
 0x6b6   : > { %3348 = vst [vmem:[#allocation20] sm:$0xff] %v3340_v45  ;;  %3349 = vst [vmem:[#allocation20 + $0x10] sm:$0xff] %v3341_v47  ;;  %v3343_v53 = vld [vmem:[#allocation3 + $0x18] sm:$0xff]  ;;  %v3344_v46 = vld [vmem:[#allocation3 + $0x20] sm:$0xff] }
 0x6b7   : > { %3350 = vst [vmem:[#allocation20 + $0x20] sm:$0xff] %v3342_v49  ;;  %v3345_v27 = vld [vmem:[#allocation3 + $0x28] sm:$0xff]  ;;  %3351 = vst [vmem:[#allocation20 + $0x30] sm:$0xff] %v3343_v53  ;;  %v3346_v20 = vld [vmem:[#allocation3 + $0x30] sm:$0xff] }
 0x6b8   : > { %3352 = vst [vmem:[#allocation20 + $0x40] sm:$0xff] %v3344_v46  ;;  %3353 = vst [vmem:[#allocation20 + $0x50] sm:$0xff] %v3345_v27  ;;  %v3347_v59 = vld [vmem:[#allocation3 + $0x38] sm:$0xff]  ;;  %v3356_v25 = vld [vmem:[#allocation4] sm:$0xff] }
 0x6b9   : > { %3354 = vst [vmem:[#allocation20 + $0x60] sm:$0xff] %v3346_v20  ;;  %3355 = vst [vmem:[#allocation20 + $0x70] sm:$0xff] %v3347_v59  ;;  %v3357_v42 = vld [vmem:[#allocation4 + $0x8] sm:$0xff]  ;;  %v3358_v35 = vld [vmem:[#allocation4 + $0x10] sm:$0xff] }
 0x6ba   : > { %3364 = vst [vmem:[#allocation20 + $0x8] sm:$0xff] %v3356_v25  ;;  %v3359_v50 = vld [vmem:[#allocation4 + $0x18] sm:$0xff]  ;;  %3365 = vst [vmem:[#allocation20 + $0x18] sm:$0xff] %v3357_v42  ;;  %v3360_v51 = vld [vmem:[#allocation4 + $0x20] sm:$0xff] }
 0x6bb   : > { %3366 = vst [vmem:[#allocation20 + $0x28] sm:$0xff] %v3358_v35  ;;  %3367 = vst [vmem:[#allocation20 + $0x38] sm:$0xff] %v3359_v50  ;;  %v3361_v11 = vld [vmem:[#allocation4 + $0x28] sm:$0xff]  ;;  %v3362_v55 = vld [vmem:[#allocation4 + $0x30] sm:$0xff] }
 0x6bc   : > { %3368 = vst [vmem:[#allocation20 + $0x48] sm:$0xff] %v3360_v51  ;;  %3369 = vst [vmem:[#allocation20 + $0x58] sm:$0xff] %v3361_v11  ;;  %v3363_v56 = vld [vmem:[#allocation4 + $0x38] sm:$0xff]  ;;  %v3372_v54 = vld [vmem:[#allocation7] sm:$0xff] }
 0x6bd   : > { %3370 = vst [vmem:[#allocation20 + $0x68] sm:$0xff] %v3362_v55  ;;  %v3921_v57 = vld [vmem:[%s7715_s24] ss:$0 sm:$0xff]  ;;  %3371 = vst [vmem:[#allocation20 + $0x78] sm:$0xff] %v3363_v56 }
 0x6be   : > { %v3380_v30 = vadd.f32 %v3921_v57, %v3372_v54 }
 0x6c0   : > { %4535 = vtanh.f32 %v3380_v30 }
 0x6cd   : > { %v4536_v58 = vpop.eup %4535 }
 0x6ce   : > { %3382 = vst [vmem:[#allocation21] sm:$0xff] %v4536_v58 }
 0x6cf PF: > { %p4344_p2 = scmp.eq.s32.totalorder %s5101_s12, 1  ;;  %s4894_s6 = smov [#allocation20]  }
 0x6d0   : > { %s3392_s27 = sshll.u32 %s4894_s6, 4  ;;  %s3393_s27 = int_to_ptr.vmem [resolvable:$true] %s3392_s27 }
 0x6d1   : > { %s4731_s23 = scalar_lea.vmem %s3393_s27, 2048  ;;  %p4738_p12 = scmp.lt.s32.totalorder %s3393_s27, %s3393_s27 }
 0x6d2   : > { %p4732_p3 = scmp.ne.s32.totalorder %s3393_s27, %s4731_s23  ;;  %p4739_p11 = scmp.lt.s32.totalorder %s4731_s23, %s4731_s23 }
 0x6d4   : > { %p4733_p5 = pnand %p4732_p3, %p4344_p2  ;;  %p4740_p13 = por %p4739_p11, %p4738_p12 }
 0x6d6   : > { %p4734_p8 = pneg %p4733_p5 }
 0x6d8   : > { %p4741_p0 = pnand %p4740_p13, %p4734_p8 }
 0x6da   : > { %4744 = shalt.err (!%p4741_p0)
}
 0x6db   : > { %s4895_s1 = smov 256   ;;  %s4896_s22 = smov 16  }
 0x6dc   : > { %s7716_s3 = sld [smem:[#allocation283_spill]]  ;;  %s4897_s15 = smov [#allocation21]  }
 0x6dd   : > { %s3408_s0 = sshll.u32 %s4897_s15, 4  ;;  %s3409_s0 = int_to_ptr.vmem [resolvable:$true] %s3408_s0 }
 0x6de   : > { %s4755_s28 = scalar_lea.vmem %s3409_s0, 128  ;;  %p4762_p4 = scmp.lt.s32.totalorder %s3409_s0, %s3409_s0 }
 0x6df   : > { %p4756_p1 = scmp.ne.s32.totalorder %s3409_s0, %s4755_s28  ;;  %p4763_p9 = scmp.lt.s32.totalorder %s4755_s28, %s4755_s28 }
 0x6e1   : > { %p4757_p6 = pnand %p4756_p1, %p4344_p2  ;;  %p4764_p10 = por %p4763_p9, %p4762_p4 }
 0x6e2   : > { %4311 = dma.vmem_to_hbm [thread:$0]  (%p4344_p2), %s3393_s27, 2048, %s7716_s3, [#allocation10], %s4895_s1, %s4895_s1, %s4896_s22  }
 0x6e3   : > { %p4758_p7 = pneg %p4757_p6 }
 0x6e5   : > { %p4765_p3 = pnand %p4764_p10, %p4758_p7 }
 0x6e7   : > { %4768 = shalt.err (!%p4765_p3)
}
 0x6e8   : > { %s7717_s20 = sld [smem:[#allocation284_spill]] }
 0x6ee   : > { %4313 = dma.vmem_to_hbm [thread:$0]  (%p4344_p2), %s3409_s0, 128, %s7717_s20, [#allocation22]  }
 0x6ef   : > { %4832 = dma.done.wait (%p4344_p2), [#allocation10], 2048  }
 0x6f0   : > { %4834 = vsyncadd (%p4344_p2), [#allocation10], 4294965248 }
 0x6f1   : > { %4836 = dma.done.wait (%p4344_p2), [#allocation22], 128  }
 0x6f2   : > { %4838 = vsyncadd (%p4344_p2), [#allocation22], 4294967168 }
 0x6f3 PF: > { %s37_s18 = sadd.s32 1, %s4861_s18   ;;  %s7718_s21 = sld [smem:[#allocation29_spill]] }
 0x6f4   : > { %p34_p5 = scmp.ge.s32.totalorder %s37_s18, 4   ;;  %s7719_s15 = sld [smem:[#allocation31_spill]] }
 0x6f5   : > { %s7720_s4 = sld [smem:[#allocation30_spill]]  ;;  %s7721_s29 = smov %s4845_s30 }
 0x6f6   : > { %s7723_s16 = smov %s4857_s17 }
 0x6f7   :  { %36 = sbr.rel (!%p34_p5) target bundleno = 25 (0x19), region = 239 }
 0x6f9   : > { %s7722_s30 = smov %s7718_s21 }
 0x6fb   : > { %s7724_s17 = smov %s7720_s4 }
 0x6fc   :  { %3425 = vsyncpa [#allocation9], 1 }
 0x6fd   :  { %3427 = vsyncpa [#allocation9 + $0x1], 1 }
 0x6fe   :  { %3428 = vsyncpa [#allocation12], 1 }
 0x6ff   :  { %3430 = vsyncpa [#allocation12 + $0x1], 1 }
 0x700   :  { %3431 = vsyncpa [#allocation15], 1 }
 0x701   :  { %3433 = vsyncpa [#allocation15 + $0x1], 1 }
 0x702   :  { %3434 = vsyncpa [#allocation18], 1 }
 0x703   :  { %3436 = vsyncpa [#allocation18 + $0x1], 1 }
 0x704   :  { %3437 = vsyncpa [#allocation10], 1 }
 0x705   :  { %3439 = vsyncpa [#allocation10 + $0x1], 1 }
 0x706   :  { %3440 = vsyncpa [#allocation22], 1 }

</bundles_post_ra>
